<compile_context>
chip_gen: v6e
topology: v6e:2x2x1
jax: 0.10.0
libtpu: 0.0.40
codegen_flags: <defaults>
</compile_context>

<pallas_src>
import functools

import jax
import jax.numpy as jnp
from jax import lax
from jax.experimental import pallas as pl
from jax.experimental.pallas import tpu as pltpu


def _round_up(x, m):
    return ((x + m - 1) // m) * m


# ----------------------------------------------------------------------------
# Pallas kernel: lane-dense conv matmul + bias
#   out(Cout, tm) = W(Cout, K) @ patches(K, tm) + b(Cout, 1)
# ----------------------------------------------------------------------------
def _conv_mm_kernel(w_ref, p_ref, b_ref, o_ref):
    acc = jnp.dot(w_ref[...], p_ref[...], preferred_element_type=jnp.float32)
    o_ref[...] = (acc + b_ref[...]).astype(o_ref.dtype)


def conv_matmul_bias(wt, patches_t, bias, out_dtype=jnp.float32):
    """wt: (Cout, K), patches_t: (K, M), bias: (Cout,) -> (Cout, M)."""
    cout, kdim = wt.shape
    m = patches_t.shape[1]
    # Lane tile capped at 4096 (K is tiny, so per-step overhead dominated the
    # old 512 cap); pixel dim on lanes so stores are unmasked.
    tm = min(_round_up(m, 128), 4096)
    m_pad = _round_up(m, tm)
    if m_pad != m:
        patches_t = jnp.pad(patches_t, ((0, 0), (0, m_pad - m)))
    w_b = wt.astype(jnp.bfloat16)          # bf16 MXU operands, f32 accumulation
    p_b = patches_t.astype(jnp.bfloat16)
    b2 = bias.reshape(cout, 1).astype(jnp.float32)
    out = pl.pallas_call(
        _conv_mm_kernel,
        out_shape=jax.ShapeDtypeStruct((cout, m_pad), out_dtype),
        grid_spec=pltpu.PrefetchScalarGridSpec(
            num_scalar_prefetch=0,
            grid=(m_pad // tm,),
            in_specs=[
                pl.BlockSpec((cout, kdim), lambda i: (0, 0)),
                pl.BlockSpec((kdim, tm), lambda i: (0, i)),
                pl.BlockSpec((cout, 1), lambda i: (0, 0)),
            ],
            out_specs=pl.BlockSpec((cout, tm), lambda i: (0, i)),
        ),
        compiler_params=pltpu.CompilerParams(dimension_semantics=("parallel",)),
    )(w_b, p_b, b2)
    return out[:, :m]


# ----------------------------------------------------------------------------
# Convolution glue (im2col producing the K x M layout the kernel consumes)
# ----------------------------------------------------------------------------
def _im2col_t(x, k, stride, pad_tl, pad_br):
    # TODO(synk): patches are still materialized in HBM (9x inflation); an
    # in-kernel shifted-load conv (v5e HBM-bandwidth win) is left for later.
    bsz, c, h, w = x.shape
    xp = jnp.pad(x, ((0, 0), (0, 0), (pad_tl, pad_br), (pad_tl, pad_br)))
    hp, wp = h + pad_tl + pad_br, w + pad_tl + pad_br
    hout = (hp - k) // stride + 1
    wout = (wp - k) // stride + 1
    cols = []
    for ky in range(k):
        for kx in range(k):
            cols.append(xp[:, :, ky:ky + stride * hout:stride,
                           kx:kx + stride * wout:stride])
    pat = jnp.stack(cols, axis=0)                      # (k*k, B, C, hout, wout)
    pat = pat.transpose(2, 0, 1, 3, 4)                 # (C, k*k, B, hout, wout)
    patches_t = pat.reshape(c * k * k, bsz * hout * wout)
    return patches_t, hout, wout


def conv2d_nchw(x, weight, bias, *, stride, pad_tl, pad_br=None,
                out_dtype=jnp.float32):
    # weight: (Cout, Cin, k, k)  (PyTorch Conv2d layout)
    if pad_br is None:
        pad_br = pad_tl
    bsz = x.shape[0]
    cout, _, k, _ = weight.shape
    patches_t, hout, wout = _im2col_t(x, k, stride, pad_tl, pad_br)
    wt = weight.reshape(cout, -1)                      # (Cout, Cin*k*k)
    y = conv_matmul_bias(wt, patches_t, bias, out_dtype=out_dtype)
    return y.reshape(cout, bsz, hout, wout).transpose(1, 0, 2, 3)


def conv_transpose2d(x, weight, bias, *, stride, pad, output_pad):
    # weight: (Cin, Cout, k, k)  (PyTorch ConvTranspose2d layout)
    # TODO(synk): zero-dilated formulation pays ~4x matmul FLOPs / patch bytes;
    # a sub-pixel (4-parity-conv) decomposition would remove the zeros.
    bsz, cin, h, w = x.shape
    k = weight.shape[2]
    hd = (h - 1) * stride + 1
    wd = (w - 1) * stride + 1
    xd = jnp.zeros((bsz, cin, hd, wd), x.dtype).at[:, :, ::stride, ::stride].set(x)
    w_flip = jnp.flip(weight, axis=(2, 3)).transpose(1, 0, 2, 3)   # (Cout, Cin, k, k)
    pt = k - 1 - pad
    return conv2d_nchw(xd, w_flip, bias, stride=1, pad_tl=pt, pad_br=pt + output_pad)


# ----------------------------------------------------------------------------
# Fused graph kernel: adjacency (7-NN) + 2-head GAT + output GAT, one batch
# element per grid step.  Everything is channel-major (F, Npad); the (N, N)
# adjacency lives only in VMEM.
# ----------------------------------------------------------------------------
def _graph_kernel(y_ref, w01_ref, wout_ref, asrc_ref, adst_ref, o_ref,
                  *, alpha, k_nn, n_valid):
    yt = y_ref[0].astype(jnp.float32)                  # (F, Np) channel-major
    fdim, n_pad = yt.shape

    # ---- adjacency: k_nn nearest neighbours (incl. self) per row ------------
    yy = yt * yt
    s_row = jnp.sum(yy, axis=0, keepdims=True)                          # (1, Np)
    ones_f = jnp.ones((fdim, 1), jnp.float32)
    s_col = lax.dot_general(yy, ones_f, (((0,), (0,)), ((), ())),
                            preferred_element_type=jnp.float32)         # (Np, 1)
    gram = lax.dot_general(yt, yt, (((0,), (0,)), ((), ())),
                           preferred_element_type=jnp.float32)          # (Np, Np), f32
    d2 = jnp.maximum(s_col + s_row - 2.0 * gram, 0.0)

    # Packed key: bit pattern of (1 + d2) with the low idx_bits replaced by the
    # column id.  Non-negative f32 bits order like ints, so ONE float row-min
    # per pass yields both the min distance and its column (7 reduces total).
    col_ids = lax.broadcasted_iota(jnp.int32, (n_pad, n_pad), 1)
    idx_bits = max(1, (n_pad - 1).bit_length())
    low_mask = (1 << idx_bits) - 1
    big = jnp.float32(3.0e38)
    valid = col_ids < n_valid                          # padded cols never selectable
    key_bits = (pltpu.bitcast(d2 + 1.0, jnp.int32) & jnp.int32(~low_mask)) | col_ids
    key0 = jnp.where(valid, pltpu.bitcast(key_bits, jnp.float32), big)

    def knn_body(_, keym):
        row_min = jnp.min(keym, axis=-1, keepdims=True)                 # (Np, 1)
        picked = pltpu.bitcast(row_min, jnp.int32) & low_mask           # column id
        return jnp.where(col_ids == picked, big, keym)                  # mark taken

    keym = lax.fori_loop(0, k_nn, knn_body, key0, unroll=True)
    adj_pos = (keym >= jnp.float32(1.0e38)) & valid                     # selected
    neg_big = jnp.float32(-9e15)

    a_src_all = asrc_ref[...]                                           # (F, 3)
    a_dst_all = adst_ref[...]                                           # (3, F)

    # ---- one GraphAttentionLayer, fully channel-major ------------------------
    def att(wh_cm, head):
        a_src = a_src_all[:, head:head + 1]                             # (Fo, 1)
        a_dst = a_dst_all[head:head + 1, :]                             # (1, Fo)
        f1 = lax.dot_general(wh_cm, a_src, (((0,), (0,)), ((), ())),
                             preferred_element_type=jnp.float32)        # (Np, 1)
        f2 = lax.dot_general(a_dst, wh_cm, (((1,), (0,)), ((), ())),
                             preferred_element_type=jnp.float32)        # (1, Np)
        e = f1 + f2                                                     # (Np, Np)
        e = jnp.where(e > 0.0, e, alpha * e)                            # LeakyReLU
        e = jnp.where(adj_pos, e, neg_big)                              # mask
        e = e - jnp.max(e, axis=-1, keepdims=True)                      # stable
        p = jnp.exp(e)
        p = p * pl.reciprocal(jnp.sum(p, axis=-1, keepdims=True), approx=True)
        # TODO(synk): attention/feature dropout (p=0.6) skipped (eval mode).
        h = lax.dot_general(wh_cm.astype(jnp.bfloat16), p.astype(jnp.bfloat16),
                            (((1,), (1,)), ((), ())),
                            preferred_element_type=jnp.float32)         # (Fo, Np)
        # ELU; exp(min(h,0)) avoids +inf in the untaken branch.
        return jnp.where(h > 0.0, h, jnp.exp(jnp.minimum(h, 0.0)) - 1.0)

    # ---- two heads from one stacked matmul, then output attention -----------
    wh_all = lax.dot_general(w01_ref[...], yt, (((0,), (0,)), ((), ())),
                             preferred_element_type=jnp.float32)        # (2F, Np)
    h0 = att(wh_all[0:fdim], 0)
    h1 = att(wh_all[fdim:2 * fdim], 1)
    hc = jnp.concatenate([h0, h1], axis=0)                              # (2F, Np)

    wh_o = lax.dot_general(wout_ref[...], hc, (((0,), (0,)), ((), ())),
                           preferred_element_type=jnp.float32)          # (F, Np)
    o_ref[0] = att(wh_o, 2)                                             # (F, Np)


def graph_gat(y_cm, p, *, alpha=0.2, k_neighbors=7):
    """y_cm: (B, F, N) channel-major node features -> (B, F, N) float32."""
    bsz, fdim, n = y_cm.shape
    n_pad = _round_up(n, 128)        # lane-dense loads/stores; padded cols masked
    if n_pad != n:
        y_cm = jnp.pad(y_cm, ((0, 0), (0, 0), (0, n_pad - n)))
    w01 = jnp.concatenate([p["att0_W"], p["att1_W"]], axis=1).astype(jnp.float32)
    wout = p["out_W"].astype(jnp.float32)                               # (2F, F)
    asrc = jnp.stack([p["att0_a"][:fdim, 0], p["att1_a"][:fdim, 0],
                      p["out_a"][:fdim, 0]], axis=1).astype(jnp.float32)   # (F, 3)
    adst = jnp.stack([p["att0_a"][fdim:, 0], p["att1_a"][fdim:, 0],
                      p["out_a"][fdim:, 0]], axis=0).astype(jnp.float32)   # (3, F)
    kernel = functools.partial(_graph_kernel, alpha=alpha, k_nn=k_neighbors,
                               n_valid=n)
    # TODO(synk): for large N (v7x has only 64 MiB physical VMEM) the (Np, Np)
    # working set needs query-row tiling with an online softmax; here it is
    # tiny, so a 32 MiB scoped limit (also raises v5e's 16 MiB default) is safe.
    out = pl.pallas_call(
        kernel,
        out_shape=jax.ShapeDtypeStruct((bsz, fdim, n_pad), jnp.float32),
        grid_spec=pltpu.PrefetchScalarGridSpec(
            num_scalar_prefetch=0,
            grid=(bsz,),
            in_specs=[
                pl.BlockSpec((1, fdim, n_pad), lambda b: (b, 0, 0)),
                pl.BlockSpec((fdim, 2 * fdim), lambda b: (0, 0)),
                pl.BlockSpec((2 * fdim, fdim), lambda b: (0, 0)),
                pl.BlockSpec((fdim, 3), lambda b: (0, 0)),
                pl.BlockSpec((3, fdim), lambda b: (0, 0)),
            ],
            out_specs=pl.BlockSpec((1, fdim, n_pad), lambda b: (b, 0, 0)),
        ),
        compiler_params=pltpu.CompilerParams(
            dimension_semantics=("parallel",),           # megacore over batch
            vmem_limit_bytes=32 * 1024 * 1024),
    )(y_cm, w01, wout, asrc, adst)
    return out[:, :, :n]


# ----------------------------------------------------------------------------
# GCN_Unit forward
# ----------------------------------------------------------------------------
def gcn_unit_forward(x, p):
    # --- head: strided conv -> channel-major node features (bf16 writeback) --
    h = conv2d_nchw(x, p["conv1_w"], p["conv1_b"], stride=2, pad_tl=1,
                    out_dtype=jnp.bfloat16)           # (B, F, H/2, W/2)
    bsz, fdim, hh, ww = h.shape
    y_cm = h.reshape(bsz, fdim, hh * ww)              # (B, F, N), pure reshape

    # --- body: fused adjacency + GAT (adjacency never leaves VMEM) -----------
    g = graph_gat(y_cm, p)                            # (B, F, N) float32

    # --- last: back to the image grid (conv dims, no sqrt assumption) --------
    y2 = g.reshape(bsz, fdim, hh, ww)
    out = conv_transpose2d(y2, p["convT_w"], p["convT_b"],
                           stride=2, pad=1, output_pad=1)               # (B, F, H, W)
    return out


def init_params(key, in_feats, out_feats):
    k = jax.random.split(key, 10)
    f = out_feats
    s = 0.1
    return {
        "conv1_w": s * jax.random.normal(k[0], (f, in_feats, 3, 3), jnp.float32),
        "conv1_b": s * jax.random.normal(k[1], (f,), jnp.float32),
        "att0_W": s * jax.random.normal(k[2], (f, f), jnp.float32),
        "att0_a": s * jax.random.normal(k[3], (2 * f, 1), jnp.float32),
        "att1_W": s * jax.random.normal(k[4], (f, f), jnp.float32),
        "att1_a": s * jax.random.normal(k[5], (2 * f, 1), jnp.float32),
        "out_W": s * jax.random.normal(k[6], (2 * f, f), jnp.float32),
        "out_a": s * jax.random.normal(k[7], (2 * f, 1), jnp.float32),
        "convT_w": s * jax.random.normal(k[8], (f, f, 3, 3), jnp.float32),
        "convT_b": s * jax.random.normal(k[9], (f,), jnp.float32),
    }


if __name__ == "__main__":
    B, Cin, H, W = 2, 4, 16, 16
    out_feats = 8
    key = jax.random.PRNGKey(0)
    kx, kp = jax.random.split(key)
    x = jax.random.normal(kx, (B, Cin, H, W), jnp.float32)
    params = init_params(kp, Cin, out_feats)

    out = jax.jit(gcn_unit_forward)(x, params)
    out = jax.block_until_ready(out)
    assert out.shape == (B, out_feats, H, W), out.shape
    assert jnp.all(jnp.isfinite(out))
    print("KERNEL_OK")
</pallas_src>

<mosaic_0001>
module attributes {stable_mosaic.version = 11 : i64} {
  func.func @_conv_mm_kernel(%arg0: i32, %arg1: memref<8x36xbf16, #tpu.memory_space<vmem>>, %arg2: memref<36x128xbf16, #tpu.memory_space<vmem>>, %arg3: memref<8x1xf32, #tpu.memory_space<vmem>>, %arg4: memref<8x128xbf16, #tpu.memory_space<vmem>>) attributes {dimension_semantics = [#tpu.dimension_semantics<parallel>], iteration_bounds = array<i64: 1>, scalar_prefetch = 0 : i64, scratch_operands = 0 : i64, tpu.core_type = #tpu.core_type<tc>, window_params = [{pipeline_mode = #tpu.pipeline_mode<synchronous>, transform_indices = @transform_0, window_bounds = array<i64: 8, 36>}, {transform_indices = @transform_1, window_bounds = array<i64: 36, 128>}, {pipeline_mode = #tpu.pipeline_mode<synchronous>, transform_indices = @transform_2, window_bounds = array<i64: 8, 1>}, {transform_indices = @transform_3, window_bounds = array<i64: 8, 128>}]} {
    %c0 = arith.constant 0 : index
    %c0_0 = arith.constant 0 : index
    %0 = vector.load %arg1[%c0, %c0_0] : memref<8x36xbf16, #tpu.memory_space<vmem>>, vector<8x36xbf16>
    %c0_1 = arith.constant 0 : index
    %c0_2 = arith.constant 0 : index
    %1 = vector.load %arg2[%c0_1, %c0_2] : memref<36x128xbf16, #tpu.memory_space<vmem>>, vector<36x128xbf16>
    %cst = arith.constant dense<0.000000e+00> : vector<8x128xf32>
    %2 = tpu.matmul %0, %1, %cst {dimension_numbers = #tpu.dot_dimension_numbers<[1], [0], [0], [1], [0, 0, 1, 1], [], []>} : vector<8x36xbf16>, vector<36x128xbf16>, vector<8x128xf32> -> vector<8x128xf32>
    %c0_3 = arith.constant 0 : index
    %c0_4 = arith.constant 0 : index
    %3 = vector.load %arg3[%c0_3, %c0_4] : memref<8x1xf32, #tpu.memory_space<vmem>>, vector<8x1xf32>
    %4 = vector.broadcast %3 : vector<8x1xf32> to vector<8x128xf32>
    %5 = arith.addf %2, %4 : vector<8x128xf32>
    %6 = arith.truncf %5 : vector<8x128xf32> to vector<8x128xbf16>
    %c0_5 = arith.constant 0 : index
    %c0_6 = arith.constant 0 : index
    %7 = vector.load %arg4[%c0_5, %c0_6] : memref<8x128xbf16, #tpu.memory_space<vmem>>, vector<8x128xbf16>
    tpu.vector_store %arg4[%c0_5, %c0_6], %6 {strides = array<i32>} : memref<8x128xbf16, #tpu.memory_space<vmem>>, vector<8x128xbf16>,
    return
  }
  func.func @transform_0(%arg0: i32) -> (i32, i32) {
    %c0_i32 = arith.constant 0 : i32
    %c0_i32_0 = arith.constant 0 : i32
    %c0_i32_1 = arith.constant 0 : i32
    return %c0_i32, %c0_i32_0 : i32, i32
  }
  func.func @transform_1(%arg0: i32) -> (i32, i32) {
    %c0_i32 = arith.constant 0 : i32
    %c0_i32_0 = arith.constant 0 : i32
    return %c0_i32, %arg0 : i32, i32
  }
  func.func @transform_2(%arg0: i32) -> (i32, i32) {
    %c0_i32 = arith.constant 0 : i32
    %c0_i32_0 = arith.constant 0 : i32
    %c0_i32_1 = arith.constant 0 : i32
    return %c0_i32, %c0_i32_0 : i32, i32
  }
  func.func @transform_3(%arg0: i32) -> (i32, i32) {
    %c0_i32 = arith.constant 0 : i32
    %c0_i32_0 = arith.constant 0 : i32
    return %c0_i32, %arg0 : i32, i32
  }
}

module attributes {stable_mosaic.version = 11 : i64} {
  func.func @_graph_kernel(%arg0: i32, %arg1: memref<1x8x128xbf16, #tpu.memory_space<vmem>>, %arg2: memref<8x16xf32, #tpu.memory_space<vmem>>, %arg3: memref<16x8xf32, #tpu.memory_space<vmem>>, %arg4: memref<8x3xf32, #tpu.memory_space<vmem>>, %arg5: memref<3x8xf32, #tpu.memory_space<vmem>>, %arg6: memref<1x8x128xf32, #tpu.memory_space<vmem>>) attributes {dimension_semantics = [#tpu.dimension_semantics<parallel>], iteration_bounds = array<i64: 2>, scalar_prefetch = 0 : i64, scratch_operands = 0 : i64, tpu.core_type = #tpu.core_type<tc>, window_params = [{transform_indices = @transform_0, window_bounds = array<i64: 1, 8, 128>}, {pipeline_mode = #tpu.pipeline_mode<synchronous>, transform_indices = @transform_1, window_bounds = array<i64: 8, 16>}, {pipeline_mode = #tpu.pipeline_mode<synchronous>, transform_indices = @transform_2, window_bounds = array<i64: 16, 8>}, {pipeline_mode = #tpu.pipeline_mode<synchronous>, transform_indices = @transform_3, window_bounds = array<i64: 8, 3>}, {pipeline_mode = #tpu.pipeline_mode<synchronous>, transform_indices = @transform_4, window_bounds = array<i64: 3, 8>}, {transform_indices = @transform_5, window_bounds = array<i64: 1, 8, 128>}]} {
    %c0 = arith.constant 0 : index
    %c0_0 = arith.constant 0 : index
    %c0_1 = arith.constant 0 : index
    %0 = vector.load %arg1[%c0, %c0_0, %c0_1] : memref<1x8x128xbf16, #tpu.memory_space<vmem>>, vector<1x8x128xbf16>
    %1 = vector.shape_cast %0 : vector<1x8x128xbf16> to vector<8x128xbf16>
    %2 = arith.extf %1 : vector<8x128xbf16> to vector<8x128xf32>
    %3 = arith.mulf %2, %2 : vector<8x128xf32>
    %cst = arith.constant dense<0.000000e+00> : vector<128xf32>
    %4 = vector.multi_reduction <add>, %3, %cst [0] : vector<8x128xf32> to vector<128xf32>
    %5 = vector.shape_cast %4 : vector<128xf32> to vector<1x128xf32>
    %cst_2 = arith.constant 1.000000e+00 : f32
    %6 = vector.broadcast %cst_2 : f32 to vector<8x1xf32>
    %cst_3 = arith.constant dense<0.000000e+00> : vector<128x1xf32>
    %7 = tpu.matmul %3, %6, %cst_3 {dimension_numbers = #tpu.dot_dimension_numbers<[0], [0], [1], [1], [0, 1, 1, 1], [], []>} : vector<8x128xf32>, vector<8x1xf32>, vector<128x1xf32> -> vector<128x1xf32>
    %cst_4 = arith.constant dense<0.000000e+00> : vector<128x128xf32>
    %8 = tpu.matmul %2, %2, %cst_4 {dimension_numbers = #tpu.dot_dimension_numbers<[0], [0], [1], [1], [0, 1, 1, 1], [], []>} : vector<8x128xf32>, vector<8x128xf32>, vector<128x128xf32> -> vector<128x128xf32>
    %9 = vector.broadcast %7 : vector<128x1xf32> to vector<128x128xf32>
    %10 = vector.broadcast %5 : vector<1x128xf32> to vector<128x128xf32>
    %11 = arith.addf %9, %10 : vector<128x128xf32>
    %cst_5 = arith.constant 2.000000e+00 : f32
    %12 = vector.broadcast %cst_5 : f32 to vector<128x128xf32>
    %13 = arith.mulf %12, %8 : vector<128x128xf32>
    %14 = arith.subf %11, %13 : vector<128x128xf32>
    %cst_6 = arith.constant 0.000000e+00 : f32
    %15 = vector.broadcast %cst_6 : f32 to vector<128x128xf32>
    %16 = arith.maximumf %14, %15 : vector<128x128xf32>
    %17 = tpu.iota {dimensions = array<i32: 1>} : vector<128x128xi32>
    %c64_i32 = arith.constant 64 : i32
    %18 = vector.broadcast %c64_i32 : i32 to vector<128x128xi32>
    %19 = arith.cmpi slt, %17, %18 : vector<128x128xi32>
    %cst_7 = arith.constant 1.000000e+00 : f32
    %20 = vector.broadcast %cst_7 : f32 to vector<128x128xf32>
    %21 = arith.addf %16, %20 : vector<128x128xf32>
    %22 = tpu.bitcast %21 : vector<128x128xf32> -> vector<128x128xi32>
    %c-128_i32 = arith.constant -128 : i32
    %23 = vector.broadcast %c-128_i32 : i32 to vector<128x128xi32>
    %24 = arith.andi %22, %23 : vector<128x128xi32>
    %25 = arith.ori %24, %17 : vector<128x128xi32>
    %26 = tpu.bitcast %25 : vector<128x128xi32> -> vector<128x128xf32>
    %cst_8 = arith.constant 3.000000e+38 : f32
    %27 = vector.broadcast %cst_8 : f32 to vector<128x128xf32>
    %28 = arith.select %19, %26, %27 : vector<128x128xi1>, vector<128x128xf32>
    %cst_9 = arith.constant 3.000000e+38 : f32
    %c0_i32 = arith.constant 0 : i32
    %cst_10 = arith.constant dense<0x7F800000> : vector<128xf32>
    %29 = vector.multi_reduction <minimumf>, %28, %cst_10 [1] : vector<128x128xf32> to vector<128xf32>
    %30 = vector.shape_cast %29 : vector<128xf32> to vector<128x1xf32>
    %31 = tpu.bitcast %30 : vector<128x1xf32> -> vector<128x1xi32>
    %c127_i32 = arith.constant 127 : i32
    %32 = vector.broadcast %c127_i32 : i32 to vector<128x1xi32>
    %33 = arith.andi %31, %32 : vector<128x1xi32>
    %34 = vector.broadcast %33 : vector<128x1xi32> to vector<128x128xi32>
    %35 = arith.cmpi eq, %17, %34 : vector<128x128xi32>
    %36 = vector.broadcast %cst_9 : f32 to vector<128x128xf32>
    %37 = arith.select %35, %36, %28 : vector<128x128xi1>, vector<128x128xf32>
    %c1_i32 = arith.constant 1 : i32
    %cst_11 = arith.constant dense<0x7F800000> : vector<128xf32>
    %38 = vector.multi_reduction <minimumf>, %37, %cst_11 [1] : vector<128x128xf32> to vector<128xf32>
    %39 = vector.shape_cast %38 : vector<128xf32> to vector<128x1xf32>
    %40 = tpu.bitcast %39 : vector<128x1xf32> -> vector<128x1xi32>
    %c127_i32_12 = arith.constant 127 : i32
    %41 = vector.broadcast %c127_i32_12 : i32 to vector<128x1xi32>
    %42 = arith.andi %40, %41 : vector<128x1xi32>
    %43 = vector.broadcast %42 : vector<128x1xi32> to vector<128x128xi32>
    %44 = arith.cmpi eq, %17, %43 : vector<128x128xi32>
    %45 = vector.broadcast %cst_9 : f32 to vector<128x128xf32>
    %46 = arith.select %44, %45, %37 : vector<128x128xi1>, vector<128x128xf32>
    %c2_i32 = arith.constant 2 : i32
    %cst_13 = arith.constant dense<0x7F800000> : vector<128xf32>
    %47 = vector.multi_reduction <minimumf>, %46, %cst_13 [1] : vector<128x128xf32> to vector<128xf32>
    %48 = vector.shape_cast %47 : vector<128xf32> to vector<128x1xf32>
    %49 = tpu.bitcast %48 : vector<128x1xf32> -> vector<128x1xi32>
    %c127_i32_14 = arith.constant 127 : i32
    %50 = vector.broadcast %c127_i32_14 : i32 to vector<128x1xi32>
    %51 = arith.andi %49, %50 : vector<128x1xi32>
    %52 = vector.broadcast %51 : vector<128x1xi32> to vector<128x128xi32>
    %53 = arith.cmpi eq, %17, %52 : vector<128x128xi32>
    %54 = vector.broadcast %cst_9 : f32 to vector<128x128xf32>
    %55 = arith.select %53, %54, %46 : vector<128x128xi1>, vector<128x128xf32>
    %c3_i32 = arith.constant 3 : i32
    %cst_15 = arith.constant dense<0x7F800000> : vector<128xf32>
    %56 = vector.multi_reduction <minimumf>, %55, %cst_15 [1] : vector<128x128xf32> to vector<128xf32>
    %57 = vector.shape_cast %56 : vector<128xf32> to vector<128x1xf32>
    %58 = tpu.bitcast %57 : vector<128x1xf32> -> vector<128x1xi32>
    %c127_i32_16 = arith.constant 127 : i32
    %59 = vector.broadcast %c127_i32_16 : i32 to vector<128x1xi32>
    %60 = arith.andi %58, %59 : vector<128x1xi32>
    %61 = vector.broadcast %60 : vector<128x1xi32> to vector<128x128xi32>
    %62 = arith.cmpi eq, %17, %61 : vector<128x128xi32>
    %63 = vector.broadcast %cst_9 : f32 to vector<128x128xf32>
    %64 = arith.select %62, %63, %55 : vector<128x128xi1>, vector<128x128xf32>
    %c4_i32 = arith.constant 4 : i32
    %cst_17 = arith.constant dense<0x7F800000> : vector<128xf32>
    %65 = vector.multi_reduction <minimumf>, %64, %cst_17 [1] : vector<128x128xf32> to vector<128xf32>
    %66 = vector.shape_cast %65 : vector<128xf32> to vector<128x1xf32>
    %67 = tpu.bitcast %66 : vector<128x1xf32> -> vector<128x1xi32>
    %c127_i32_18 = arith.constant 127 : i32
    %68 = vector.broadcast %c127_i32_18 : i32 to vector<128x1xi32>
    %69 = arith.andi %67, %68 : vector<128x1xi32>
    %70 = vector.broadcast %69 : vector<128x1xi32> to vector<128x128xi32>
    %71 = arith.cmpi eq, %17, %70 : vector<128x128xi32>
    %72 = vector.broadcast %cst_9 : f32 to vector<128x128xf32>
    %73 = arith.select %71, %72, %64 : vector<128x128xi1>, vector<128x128xf32>
    %c5_i32 = arith.constant 5 : i32
    %cst_19 = arith.constant dense<0x7F800000> : vector<128xf32>
    %74 = vector.multi_reduction <minimumf>, %73, %cst_19 [1] : vector<128x128xf32> to vector<128xf32>
    %75 = vector.shape_cast %74 : vector<128xf32> to vector<128x1xf32>
    %76 = tpu.bitcast %75 : vector<128x1xf32> -> vector<128x1xi32>
    %c127_i32_20 = arith.constant 127 : i32
    %77 = vector.broadcast %c127_i32_20 : i32 to vector<128x1xi32>
    %78 = arith.andi %76, %77 : vector<128x1xi32>
    %79 = vector.broadcast %78 : vector<128x1xi32> to vector<128x128xi32>
    %80 = arith.cmpi eq, %17, %79 : vector<128x128xi32>
    %81 = vector.broadcast %cst_9 : f32 to vector<128x128xf32>
    %82 = arith.select %80, %81, %73 : vector<128x128xi1>, vector<128x128xf32>
    %c6_i32 = arith.constant 6 : i32
    %cst_21 = arith.constant dense<0x7F800000> : vector<128xf32>
    %83 = vector.multi_reduction <minimumf>, %82, %cst_21 [1] : vector<128x128xf32> to vector<128xf32>
    %84 = vector.shape_cast %83 : vector<128xf32> to vector<128x1xf32>
    %85 = tpu.bitcast %84 : vector<128x1xf32> -> vector<128x1xi32>
    %c127_i32_22 = arith.constant 127 : i32
    %86 = vector.broadcast %c127_i32_22 : i32 to vector<128x1xi32>
    %87 = arith.andi %85, %86 : vector<128x1xi32>
    %88 = vector.broadcast %87 : vector<128x1xi32> to vector<128x128xi32>
    %89 = arith.cmpi eq, %17, %88 : vector<128x128xi32>
    %90 = vector.broadcast %cst_9 : f32 to vector<128x128xf32>
    %91 = arith.select %89, %90, %82 : vector<128x128xi1>, vector<128x128xf32>
    %cst_23 = arith.constant 9.99999968E+37 : f32
    %92 = vector.broadcast %cst_23 : f32 to vector<128x128xf32>
    %93 = arith.cmpf oge, %91, %92 : vector<128x128xf32>
    %94 = arith.andi %93, %19 : vector<128x128xi1>
    %c0_24 = arith.constant 0 : index
    %c0_25 = arith.constant 0 : index
    %95 = vector.load %arg4[%c0_24, %c0_25] : memref<8x3xf32, #tpu.memory_space<vmem>>, vector<8x3xf32>
    %c0_26 = arith.constant 0 : index
    %c0_27 = arith.constant 0 : index
    %96 = vector.load %arg5[%c0_26, %c0_27] : memref<3x8xf32, #tpu.memory_space<vmem>>, vector<3x8xf32>
    %c0_28 = arith.constant 0 : index
    %c0_29 = arith.constant 0 : index
    %97 = vector.load %arg2[%c0_28, %c0_29] : memref<8x16xf32, #tpu.memory_space<vmem>>, vector<8x16xf32>
    %cst_30 = arith.constant dense<0.000000e+00> : vector<16x128xf32>
    %98 = tpu.matmul %97, %2, %cst_30 {dimension_numbers = #tpu.dot_dimension_numbers<[0], [0], [1], [1], [0, 1, 1, 1], [], []>} : vector<8x16xf32>, vector<8x128xf32>, vector<16x128xf32> -> vector<16x128xf32>
    %99 = vector.extract_strided_slice %98 {offsets = [0, 0], sizes = [8, 128], strides = [1, 1]} : vector<16x128xf32> to vector<8x128xf32>
    %100 = vector.extract_strided_slice %95 {offsets = [0, 0], sizes = [8, 1], strides = [1, 1]} : vector<8x3xf32> to vector<8x1xf32>
    %101 = vector.extract_strided_slice %96 {offsets = [0, 0], sizes = [1, 8], strides = [1, 1]} : vector<3x8xf32> to vector<1x8xf32>
    %cst_31 = arith.constant dense<0.000000e+00> : vector<128x1xf32>
    %102 = tpu.matmul %99, %100, %cst_31 {dimension_numbers = #tpu.dot_dimension_numbers<[0], [0], [1], [1], [0, 1, 1, 1], [], []>} : vector<8x128xf32>, vector<8x1xf32>, vector<128x1xf32> -> vector<128x1xf32>
    %cst_32 = arith.constant dense<0.000000e+00> : vector<1x128xf32>
    %103 = tpu.matmul %101, %99, %cst_32 {dimension_numbers = #tpu.dot_dimension_numbers<[1], [0], [0], [1], [0, 0, 1, 1], [], []>} : vector<1x8xf32>, vector<8x128xf32>, vector<1x128xf32> -> vector<1x128xf32>
    %104 = vector.broadcast %102 : vector<128x1xf32> to vector<128x128xf32>
    %105 = vector.broadcast %103 : vector<1x128xf32> to vector<128x128xf32>
    %106 = arith.addf %104, %105 : vector<128x128xf32>
    %cst_33 = arith.constant 0.000000e+00 : f32
    %107 = vector.broadcast %cst_33 : f32 to vector<128x128xf32>
    %108 = arith.cmpf ogt, %106, %107 : vector<128x128xf32>
    %cst_34 = arith.constant 2.000000e-01 : f32
    %109 = vector.broadcast %cst_34 : f32 to vector<128x128xf32>
    %110 = arith.mulf %109, %106 : vector<128x128xf32>
    %111 = arith.select %108, %106, %110 : vector<128x128xi1>, vector<128x128xf32>
    %cst_35 = arith.constant -9.000000e+15 : f32
    %112 = vector.broadcast %cst_35 : f32 to vector<128x128xf32>
    %113 = arith.select %94, %111, %112 : vector<128x128xi1>, vector<128x128xf32>
    %cst_36 = arith.constant dense<0xFF800000> : vector<128xf32>
    %114 = vector.multi_reduction <maximumf>, %113, %cst_36 [1] : vector<128x128xf32> to vector<128xf32>
    %115 = vector.shape_cast %114 : vector<128xf32> to vector<128x1xf32>
    %116 = vector.broadcast %115 : vector<128x1xf32> to vector<128x128xf32>
    %117 = arith.subf %113, %116 : vector<128x128xf32>
    %118 = math.exp %117 : vector<128x128xf32>
    %cst_37 = arith.constant dense<0.000000e+00> : vector<128xf32>
    %119 = vector.multi_reduction <add>, %118, %cst_37 [1] : vector<128x128xf32> to vector<128xf32>
    %120 = vector.shape_cast %119 : vector<128xf32> to vector<128x1xf32>
    %121 = tpu.reciprocal %120 {approx = true} : vector<128x1xf32> -> vector<128x1xf32>
    %122 = vector.broadcast %121 : vector<128x1xf32> to vector<128x128xf32>
    %123 = arith.mulf %118, %122 : vector<128x128xf32>
    %124 = arith.truncf %99 : vector<8x128xf32> to vector<8x128xbf16>
    %125 = arith.truncf %123 : vector<128x128xf32> to vector<128x128xbf16>
    %cst_38 = arith.constant dense<0.000000e+00> : vector<8x128xf32>
    %126 = tpu.matmul %124, %125, %cst_38 {dimension_numbers = #tpu.dot_dimension_numbers<[1], [1], [0], [0], [0, 0, 1, 0], [], []>} : vector<8x128xbf16>, vector<128x128xbf16>, vector<8x128xf32> -> vector<8x128xf32>
    %cst_39 = arith.constant 0.000000e+00 : f32
    %127 = vector.broadcast %cst_39 : f32 to vector<8x128xf32>
    %128 = arith.cmpf ogt, %126, %127 : vector<8x128xf32>
    %cst_40 = arith.constant 0.000000e+00 : f32
    %129 = vector.broadcast %cst_40 : f32 to vector<8x128xf32>
    %130 = arith.minimumf %126, %129 : vector<8x128xf32>
    %131 = math.exp %130 : vector<8x128xf32>
    %cst_41 = arith.constant 1.000000e+00 : f32
    %132 = vector.broadcast %cst_41 : f32 to vector<8x128xf32>
    %133 = arith.subf %131, %132 : vector<8x128xf32>
    %134 = arith.select %128, %126, %133 : vector<8x128xi1>, vector<8x128xf32>
    %135 = vector.extract_strided_slice %98 {offsets = [8, 0], sizes = [8, 128], strides = [1, 1]} : vector<16x128xf32> to vector<8x128xf32>
    %136 = vector.extract_strided_slice %95 {offsets = [0, 1], sizes = [8, 1], strides = [1, 1]} : vector<8x3xf32> to vector<8x1xf32>
    %137 = vector.extract_strided_slice %96 {offsets = [1, 0], sizes = [1, 8], strides = [1, 1]} : vector<3x8xf32> to vector<1x8xf32>
    %cst_42 = arith.constant dense<0.000000e+00> : vector<128x1xf32>
    %138 = tpu.matmul %135, %136, %cst_42 {dimension_numbers = #tpu.dot_dimension_numbers<[0], [0], [1], [1], [0, 1, 1, 1], [], []>} : vector<8x128xf32>, vector<8x1xf32>, vector<128x1xf32> -> vector<128x1xf32>
    %cst_43 = arith.constant dense<0.000000e+00> : vector<1x128xf32>
    %139 = tpu.matmul %137, %135, %cst_43 {dimension_numbers = #tpu.dot_dimension_numbers<[1], [0], [0], [1], [0, 0, 1, 1], [], []>} : vector<1x8xf32>, vector<8x128xf32>, vector<1x128xf32> -> vector<1x128xf32>
    %140 = vector.broadcast %138 : vector<128x1xf32> to vector<128x128xf32>
    %141 = vector.broadcast %139 : vector<1x128xf32> to vector<128x128xf32>
    %142 = arith.addf %140, %141 : vector<128x128xf32>
    %cst_44 = arith.constant 0.000000e+00 : f32
    %143 = vector.broadcast %cst_44 : f32 to vector<128x128xf32>
    %144 = arith.cmpf ogt, %142, %143 : vector<128x128xf32>
    %cst_45 = arith.constant 2.000000e-01 : f32
    %145 = vector.broadcast %cst_45 : f32 to vector<128x128xf32>
    %146 = arith.mulf %145, %142 : vector<128x128xf32>
    %147 = arith.select %144, %142, %146 : vector<128x128xi1>, vector<128x128xf32>
    %cst_46 = arith.constant -9.000000e+15 : f32
    %148 = vector.broadcast %cst_46 : f32 to vector<128x128xf32>
    %149 = arith.select %94, %147, %148 : vector<128x128xi1>, vector<128x128xf32>
    %cst_47 = arith.constant dense<0xFF800000> : vector<128xf32>
    %150 = vector.multi_reduction <maximumf>, %149, %cst_47 [1] : vector<128x128xf32> to vector<128xf32>
    %151 = vector.shape_cast %150 : vector<128xf32> to vector<128x1xf32>
    %152 = vector.broadcast %151 : vector<128x1xf32> to vector<128x128xf32>
    %153 = arith.subf %149, %152 : vector<128x128xf32>
    %154 = math.exp %153 : vector<128x128xf32>
    %cst_48 = arith.constant dense<0.000000e+00> : vector<128xf32>
    %155 = vector.multi_reduction <add>, %154, %cst_48 [1] : vector<128x128xf32> to vector<128xf32>
    %156 = vector.shape_cast %155 : vector<128xf32> to vector<128x1xf32>
    %157 = tpu.reciprocal %156 {approx = true} : vector<128x1xf32> -> vector<128x1xf32>
    %158 = vector.broadcast %157 : vector<128x1xf32> to vector<128x128xf32>
    %159 = arith.mulf %154, %158 : vector<128x128xf32>
    %160 = arith.truncf %135 : vector<8x128xf32> to vector<8x128xbf16>
    %161 = arith.truncf %159 : vector<128x128xf32> to vector<128x128xbf16>
    %cst_49 = arith.constant dense<0.000000e+00> : vector<8x128xf32>
    %162 = tpu.matmul %160, %161, %cst_49 {dimension_numbers = #tpu.dot_dimension_numbers<[1], [1], [0], [0], [0, 0, 1, 0], [], []>} : vector<8x128xbf16>, vector<128x128xbf16>, vector<8x128xf32> -> vector<8x128xf32>
    %cst_50 = arith.constant 0.000000e+00 : f32
    %163 = vector.broadcast %cst_50 : f32 to vector<8x128xf32>
    %164 = arith.cmpf ogt, %162, %163 : vector<8x128xf32>
    %cst_51 = arith.constant 0.000000e+00 : f32
    %165 = vector.broadcast %cst_51 : f32 to vector<8x128xf32>
    %166 = arith.minimumf %162, %165 : vector<8x128xf32>
    %167 = math.exp %166 : vector<8x128xf32>
    %cst_52 = arith.constant 1.000000e+00 : f32
    %168 = vector.broadcast %cst_52 : f32 to vector<8x128xf32>
    %169 = arith.subf %167, %168 : vector<8x128xf32>
    %170 = arith.select %164, %162, %169 : vector<8x128xi1>, vector<8x128xf32>
    %171 = tpu.concatenate %134, %170 in 0 : vector<8x128xf32>, vector<8x128xf32> -> vector<16x128xf32>
    %c0_53 = arith.constant 0 : index
    %c0_54 = arith.constant 0 : index
    %172 = vector.load %arg3[%c0_53, %c0_54] : memref<16x8xf32, #tpu.memory_space<vmem>>, vector<16x8xf32>
    %cst_55 = arith.constant dense<0.000000e+00> : vector<8x128xf32>
    %173 = tpu.matmul %172, %171, %cst_55 {dimension_numbers = #tpu.dot_dimension_numbers<[0], [0], [1], [1], [0, 1, 1, 1], [], []>} : vector<16x8xf32>, vector<16x128xf32>, vector<8x128xf32> -> vector<8x128xf32>
    %174 = vector.extract_strided_slice %95 {offsets = [0, 2], sizes = [8, 1], strides = [1, 1]} : vector<8x3xf32> to vector<8x1xf32>
    %175 = vector.extract_strided_slice %96 {offsets = [2, 0], sizes = [1, 8], strides = [1, 1]} : vector<3x8xf32> to vector<1x8xf32>
    %cst_56 = arith.constant dense<0.000000e+00> : vector<128x1xf32>
    %176 = tpu.matmul %173, %174, %cst_56 {dimension_numbers = #tpu.dot_dimension_numbers<[0], [0], [1], [1], [0, 1, 1, 1], [], []>} : vector<8x128xf32>, vector<8x1xf32>, vector<128x1xf32> -> vector<128x1xf32>
    %cst_57 = arith.constant dense<0.000000e+00> : vector<1x128xf32>
    %177 = tpu.matmul %175, %173, %cst_57 {dimension_numbers = #tpu.dot_dimension_numbers<[1], [0], [0], [1], [0, 0, 1, 1], [], []>} : vector<1x8xf32>, vector<8x128xf32>, vector<1x128xf32> -> vector<1x128xf32>
    %178 = vector.broadcast %176 : vector<128x1xf32> to vector<128x128xf32>
    %179 = vector.broadcast %177 : vector<1x128xf32> to vector<128x128xf32>
    %180 = arith.addf %178, %179 : vector<128x128xf32>
    %cst_58 = arith.constant 0.000000e+00 : f32
    %181 = vector.broadcast %cst_58 : f32 to vector<128x128xf32>
    %182 = arith.cmpf ogt, %180, %181 : vector<128x128xf32>
    %cst_59 = arith.constant 2.000000e-01 : f32
    %183 = vector.broadcast %cst_59 : f32 to vector<128x128xf32>
    %184 = arith.mulf %183, %180 : vector<128x128xf32>
    %185 = arith.select %182, %180, %184 : vector<128x128xi1>, vector<128x128xf32>
    %cst_60 = arith.constant -9.000000e+15 : f32
    %186 = vector.broadcast %cst_60 : f32 to vector<128x128xf32>
    %187 = arith.select %94, %185, %186 : vector<128x128xi1>, vector<128x128xf32>
    %cst_61 = arith.constant dense<0xFF800000> : vector<128xf32>
    %188 = vector.multi_reduction <maximumf>, %187, %cst_61 [1] : vector<128x128xf32> to vector<128xf32>
    %189 = vector.shape_cast %188 : vector<128xf32> to vector<128x1xf32>
    %190 = vector.broadcast %189 : vector<128x1xf32> to vector<128x128xf32>
    %191 = arith.subf %187, %190 : vector<128x128xf32>
    %192 = math.exp %191 : vector<128x128xf32>
    %cst_62 = arith.constant dense<0.000000e+00> : vector<128xf32>
    %193 = vector.multi_reduction <add>, %192, %cst_62 [1] : vector<128x128xf32> to vector<128xf32>
    %194 = vector.shape_cast %193 : vector<128xf32> to vector<128x1xf32>
    %195 = tpu.reciprocal %194 {approx = true} : vector<128x1xf32> -> vector<128x1xf32>
    %196 = vector.broadcast %195 : vector<128x1xf32> to vector<128x128xf32>
    %197 = arith.mulf %192, %196 : vector<128x128xf32>
    %198 = arith.truncf %173 : vector<8x128xf32> to vector<8x128xbf16>
    %199 = arith.truncf %197 : vector<128x128xf32> to vector<128x128xbf16>
    %cst_63 = arith.constant dense<0.000000e+00> : vector<8x128xf32>
    %200 = tpu.matmul %198, %199, %cst_63 {dimension_numbers = #tpu.dot_dimension_numbers<[1], [1], [0], [0], [0, 0, 1, 0], [], []>} : vector<8x128xbf16>, vector<128x128xbf16>, vector<8x128xf32> -> vector<8x128xf32>
    %cst_64 = arith.constant 0.000000e+00 : f32
    %201 = vector.broadcast %cst_64 : f32 to vector<8x128xf32>
    %202 = arith.cmpf ogt, %200, %201 : vector<8x128xf32>
    %cst_65 = arith.constant 0.000000e+00 : f32
    %203 = vector.broadcast %cst_65 : f32 to vector<8x128xf32>
    %204 = arith.minimumf %200, %203 : vector<8x128xf32>
    %205 = math.exp %204 : vector<8x128xf32>
    %cst_66 = arith.constant 1.000000e+00 : f32
    %206 = vector.broadcast %cst_66 : f32 to vector<8x128xf32>
    %207 = arith.subf %205, %206 : vector<8x128xf32>
    %208 = arith.select %202, %200, %207 : vector<8x128xi1>, vector<8x128xf32>
    %c0_67 = arith.constant 0 : index
    %c0_68 = arith.constant 0 : index
    %c0_69 = arith.constant 0 : index
    %209 = vector.load %arg6[%c0_67, %c0_68, %c0_69] : memref<1x8x128xf32, #tpu.memory_space<vmem>>, vector<1x8x128xf32>
    %210 = vector.shape_cast %209 : vector<1x8x128xf32> to vector<8x128xf32>
    %211 = vector.shape_cast %208 : vector<8x128xf32> to vector<1x8x128xf32>
    tpu.vector_store %arg6[%c0_67, %c0_68, %c0_69], %211 {strides = array<i32>} : memref<1x8x128xf32, #tpu.memory_space<vmem>>, vector<1x8x128xf32>,
    return
  }
  func.func @transform_0(%arg0: i32) -> (i32, i32, i32) {
    %c0_i32 = arith.constant 0 : i32
    %c0_i32_0 = arith.constant 0 : i32
    %c0_i32_1 = arith.constant 0 : i32
    return %arg0, %c0_i32, %c0_i32_0 : i32, i32, i32
  }
  func.func @transform_1(%arg0: i32) -> (i32, i32) {
    %c0_i32 = arith.constant 0 : i32
    %c0_i32_0 = arith.constant 0 : i32
    %c0_i32_1 = arith.constant 0 : i32
    return %c0_i32, %c0_i32_0 : i32, i32
  }
  func.func @transform_2(%arg0: i32) -> (i32, i32) {
    %c0_i32 = arith.constant 0 : i32
    %c0_i32_0 = arith.constant 0 : i32
    %c0_i32_1 = arith.constant 0 : i32
    return %c0_i32, %c0_i32_0 : i32, i32
  }
  func.func @transform_3(%arg0: i32) -> (i32, i32) {
    %c0_i32 = arith.constant 0 : i32
    %c0_i32_0 = arith.constant 0 : i32
    %c0_i32_1 = arith.constant 0 : i32
    return %c0_i32, %c0_i32_0 : i32, i32
  }
  func.func @transform_4(%arg0: i32) -> (i32, i32) {
    %c0_i32 = arith.constant 0 : i32
    %c0_i32_0 = arith.constant 0 : i32
    %c0_i32_1 = arith.constant 0 : i32
    return %c0_i32, %c0_i32_0 : i32, i32
  }
  func.func @transform_5(%arg0: i32) -> (i32, i32, i32) {
    %c0_i32 = arith.constant 0 : i32
    %c0_i32_0 = arith.constant 0 : i32
    %c0_i32_1 = arith.constant 0 : i32
    return %arg0, %c0_i32, %c0_i32_0 : i32, i32, i32
  }
}

module attributes {stable_mosaic.version = 11 : i64} {
  func.func @_conv_mm_kernel(%arg0: i32, %arg1: memref<8x72xbf16, #tpu.memory_space<vmem>>, %arg2: memref<72x512xbf16, #tpu.memory_space<vmem>>, %arg3: memref<8x1xf32, #tpu.memory_space<vmem>>, %arg4: memref<8x512xf32, #tpu.memory_space<vmem>>) attributes {dimension_semantics = [#tpu.dimension_semantics<parallel>], iteration_bounds = array<i64: 1>, scalar_prefetch = 0 : i64, scratch_operands = 0 : i64, tpu.core_type = #tpu.core_type<tc>, window_params = [{pipeline_mode = #tpu.pipeline_mode<synchronous>, transform_indices = @transform_0, window_bounds = array<i64: 8, 72>}, {transform_indices = @transform_1, window_bounds = array<i64: 72, 512>}, {pipeline_mode = #tpu.pipeline_mode<synchronous>, transform_indices = @transform_2, window_bounds = array<i64: 8, 1>}, {transform_indices = @transform_3, window_bounds = array<i64: 8, 512>}]} {
    %c0 = arith.constant 0 : index
    %c0_0 = arith.constant 0 : index
    %0 = vector.load %arg1[%c0, %c0_0] : memref<8x72xbf16, #tpu.memory_space<vmem>>, vector<8x72xbf16>
    %c0_1 = arith.constant 0 : index
    %c0_2 = arith.constant 0 : index
    %1 = vector.load %arg2[%c0_1, %c0_2] : memref<72x512xbf16, #tpu.memory_space<vmem>>, vector<72x512xbf16>
    %cst = arith.constant dense<0.000000e+00> : vector<8x512xf32>
    %2 = tpu.matmul %0, %1, %cst {dimension_numbers = #tpu.dot_dimension_numbers<[1], [0], [0], [1], [0, 0, 1, 1], [], []>} : vector<8x72xbf16>, vector<72x512xbf16>, vector<8x512xf32> -> vector<8x512xf32>
    %c0_3 = arith.constant 0 : index
    %c0_4 = arith.constant 0 : index
    %3 = vector.load %arg3[%c0_3, %c0_4] : memref<8x1xf32, #tpu.memory_space<vmem>>, vector<8x1xf32>
    %4 = vector.broadcast %3 : vector<8x1xf32> to vector<8x512xf32>
    %5 = arith.addf %2, %4 : vector<8x512xf32>
    %c0_5 = arith.constant 0 : index
    %c0_6 = arith.constant 0 : index
    %6 = vector.load %arg4[%c0_5, %c0_6] : memref<8x512xf32, #tpu.memory_space<vmem>>, vector<8x512xf32>
    tpu.vector_store %arg4[%c0_5, %c0_6], %5 {strides = array<i32>} : memref<8x512xf32, #tpu.memory_space<vmem>>, vector<8x512xf32>,
    return
  }
  func.func @transform_0(%arg0: i32) -> (i32, i32) {
    %c0_i32 = arith.constant 0 : i32
    %c0_i32_0 = arith.constant 0 : i32
    %c0_i32_1 = arith.constant 0 : i32
    return %c0_i32, %c0_i32_0 : i32, i32
  }
  func.func @transform_1(%arg0: i32) -> (i32, i32) {
    %c0_i32 = arith.constant 0 : i32
    %c0_i32_0 = arith.constant 0 : i32
    return %c0_i32, %arg0 : i32, i32
  }
  func.func @transform_2(%arg0: i32) -> (i32, i32) {
    %c0_i32 = arith.constant 0 : i32
    %c0_i32_0 = arith.constant 0 : i32
    %c0_i32_1 = arith.constant 0 : i32
    return %c0_i32, %c0_i32_0 : i32, i32
  }
  func.func @transform_3(%arg0: i32) -> (i32, i32) {
    %c0_i32 = arith.constant 0 : i32
    %c0_i32_0 = arith.constant 0 : i32
    return %c0_i32, %arg0 : i32, i32
  }
}

</mosaic_0001>

<bundles_post_ra>
// kernel: gcn_unit_forward.3
= control target key start
LH: loop header
LB: loop body
LE: loop exit
PB: predicated region body
PF: predicated region fallthrough
CT: control target
= control target key end

     0   :  { %vm46_vm0 = vcmask 1041408   ;;  %v121_v0 = vmov 0.0   ;;  %vm122_vm1 = vmmov 0   ;;  %v123_v5 = vmov 0   ;;  %s162_s1 = inlined_call_operand.vmem [shape: bf16[36,128], index: 1, kind: input, shape index: {}]   ;;  %s163_s2 = inlined_call_operand.vmem [shape: f32[8,1], index: 2, kind: input, shape index: {}]   ;;  %s164_s0 = inlined_call_operand.vmem [shape: bf16[8,36], index: 0, kind: input, shape index: {}]   ;;  %s165_s3 = inlined_call_operand.vmem [shape: bf16[8,128], index: 3, kind: output, shape index: {}]  }
   0x1   :  { %104 = vmatprep.subr.bf16.mxu0 %v121_v0  ;;  %v118_v1 = vld [vmem:[%s162_s1 + $0x10] ss:$0 sps:$4 sm:$0x33]   ;;  %110 = vmatprep.mubr.msk.bf16.mxu0 %vm122_vm1, %v121_v0  ;;  %v119_v3 = vld [vmem:[%s162_s1 + $0x8] sm:$0xff]   ;;  %v21_v4 = vld [vmem:[%s163_s2] sm:$0xff]  ;;  %vm42_vm2 = vcmask 293888  }
   0x2   :  { %v48_v2 = vsel %vm46_vm0, %v118_v1, 0  ;;  %117 = vset.pattern.permute.xlu0 %v123_v5  ;;  %v120_v6 = vld [vmem:[%s162_s1] sm:$0xff]  }
   0x3   :  { %105 = vmatpush3.bf16.msra.mxu0 %v48_v2  ;;  %24 = vperm.xlu0 %117, %v21_v4   ;;  %v15_v7 = vld [vmem:[%s164_s0] sm:$0xf] }
   0x4   :  { %106 = vmatprep.subr.bf16.mxu0 %v121_v0 }
   0x7   :  { %107 = vmatpush3.bf16.msra.mxu0 %v119_v3 }
   0x8   :  { %108 = vmatprep.subr.bf16.mxu0 %v121_v0 }
   0xb   :  { %109 = vmatpush3.bf16.msra.mxu0 %v120_v6 }
   0xe   :  { %111 = vmatmul.mubr.msk.bf16.vlgmr.msra.gmra.mxu0 %vm42_vm2, %v15_v7 }
  0x7e   :  { %v25_v8 = vpop.permute.xlu0 %24 }
  0xce   :  { %v84_v9 = vpop.f32.mrf.mxu0 }
  0xcf   :  { %v85_v10 = vadd.f32 %v84_v9, %v25_v8 }
  0xd0   :  { %v112_v11 = vpop.f32.mrf.mxu0 }
  0xd1   :  { %v90_v12 = vpack.c.bf16 %v85_v10, %v85_v10 }
  0xd2   :  { %v87_v13 = vpop.f32.mrf.mxu0 }
  0xd3   :  { %91 = vst [vmem:[%s165_s3] sm:$0xf] %v90_v12 }
  0xd4   :  { %v113_v14 = vpop.f32.mrf.mxu0 }

// kernel: gcn_unit_forward.4
= control target key start
LH: loop header
LB: loop body
LE: loop exit
PB: predicated region body
PF: predicated region fallthrough
CT: control target
= control target key end

     0   :  { %s4595_s18 = smov 0   ;;  %s6437_s0 = inlined_call_operand.vmem [shape: bf16[2,8,128], index: 0, kind: input, shape index: {}]   ;;  %s6438_s1 = inlined_call_operand.vmem [shape: f32[8,16], index: 1, kind: input, shape index: {}]   ;;  %s6439_s2 = inlined_call_operand.vmem [shape: f32[16,8], index: 2, kind: input, shape index: {}]   ;;  %s6440_s3 = inlined_call_operand.vmem [shape: f32[8,3], index: 3, kind: input, shape index: {}]   ;;  %s6441_s4 = inlined_call_operand.vmem [shape: f32[3,8], index: 4, kind: input, shape index: {}]   ;;  %s6442_s5 = inlined_call_operand.vmem [shape: f32[2,8,128], index: 5, kind: output, shape index: {}]  }
   0x1 LB: > { %s3896_s19 = sadd.s32 4294967295, %s4557_s18   ;;  %p3900_p0 = scmp.ge.s32.totalorder %s4557_s18, 1  ;;  %s4557_s18 = sphi %s4595_s18, %s15_s18  }
   0x2   : > { %p186_p1 = scmp.lt.s32.totalorder %s4557_s18, 3 }
   0x4   : > { %p187_p2 = pnand %p3900_p0, %p186_p1 }
   0x6   : > { %190 = sbr.rel (%p187_p2) target bundleno = 3845 (0xf05), region = 40 }
   0xb   : > { %v1630_v0 = vld [vmem:[%s6438_s1] sm:$0xff]  ;;  %p212_p3 = scmp.lt.s32.totalorder %s3896_s19, 1  ;;  %v4559_v4 = vmov 1.0   ;;  %vm6447_vm0 = vcmask 64512   ;;  %v6443_v23 = vmov 0.0   ;;  %v4561_v28 = vmov 0  }
   0xc   : > { %1631 = vxpose.xlu1.b32.start.end [1/1] (short) (narrow) %v1630_v0, 16  ;;  %4118 = vmatprep.subr.mxu1 %v4559_v4  ;;  %vm6448_vm1 = vmmov 0   ;;  %v4661_v47 = vld [vmem:[%s6441_s4] sm:$0x7]  ;;  %s4563_s30 = smov 127   ;;  %s4564_s12 = smov 126  }
   0xd   : > { %s6572_s19 = smov (!%p212_p3, %s3896_s19), 1  ;;  %4119 = vmatpush3.msra.mxu1 %v4559_v4 }
   0xe   : > { %s3901_s22 = sshll.u32 %s6572_s19, 2  ;;  %s3902_s15 = sshll.u32 %s6572_s19, 3 }
   0xf   : > { %s215_s25 = scalar_lea.vmem %s6437_s0, %s3901_s22  ;;  %s219_s20 = scalar_lea.vmem %s6442_s5, %s3902_s15 }
  0x10   : > { %v221_v1 = vld [vmem:[%s215_s25] sm:$0xf] }
  0x11   : > { %v222_v2 = vunpack.c.l.bf16 %v221_v1 }
  0x13   : > { %v4612_v3 = vmul.f32 %v222_v2, %v222_v2  ;;  %4170 = vmatprep.subr.mxu0 %v222_v2  ;;  %4144 = vmatprep.subr.mxu1 %v222_v2 }
  0x14   : > { %4171 = vmatpush3.msra.mxu0 %v222_v2 }
  0x15   : > { %230 = vxpose.xlu0.b32.start.end [1/1] (short) %v4612_v3, 128  ;;  %4201 = vmatprep.subr.mxu0 %v6443_v23  ;;  %v224_v60 = vrot.slane %v4612_v3, 4 }
  0x17   : > { %v225_v61 = vadd.f32 %v224_v60, %v4612_v3 }
  0x19   : > { %v226_v0 = vrot.slane %v225_v61, 2 }
  0x1b   : > { %v227_v4 = vadd.f32 %v226_v0, %v225_v61 }
  0x52   : > { %456 = vxpose.xlu0.b32.start.end [1/1] (short) %v222_v2, 128 }
  0x7b   : > { %4349 = vset.pattern.permute.xlu0 %v4561_v28 }
  0x88   : > { %v1647_v5 = vpop.trf.xlu1 }
  0x89   : > { %4172 = vmatprep.mubr.msk.f32.mxu0 %vm6447_vm0, %v1647_v5 }
  0x8c   : > { %v1648_v6 = vpop.trf.xlu1 }
  0x8d   : > { %4173 = vmatmul.mubr.msk.f32.vlgmr.msra.gmra.mxu0 %vm6447_vm0, %v1648_v6 }
  0x8e   : > { %4203 = vmatprep.mubr.msk.f32.mxu0 %vm6448_vm1, %v6443_v23 }
  0x91   : > { %v246_v7 = vpop.trf.xlu0 }
  0x92   : > { %4120 = vmatprep.mubr.msk.f32.mxu1 %vm6447_vm0, %v246_v7  ;;  %v228_v7 = vrot.slane %v227_v4, 1 }
  0x95   : > { %v247_v8 = vpop.trf.xlu0 }
  0x96   : > { %4121 = vmatmul.mubr.msk.f32.vlgmr.msra.gmra.mxu1 %vm6447_vm0, %v247_v8 }
  0x97   : > { %4145 = vmatpush3.msra.mxu1 %v222_v2 }
  0x99   : > { %v248_v9 = vpop.trf.xlu0 }
  0x9a   : > { %4123 = vmatprep.mubr.msk.f32.mxu1 %vm6447_vm0, %v248_v9  ;;  %v4680_v9 = vadd.f32 %v228_v7, %v227_v4 }
  0x9d   : > { %v249_v10 = vpop.trf.xlu0 }
  0x9e   : > { %4124 = vmatmul.mubr.msk.f32.gmra.mxu1 %vm6447_vm0, %v249_v10 }
  0xa1   : > { %v250_v11 = vpop.trf.xlu0 }
  0xa2   : > { %4126 = vmatprep.mubr.msk.f32.mxu1 %vm6447_vm0, %v250_v11 }
  0xa5   : > { %v251_v12 = vpop.trf.xlu0 }
  0xa6   : > { %4127 = vmatmul.mubr.msk.f32.gmra.mxu1 %vm6447_vm0, %v251_v12 }
  0xa9   : > { %v252_v13 = vpop.trf.xlu0 }
  0xaa   : > { %4129 = vmatprep.mubr.msk.f32.mxu1 %vm6447_vm0, %v252_v13 }
  0xad   : > { %v253_v14 = vpop.trf.xlu0 }
  0xae   : > { %4130 = vmatmul.mubr.msk.f32.gmra.mxu1 %vm6447_vm0, %v253_v14  ;;  %v6445_v14 = vlaneseq }
  0xb1   : > { %v254_v15 = vpop.trf.xlu0 }
  0xb2   : > { %4132 = vmatprep.mubr.msk.f32.mxu1 %vm6447_vm0, %v254_v15 }
  0xb5   : > { %v255_v16 = vpop.trf.xlu0 }
  0xb6   : > { %4133 = vmatmul.mubr.msk.f32.gmra.mxu1 %vm6447_vm0, %v255_v16 }
  0xb9   : > { %v256_v17 = vpop.trf.xlu0 }
  0xba   : > { %4135 = vmatprep.mubr.msk.f32.mxu1 %vm6447_vm0, %v256_v17 }
  0xbd   : > { %v257_v18 = vpop.trf.xlu0 }
  0xbe   : > { %4136 = vmatmul.mubr.msk.f32.gmra.mxu1 %vm6447_vm0, %v257_v18  ;;  %v4688_v18 = vand.u32 127, %v6445_v14 }
  0xc0   : > { %vm6451_vm2 = vcmp.lt.s32.totalorder %v4688_v18, 64 }
  0xc1   : > { %v258_v19 = vpop.trf.xlu0 }
  0xc2   : > { %4138 = vmatprep.mubr.msk.f32.mxu1 %vm6447_vm0, %v258_v19 }
  0xc5   : > { %v259_v20 = vpop.trf.xlu0 }
  0xc6   : > { %4139 = vmatmul.mubr.msk.f32.gmra.mxu1 %vm6447_vm0, %v259_v20 }
  0xc9   : > { %v260_v21 = vpop.trf.xlu0 }
  0xca   : > { %4141 = vmatprep.mubr.msk.f32.mxu1 %vm6447_vm0, %v260_v21 }
  0xcd   : > { %v261_v22 = vpop.trf.xlu0 }
  0xce   : > { %4142 = vmatmul.mubr.msk.f32.gmra.mxu1 %vm6447_vm0, %v261_v22 }
  0xd1   : > { %v472_v24 = vpop.trf.xlu0 }
  0xd2   : > { %4146 = vmatprep.mubr.msk.f32.mxu1 %vm6447_vm0, %v472_v24 }
  0xd5   : > { %v473_v25 = vpop.trf.xlu0 }
  0xd6   : > { %4147 = vmatmul.mubr.msk.f32.vlgmr.msra.gmra.mxu1 %vm6447_vm0, %v473_v25 }
  0xd9   : > { %v474_v26 = vpop.trf.xlu0 }
  0xda   : > { %4149 = vmatprep.mubr.msk.f32.mxu1 %vm6447_vm0, %v474_v26 }
  0xdd   : > { %v475_v27 = vpop.trf.xlu0 }
  0xde   : > { %4150 = vmatmul.mubr.msk.f32.gmra.mxu1 %vm6447_vm0, %v475_v27 }
  0xe1   : > { %v476_v29 = vpop.trf.xlu0 }
  0xe2   : > { %4152 = vmatprep.mubr.msk.f32.mxu1 %vm6447_vm0, %v476_v29 }
  0xe5   : > { %v477_v30 = vpop.trf.xlu0 }
  0xe6   : > { %4153 = vmatmul.mubr.msk.f32.gmra.mxu1 %vm6447_vm0, %v477_v30 }
  0xe9   : > { %v478_v31 = vpop.trf.xlu0 }
  0xea   : > { %4155 = vmatprep.mubr.msk.f32.mxu1 %vm6447_vm0, %v478_v31 }
  0xed   : > { %v479_v32 = vpop.trf.xlu0 }
  0xee   : > { %4156 = vmatmul.mubr.msk.f32.gmra.mxu1 %vm6447_vm0, %v479_v32 }
  0xf1   : > { %v480_v33 = vpop.trf.xlu0 }
  0xf2   : > { %4158 = vmatprep.mubr.msk.f32.mxu1 %vm6447_vm0, %v480_v33 }
  0xf5   : > { %v481_v34 = vpop.trf.xlu0 }
  0xf6   : > { %4159 = vmatmul.mubr.msk.f32.gmra.mxu1 %vm6447_vm0, %v481_v34 }
  0xf9   : > { %v482_v35 = vpop.trf.xlu0 }
  0xfa   : > { %4161 = vmatprep.mubr.msk.f32.mxu1 %vm6447_vm0, %v482_v35 }
  0xfd   : > { %v483_v36 = vpop.trf.xlu0 }
  0xfe   : > { %4162 = vmatmul.mubr.msk.f32.gmra.mxu1 %vm6447_vm0, %v483_v36 }
 0x101   : > { %v484_v37 = vpop.trf.xlu0 }
 0x102   : > { %4164 = vmatprep.mubr.msk.f32.mxu1 %vm6447_vm0, %v484_v37 }
 0x105   : > { %v485_v38 = vpop.trf.xlu0 }
 0x106   : > { %4165 = vmatmul.mubr.msk.f32.gmra.mxu1 %vm6447_vm0, %v485_v38 }
 0x109   : > { %v486_v39 = vpop.trf.xlu0 }
 0x10a   : > { %4167 = vmatprep.mubr.msk.f32.mxu1 %vm6447_vm0, %v486_v39 }
 0x10d   : > { %v487_v40 = vpop.trf.xlu0 }
 0x10e   : > { %4168 = vmatmul.mubr.msk.f32.gmra.mxu1 %vm6447_vm0, %v487_v40 }
 0x14d   : > { %v4650_v41 = vpop.f32.mrf.mxu0 }
 0x14e   : > { %2405 = vxpose.xlu1.b32.start.end [1/1] (short) %v4650_v41, 128 }
 0x14f   : > { %v4653_v42 = vpop.f32.mrf.mxu0 }
 0x150   : > { %4202 = vmatpush3.msra.mxu0 %v4653_v42 }
 0x151   : > { %4204 = vmatmul.mubr.msk.f32.vlgmr.msra.gmra.mxu0 %vm6447_vm0, %v4661_v47 }
 0x156   : > { %v4122_v43 = vpop.f32.mrf.mxu1 }
 0x158   : > { %v377_v44 = vpop.f32.mrf.mxu1 }
 0x15e   : > { %v4125_v45 = vpop.f32.mrf.mxu1 }
 0x160   : > { %v387_v46 = vpop.f32.mrf.mxu1 }
 0x161   : > { %693 = vperm.xlu0 %4349, %v387_v46  }
 0x166   : > { %v4128_v48 = vpop.f32.mrf.mxu1 }
 0x168   : > { %v397_v49 = vpop.f32.mrf.mxu1 }
 0x16c   : > { %4350 = vset.pattern.permute.xlu1 %v4561_v28 }
 0x16e   : > { %v4131_v50 = vpop.f32.mrf.mxu1 }
 0x170   : > { %v407_v51 = vpop.f32.mrf.mxu1 }
 0x176   : > { %v4134_v52 = vpop.f32.mrf.mxu1 }
 0x178   : > { %v417_v53 = vpop.f32.mrf.mxu1 }
 0x17e   : > { %v4137_v54 = vpop.f32.mrf.mxu1 }
 0x180   : > { %v427_v55 = vpop.f32.mrf.mxu1 }
 0x186   : > { %v4140_v56 = vpop.f32.mrf.mxu1 }
 0x188   : > { %v437_v57 = vpop.f32.mrf.mxu1 }
 0x18e   : > { %v4143_v58 = vpop.f32.mrf.mxu1 }
 0x190   : > { %v447_v59 = vpop.f32.mrf.mxu1 }
 0x196   : > { %v4668_v63 = vpop.f32.mrf.mxu1 }
 0x198   : > { %v4672_v2 = vpop.f32.mrf.mxu1 }
 0x19e   : > { %v4676_v6 = vpop.f32.mrf.mxu1 }
 0x1a0   : > { %v612_v8 = vpop.f32.mrf.mxu1 }
 0x1a1   : > { %v779_v11 = vmul.f32 2.0, %v612_v8 }
 0x1a6   : > { %v4717_v35 = vpop.f32.mrf.mxu1 }
 0x1a8   : > { %728 = vperm.xlu1 %4350, %v4134_v52   ;;  %v622_v37 = vpop.f32.mrf.mxu1 }
 0x1ac   : > { %723 = vperm.xlu1 %4350, %v417_v53  }
 0x1ae   : > { %v4157_v39 = vpop.f32.mrf.mxu1 }
 0x1b0   : > { %738 = vperm.xlu1 %4350, %v4137_v54  }
 0x1b4   : > { %733 = vperm.xlu1 %4350, %v427_v55  }
 0x1b8   : > { %748 = vperm.xlu1 %4350, %v4140_v56  }
 0x1bc   : > { %743 = vperm.xlu1 %4350, %v437_v57  }
 0x1c0   : > { %758 = vperm.xlu1 %4350, %v4143_v58  }
 0x1c4   : > { %753 = vperm.xlu1 %4350, %v447_v59  }
 0x1c8   : > { %713 = vperm.xlu1 %4350, %v407_v51  }
 0x1ca   : > { %v2421_v62 = vpop.trf.xlu1 }
 0x1cb   : > { %4228 = vmatprep.mubr.msk.f32.mxu0 %vm6447_vm0, %v2421_v62 }
 0x1cc   : > { %718 = vperm.xlu1 %4350, %v4131_v50  }
 0x1ce   : > { %v4670_v1 = vpop.trf.xlu1 }
 0x1d0   : > { %703 = vperm.xlu1 %4350, %v397_v49  }
 0x1d2   : > { %v4674_v5 = vpop.trf.xlu1 }
 0x1d4   : > { %708 = vperm.xlu1 %4350, %v4128_v48  }
 0x1d6   : > { %v4678_v3 = vpop.trf.xlu1 }
 0x1d8   : > { %698 = vperm.xlu1 %4350, %v4125_v45  }
 0x1da   : > { %v4682_v10 = vpop.trf.xlu1 }
 0x1dc   : > { %683 = vperm.xlu1 %4350, %v377_v44   ;;  %v694_v12 = vpop.permute.xlu0 %693 }
 0x1dd   : > { %v763_v13 = vadd.f32 %v694_v12, %v4680_v9  ;;  %v784_v12 = vmul.f32 2.0, %v4157_v39 }
 0x1de   : > { %v4685_v16 = vpop.trf.xlu1 }
 0x1df   : > { %v795_v15 = vsub.f32 %v763_v13, %v779_v11 }
 0x1e0   : > { %688 = vperm.xlu1 %4350, %v4122_v43   ;;  %v632_v43 = vpop.f32.mrf.mxu1 }
 0x1e1   : > { %v811_v17 = vmax.f32 %v795_v15, 0.0  ;;  %v783_v59 = vmul.f32 2.0, %v632_v43 }
 0x1e2   : > { %v4691_v21 = vpop.trf.xlu1  ;;  %v4160_v45 = vpop.f32.mrf.mxu1 }
 0x1e3   : > { %v830_v19 = vadd.f32 1.0, %v811_v17  ;;  %v786_v57 = vmul.f32 2.0, %v4160_v45 }
 0x1e4   : > { %v642_v46 = vpop.f32.mrf.mxu1 }
 0x1e5   : > { %v862_v20 = vand.u32 4294967168, %v830_v19  ;;  %v785_v8 = vmul.f32 2.0, %v642_v46 }
 0x1e6   : > { %v4699_v25 = vpop.trf.xlu1  ;;  %v4163_v49 = vpop.f32.mrf.mxu1 }
 0x1e7   : > { %v878_v22 = vor.u32 %v862_v20, %v4688_v18  ;;  %v788_v45 = vmul.f32 2.0, %v4163_v49 }
 0x1e8   : > { %v652_v50 = vpop.f32.mrf.mxu1 }
 0x1e9   : > { %v4696_v24 = vsel %vm6451_vm2, %v878_v22, 3e+38  ;;  %v781_v22 = vmul.f32 2.0, %v622_v37 }
 0x1ea   : > { %928 = vmin.xlane.f32.xlu0 %v4696_v24  ;;  %v4701_v26 = vpop.trf.xlu1  ;;  %v4166_v52 = vpop.f32.mrf.mxu1 }
 0x1eb   : > { %v790_v49 = vmul.f32 2.0, %v4166_v52 }
 0x1ec   : > { %v662_v53 = vpop.f32.mrf.mxu1 }
 0x1ed   : > { %v789_v52 = vmul.f32 2.0, %v662_v53 }
 0x1ee   : > { %v4703_v27 = vpop.trf.xlu1  ;;  %v4169_v55 = vpop.f32.mrf.mxu1 }
 0x1ef   : > { %v792_v61 = vmul.f32 2.0, %v4169_v55 }
 0x1f2   : > { %v4705_v28 = vpop.trf.xlu1 }
 0x1f6   : > { %v4707_v29 = vpop.trf.xlu1 }
 0x1fa   : > { %v4709_v30 = vpop.trf.xlu1 }
 0x1fe   : > { %v4711_v31 = vpop.trf.xlu1 }
 0x202   : > { %v4713_v32 = vpop.trf.xlu1 }
 0x206   : > { %v4715_v33 = vpop.trf.xlu1 }
 0x223   : > { %v729_v34 = vpop.permute.xlu1 %728 }
 0x224   : > { %v770_v56 = vadd.f32 %v729_v34, %v4680_v9 }
 0x226   : > { %v802_v0 = vsub.f32 %v770_v56, %v786_v57 }
 0x227   : > { %v724_v36 = vpop.permute.xlu1 %723 }
 0x228   : > { %v769_v7 = vadd.f32 %v724_v36, %v4680_v9  ;;  %v818_v19 = vmax.f32 %v802_v0, 0.0 }
 0x22a   : > { %v801_v34 = vsub.f32 %v769_v7, %v785_v8  ;;  %v837_v46 = vadd.f32 1.0, %v818_v19 }
 0x22b   : > { %v739_v38 = vpop.permute.xlu1 %738 }
 0x22c   : > { %v772_v43 = vadd.f32 %v739_v38, %v4680_v9  ;;  %v869_v38 = vand.u32 4294967168, %v837_v46 }
 0x22f   : > { %v734_v40 = vpop.permute.xlu1 %733 }
 0x233   : > { %v749_v44 = vpop.permute.xlu1 %748 }
 0x237   : > { %v4719_v48 = vpop.permute.xlu1 %743 }
 0x23b   : > { %v759_v51 = vpop.permute.xlu1 %758 }
 0x23c   : > { %v776_v60 = vadd.f32 %v759_v51, %v4680_v9 }
 0x23e   : > { %v808_v13 = vsub.f32 %v776_v60, %v792_v61  ;;  %v804_v60 = vsub.f32 %v772_v43, %v788_v45  ;;  %v771_v61 = vadd.f32 %v734_v40, %v4680_v9  ;;  %v885_v43 = vor.u32 %v869_v38, %v4688_v18 }
 0x23f   : > { %v4721_v54 = vpop.permute.xlu1 %753 }
 0x240   : > { %v824_v55 = vmax.f32 %v808_v13, 0.0  ;;  %v820_v13 = vmax.f32 %v804_v60, 0.0 }
 0x242   : > { %v843_v0 = vadd.f32 1.0, %v824_v55 }
 0x243   : > { %v714_v58 = vpop.permute.xlu1 %713 }
 0x244   : > { %v767_v62 = vadd.f32 %v714_v58, %v4680_v9 }
 0x246   : > { %v799_v4 = vsub.f32 %v767_v62, %v783_v59  ;;  %v817_v59 = vmax.f32 %v801_v34, 0.0  ;;  %v787_v62 = vmul.f32 2.0, %v652_v50 }
 0x247   : > { %v719_v11 = vpop.permute.xlu1 %718 }
 0x248   : > { %v815_v15 = vmax.f32 %v799_v4, 0.0  ;;  %v768_v17 = vadd.f32 %v719_v11, %v4680_v9 }
 0x24a   : > { %v800_v20 = vsub.f32 %v768_v17, %v784_v12  ;;  %v834_v56 = vadd.f32 1.0, %v815_v15  ;;  %v836_v12 = vadd.f32 1.0, %v817_v59  ;;  %v803_v15 = vsub.f32 %v771_v61, %v787_v62 }
 0x24b   : > { %v704_v51 = vpop.permute.xlu1 %703  ;;  %v774_v17 = vadd.f32 %v749_v44, %v4680_v9  ;;  %v773_v44 = vadd.f32 %v4719_v48, %v4680_v9  ;;  %v4756_v61 = vsel %vm6451_vm2, %v885_v43, 3e+38 }
 0x24c   : > { %v816_v57 = vmax.f32 %v800_v20, 0.0  ;;  %v765_v36 = vadd.f32 %v704_v51, %v4680_v9  ;;  %v866_v7 = vand.u32 4294967168, %v834_v56  ;;  %v875_v20 = vand.u32 4294967168, %v843_v0  ;;  %v672_v56 = vpop.f32.mrf.mxu1 }
 0x24d   : > { %v868_v45 = vand.u32 4294967168, %v836_v12  ;;  %v819_v51 = vmax.f32 %v803_v15, 0.0  ;;  %v806_v55 = vsub.f32 %v774_v17, %v790_v49  ;;  %v805_v60 = vsub.f32 %v773_v44, %v789_v52 }
 0x24e   : > { %v835_v58 = vadd.f32 1.0, %v816_v57  ;;  %v797_v39 = vsub.f32 %v765_v36, %v781_v22  ;;  %v882_v50 = vor.u32 %v866_v7, %v4688_v18  ;;  %v839_v57 = vadd.f32 1.0, %v820_v13 }
 0x24f   : > { %v709_v19 = vpop.permute.xlu1 %708  ;;  %v891_v53 = vor.u32 %v875_v20, %v4688_v18  ;;  %v838_v59 = vadd.f32 1.0, %v819_v51  ;;  %v822_v48 = vmax.f32 %v806_v55, 0.0  ;;  %v775_v0 = vadd.f32 %v4721_v54, %v4680_v9 }
 0x250   : > { %v813_v37 = vmax.f32 %v797_v39, 0.0  ;;  %v867_v4 = vand.u32 4294967168, %v835_v58  ;;  %v4745_v36 = vsel %vm6451_vm2, %v882_v50, 3e+38  ;;  %v791_v39 = vmul.f32 2.0, %v672_v56 }
 0x251   : > { %v871_v62 = vand.u32 4294967168, %v839_v57  ;;  %v870_v7 = vand.u32 4294967168, %v838_v59  ;;  %v841_v38 = vadd.f32 1.0, %v822_v48  ;;  %v821_v49 = vmax.f32 %v805_v60, 0.0 }
 0x252   : > { %v832_v8 = vadd.f32 1.0, %v813_v37  ;;  %v883_v11 = vor.u32 %v867_v4, %v4688_v18  ;;  %v4762_v37 = vsel %vm6451_vm2, %v891_v53, 3e+38  ;;  %v884_v4 = vor.u32 %v868_v45, %v4688_v18 }
 0x253   : > { %v699_v58 = vpop.permute.xlu1 %698  ;;  %v766_v12 = vadd.f32 %v709_v19, %v4680_v9  ;;  %v887_v13 = vor.u32 %v871_v62, %v4688_v18  ;;  %v782_v15 = vmul.f32 2.0, %v4717_v35  ;;  %v873_v17 = vand.u32 4294967168, %v841_v38 }
 0x254   : > { %v4735_v40 = vsel %vm6451_vm2, %v883_v11, 3e+38  ;;  %v864_v22 = vand.u32 4294967168, %v832_v8  ;;  %v807_v11 = vsub.f32 %v775_v0, %v791_v39  ;;  %v4770_v54 = vsel %vm6451_vm2, %v884_v4, 3e+38 }
 0x255   : > { %938 = vmin.xlane.f32.xlu1 %v4735_v40  ;;  %v840_v20 = vadd.f32 1.0, %v821_v49  ;;  %v886_v50 = vor.u32 %v870_v7, %v4688_v18  ;;  %v798_v52 = vsub.f32 %v766_v12, %v782_v15  ;;  %v4779_v19 = vsel %vm6451_vm2, %v887_v13, 3e+38 }
 0x256   : > { %v880_v34 = vor.u32 %v864_v22, %v4688_v18  ;;  %v823_v22 = vmax.f32 %v807_v11, 0.0  ;;  %v780_v45 = vmul.f32 2.0, %v4676_v6  ;;  %v889_v55 = vor.u32 %v873_v17, %v4688_v18 }
 0x257   : > { %v684_v8 = vpop.permute.xlu1 %683  ;;  %v872_v51 = vand.u32 4294967168, %v840_v20  ;;  %v4785_v35 = vsel %vm6451_vm2, %v886_v50, 3e+38  ;;  %v814_v56 = vmax.f32 %v798_v52, 0.0 }
 0x258   : > { %v4749_v46 = vsel %vm6451_vm2, %v880_v34, 3e+38  ;;  %v764_v34 = vadd.f32 %v699_v58, %v4680_v9  ;;  %v842_v44 = vadd.f32 1.0, %v823_v22  ;;  %v778_v58 = vmul.f32 2.0, %v4668_v63 }
 0x259   : > { %936 = vmin.xlane.f32.xlu1 %v4745_v36  ;;  %932 = vmin.xlane.f32.xlu0 %v4749_v46  ;;  %v4793_v39 = vsel %vm6451_vm2, %v889_v55, 3e+38  ;;  %v888_v6 = vor.u32 %v872_v51, %v4688_v18  ;;  %v833_v48 = vadd.f32 1.0, %v814_v56 }
 0x25a   : > { %v796_v57 = vsub.f32 %v764_v34, %v780_v45  ;;  %v874_v59 = vand.u32 4294967168, %v842_v44  ;;  %v4824_v34 = vld [vmem:[%s6440_s3] sm:$0xff]  ;;  %v777_v45 = vmul.f32 2.0, %v4672_v2 }
 0x25b   : > { %v689_v43 = vpop.permute.xlu1 %688  ;;  %v920_v0 = vsel %vm6451_vm2, %v888_v6, 3e+38  ;;  %v865_v63 = vand.u32 4294967168, %v833_v48  ;;  %4175 = vmatprep.subr.mxu1 %v4824_v34 }
 0x25c   : > { %v762_v53 = vadd.f32 %v689_v43, %v4680_v9  ;;  %v812_v60 = vmax.f32 %v796_v57, 0.0  ;;  %v890_v38 = vor.u32 %v874_v59, %v4688_v18  ;;  %4176 = vmatpush3.msra.mxu1 %v4824_v34  ;;  %v761_v43 = vadd.f32 %v684_v8, %v4680_v9 }
 0x25d   : > { %942 = vmin.xlane.f32.xlu1 %v4756_v61  ;;  %954 = vmin.xlane.f32.xlu0 %v4762_v37  ;;  %v881_v12 = vor.u32 %v865_v63, %v4688_v18 }
 0x25e   : > { %v794_v62 = vsub.f32 %v762_v53, %v778_v58  ;;  %v831_v4 = vadd.f32 1.0, %v812_v60  ;;  %v922_v11 = vsel %vm6451_vm2, %v890_v38, 3e+38  ;;  %4206 = vmatprep.subr.bf16.mxu1 %v6443_v23  ;;  %v793_v51 = vsub.f32 %v761_v43, %v777_v45 }
 0x25f   : > { %v4805_v15 = vsel %vm6451_vm2, %v881_v12, 3e+38 }
 0x260   : > { %v810_v7 = vmax.f32 %v794_v62, 0.0  ;;  %v863_v13 = vand.u32 4294967168, %v831_v4  ;;  %v809_v44 = vmax.f32 %v793_v51, 0.0 }
 0x261   : > { %940 = vmin.xlane.f32.xlu1 %v4770_v54 }
 0x262   : > { %v829_v49 = vadd.f32 1.0, %v810_v7  ;;  %v879_v17 = vor.u32 %v863_v13, %v4688_v18  ;;  %v828_v57 = vadd.f32 1.0, %v809_v44 }
 0x264   : > { %v861_v20 = vand.u32 4294967168, %v829_v49  ;;  %v4811_v50 = vsel %vm6451_vm2, %v879_v17, 3e+38  ;;  %v860_v58 = vand.u32 4294967168, %v828_v57 }
 0x265   : > { %946 = vmin.xlane.f32.xlu1 %v4779_v19 }
 0x266   : > { %v877_v22 = vor.u32 %v861_v20, %v4688_v18  ;;  %v876_v48 = vor.u32 %v860_v58, %v4688_v18 }
 0x268   : > { %v4817_v52 = vsel %vm6451_vm2, %v877_v22, 3e+38  ;;  %v4840_v9 = vsel %vm6451_vm2, %v876_v48, 3e+38 }
 0x269   : > { %944 = vmin.xlane.f32.xlu1 %v4785_v35 }
 0x26d   : > { %950 = vmin.xlane.f32.xlu1 %v4793_v39 }
 0x271   : > { %948 = vmin.xlane.f32.xlu1 %v920_v0 }
 0x273   : > { %v929_v38 = vpop.xlane.xlu0 %928 }
 0x275   : > { %952 = vmin.xlane.f32.xlu1 %v922_v11 }
 0x279   : > { %934 = vmin.xlane.f32.xlu1 %v4805_v15 }
 0x27d   : > { %930 = vmin.xlane.f32.xlu1 %v4811_v50 }
 0x281   : > { %926 = vmin.xlane.f32.xlu1 %v4817_v52 }
 0x28a   : > { %1744 = vxpose.xlu0.b32.start.end [1/1] (short) %v4653_v42, 128 }
 0x2de   : > { %v4831_v55 = vpop.xlane.xlu1 %938 }
 0x2e2   : > { %v937_v56 = vpop.xlane.xlu1 %936  ;;  %v933_v13 = vpop.xlane.xlu0 %932 }
 0x2e3   : > { %v978_v60 = vand.u32 127, %v937_v56  ;;  %v976_v45 = vand.u32 127, %v933_v13  ;;  %v974_v56 = vand.u32 127, %v929_v38 }
 0x2e5   : > { %vm994_vm3 = vcmp.eq.s32.totalorder %v4688_v18, %v978_v60  ;;  %vm992_vm8 = vcmp.eq.s32.totalorder %v4688_v18, %v976_v45  ;;  %vm990_vm9 = vcmp.eq.s32.totalorder %v4688_v18, %v974_v56 }
 0x2e6   : > { %v4833_v53 = vpop.xlane.xlu1 %942  ;;  %v4847_v4 = vsel %vm994_vm3, 3e+38, %v4745_v36  ;;  %v4861_v22 = vpop.xlane.xlu0 %954  ;;  %v4883_v60 = vsel %vm990_vm9, 3e+38, %v4696_v24 }
 0x2ea   : > { %v941_v6 = vpop.xlane.xlu1 %940 }
 0x2eb   : > { %v980_v2 = vand.u32 127, %v941_v6 }
 0x2ed   : > { %vm996_vm4 = vcmp.eq.s32.totalorder %v4688_v18, %v980_v2 }
 0x2ee   : > { %v4835_v59 = vpop.xlane.xlu1 %946  ;;  %v4852_v49 = vsel %vm996_vm4, 3e+38, %v4770_v54 }
 0x2f2   : > { %v945_v62 = vpop.xlane.xlu1 %944 }
 0x2f3   : > { %924 = vmin.xlane.f32.xlu0 %v4840_v9  ;;  %v982_v7 = vand.u32 127, %v945_v62 }
 0x2f5   : > { %vm998_vm5 = vcmp.eq.s32.totalorder %v4688_v18, %v982_v7 }
 0x2f6   : > { %v4844_v8 = vpop.xlane.xlu1 %950  ;;  %v4857_v36 = vsel %vm998_vm5, 3e+38, %v4785_v35 }
 0x2f7   : > { %1032 = vmin.xlane.f32.xlu0 %v4847_v4  ;;  %v985_v13 = vand.u32 127, %v4844_v8 }
 0x2f9   : > { %vm1001_vm3 = vcmp.eq.s32.totalorder %v4688_v18, %v985_v13 }
 0x2fa   : > { %v949_v63 = vpop.xlane.xlu1 %948 }
 0x2fb   : > { %v984_v12 = vand.u32 127, %v949_v63  ;;  %1036 = vmin.xlane.f32.xlu0 %v4852_v49  ;;  %v981_v63 = vand.u32 127, %v4833_v53 }
 0x2fd   : > { %vm1000_vm6 = vcmp.eq.s32.totalorder %v4688_v18, %v984_v12  ;;  %v983_v12 = vand.u32 127, %v4835_v59  ;;  %vm997_vm14 = vcmp.eq.s32.totalorder %v4688_v18, %v981_v63 }
 0x2fe   : > { %v953_v17 = vpop.xlane.xlu1 %952  ;;  %v4863_v54 = vsel %vm1000_vm6, 3e+38, %v920_v0  ;;  %v4873_v0 = vsel %vm992_vm8, 3e+38, %v4749_v46 }
 0x2ff   : > { %v986_v20 = vand.u32 127, %v953_v17  ;;  %1040 = vmin.xlane.f32.xlu0 %v4857_v36  ;;  %vm999_vm15 = vcmp.eq.s32.totalorder %v4688_v18, %v983_v12  ;;  %v987_v17 = vand.u32 127, %v4861_v22 }
 0x301   : > { %vm1002_vm7 = vcmp.eq.s32.totalorder %v4688_v18, %v986_v20  ;;  %vm1003_vm4 = vcmp.eq.s32.totalorder %v4688_v18, %v987_v17 }
 0x302   : > { %v935_v43 = vpop.xlane.xlu1 %934  ;;  %v4867_v44 = vsel %vm1002_vm7, 3e+38, %v922_v11 }
 0x303   : > { %1044 = vmin.xlane.f32.xlu0 %v4863_v54  ;;  %v977_v46 = vand.u32 127, %v935_v43 }
 0x305   : > { %vm993_vm12 = vcmp.eq.s32.totalorder %v4688_v18, %v977_v46 }
 0x306   : > { %v931_v51 = vpop.xlane.xlu1 %930  ;;  %v1760_v35 = vpop.trf.xlu0  ;;  %v4897_v24 = vsel %vm993_vm12, 3e+38, %v4805_v15  ;;  %v4911_v15 = vsel %vm997_vm14, 3e+38, %v4756_v61  ;;  %v4925_v61 = vsel %vm1001_vm3, 3e+38, %v4793_v39 }
 0x307   : > { %1048 = vmin.xlane.f32.xlu0 %v4867_v44  ;;  %4177 = vmatprep.mubr.msk.f32.mxu1 %vm6447_vm0, %v1760_v35  ;;  %v975_v6 = vand.u32 127, %v931_v51 }
 0x309   : > { %vm991_vm11 = vcmp.eq.s32.totalorder %v4688_v18, %v975_v6 }
 0x30a   : > { %v927_v57 = vpop.xlane.xlu1 %926  ;;  %v1761_v58 = vpop.trf.xlu0  ;;  %v4890_v2 = vsel %vm991_vm11, 3e+38, %v4811_v50 }
 0x30b   : > { %v973_v48 = vand.u32 127, %v927_v57  ;;  %1028 = vmin.xlane.f32.xlu0 %v4873_v0  ;;  %4178 = vmatmul.mubr.msk.f32.vlgmr.msra.gmra.mxu1 %vm6447_vm0, %v1761_v58 }
 0x30d   : > { %vm989_vm10 = vcmp.eq.s32.totalorder %v4688_v18, %v973_v48 }
 0x30e   : > { %v4880_v11 = vsel %vm989_vm10, 3e+38, %v4817_v52  ;;  %v1762_v62 = vpop.trf.xlu0  ;;  %v979_v52 = vand.u32 127, %v4831_v55 }
 0x30f   : > { %1022 = vmin.xlane.f32.xlu1 %v4880_v11  ;;  %1024 = vmin.xlane.f32.xlu0 %v4883_v60 }
 0x310   : > { %4180 = vmatprep.mubr.msk.f32.mxu1 %vm6447_vm0, %v1762_v62  ;;  %vm995_vm13 = vcmp.eq.s32.totalorder %v4688_v18, %v979_v52 }
 0x311   : > { %v4904_v50 = vsel %vm995_vm13, 3e+38, %v4735_v40  ;;  %v4918_v40 = vsel %vm999_vm15, 3e+38, %v4779_v19  ;;  %v4931_v19 = vsel %vm1003_vm4, 3e+38, %v4762_v37 }
 0x312   : > { %v1763_v7 = vpop.trf.xlu0 }
 0x313   : > { %1026 = vmin.xlane.f32.xlu1 %v4890_v2  ;;  %4181 = vmatmul.mubr.msk.f32.gmra.mxu1 %vm6447_vm0, %v1763_v7 }
 0x316   : > { %v1764_v38 = vpop.trf.xlu0 }
 0x317   : > { %1030 = vmin.xlane.f32.xlu1 %v4897_v24  ;;  %4183 = vmatprep.mubr.msk.f32.mxu1 %vm6447_vm0, %v1764_v38 }
 0x31a   : > { %v1765_v55 = vpop.trf.xlu0 }
 0x31b   : > { %1034 = vmin.xlane.f32.xlu1 %v4904_v50  ;;  %4184 = vmatmul.mubr.msk.f32.gmra.mxu1 %vm6447_vm0, %v1765_v55 }
 0x31e   : > { %v1766_v53 = vpop.trf.xlu0 }
 0x31f   : > { %1038 = vmin.xlane.f32.xlu1 %v4911_v15  ;;  %4186 = vmatprep.mubr.msk.f32.mxu1 %vm6447_vm0, %v1766_v53 }
 0x322   : > { %v1767_v59 = vpop.trf.xlu0 }
 0x323   : > { %1042 = vmin.xlane.f32.xlu1 %v4918_v40  ;;  %4187 = vmatmul.mubr.msk.f32.gmra.mxu1 %vm6447_vm0, %v1767_v59 }
 0x326   : > { %v1768_v8 = vpop.trf.xlu0 }
 0x327   : > { %1046 = vmin.xlane.f32.xlu1 %v4925_v61  ;;  %4189 = vmatprep.mubr.msk.f32.mxu1 %vm6447_vm0, %v1768_v8 }
 0x32a   : > { %v1769_v20 = vpop.trf.xlu0 }
 0x32b   : > { %1050 = vmin.xlane.f32.xlu1 %v4931_v19  ;;  %4190 = vmatmul.mubr.msk.f32.gmra.mxu1 %vm6447_vm0, %v1769_v20 }
 0x32e   : > { %v1770_v22 = vpop.trf.xlu0 }
 0x32f   : > { %4192 = vmatprep.mubr.msk.f32.mxu1 %vm6447_vm0, %v1770_v22 }
 0x332   : > { %v1771_v39 = vpop.trf.xlu0 }
 0x333   : > { %4193 = vmatmul.mubr.msk.f32.gmra.mxu1 %vm6447_vm0, %v1771_v39 }
 0x336   : > { %v1772_v43 = vpop.trf.xlu0 }
 0x337   : > { %4195 = vmatprep.mubr.msk.f32.mxu1 %vm6447_vm0, %v1772_v43 }
 0x33a   : > { %v1773_v45 = vpop.trf.xlu0 }
 0x33b   : > { %4196 = vmatmul.mubr.msk.f32.gmra.mxu1 %vm6447_vm0, %v1773_v45 }
 0x33e   : > { %v1774_v51 = vpop.trf.xlu0 }
 0x33f   : > { %4198 = vmatprep.mubr.msk.f32.mxu1 %vm6447_vm0, %v1774_v51 }
 0x342   : > { %v1775_v37 = vpop.trf.xlu0 }
 0x343   : > { %4199 = vmatmul.mubr.msk.f32.gmra.mxu1 %vm6447_vm0, %v1775_v37 }
 0x344   : > { %4222 = vmatprep.mubr.msk.bf16.mxu1 %vm6448_vm1, %v6443_v23 }
 0x37c   : > { %v925_v35 = vpop.xlane.xlu0 %924 }
 0x37d   : > { %v972_v56 = vand.u32 127, %v925_v35 }
 0x37f   : > { %vm988_vm5 = vcmp.eq.s32.totalorder %v4688_v18, %v972_v56 }
 0x380   : > { %v1033_v57 = vpop.xlane.xlu0 %1032  ;;  %v4945_v58 = vsel %vm988_vm5, 3e+38, %v4840_v9 }
 0x381   : > { %1020 = vmin.xlane.f32.xlu0 %v4945_v58  ;;  %v1074_v53 = vand.u32 127, %v1033_v57 }
 0x383   : > { %vm1090_vm8 = vcmp.eq.s32.totalorder %v4688_v18, %v1074_v53 }
 0x384   : > { %v1037_v6 = vpop.xlane.xlu0 %1036  ;;  %v4963_v8 = vsel %vm1090_vm8, 3e+38, %v4847_v4 }
 0x385   : > { %v1076_v20 = vand.u32 127, %v1037_v6 }
 0x387   : > { %vm1092_vm10 = vcmp.eq.s32.totalorder %v4688_v18, %v1076_v20 }
 0x388   : > { %v1041_v48 = vpop.xlane.xlu0 %1040  ;;  %v4974_v4 = vsel %vm1092_vm10, 3e+38, %v4852_v49 }
 0x389   : > { %v1078_v22 = vand.u32 127, %v1041_v48 }
 0x38b   : > { %vm1094_vm11 = vcmp.eq.s32.totalorder %v4688_v18, %v1078_v22 }
 0x38c   : > { %v1045_v62 = vpop.xlane.xlu0 %1044  ;;  %v4978_v37 = vsel %vm1094_vm11, 3e+38, %v4857_v36 }
 0x38d   : > { %v1080_v45 = vand.u32 127, %v1045_v62 }
 0x38f   : > { %vm1096_vm13 = vcmp.eq.s32.totalorder %v4688_v18, %v1080_v45 }
 0x390   : > { %v1049_v46 = vpop.xlane.xlu0 %1048  ;;  %v4988_v49 = vsel %vm1096_vm13, 3e+38, %v4863_v54 }
 0x394   : > { %v1029_v7 = vpop.xlane.xlu0 %1028 }
 0x395   : > { %v1072_v52 = vand.u32 127, %v1029_v7 }
 0x397   : > { %2438 = vrot.lane.b32.xlu0 %v4824_v34, %s4563_s30  ;;  %vm1088_vm6 = vcmp.eq.s32.totalorder %v4688_v18, %v1072_v52 }
 0x398   : > { %v4950_v38 = vpop.xlane.xlu1 %1022  ;;  %v4953_v63 = vsel %vm1088_vm6, 3e+38, %v4873_v0  ;;  %v1025_v6 = vpop.xlane.xlu0 %1024 }
 0x399   : > { %1124 = vmin.xlane.f32.xlu1 %v4953_v63  ;;  %v1070_v54 = vand.u32 127, %v1025_v6  ;;  %v1069_v7 = vand.u32 127, %v4950_v38 }
 0x39b   : > { %vm1086_vm5 = vcmp.eq.s32.totalorder %v4688_v18, %v1070_v54 }
 0x39c   : > { %v1027_v9 = vpop.xlane.xlu1 %1026 }
 0x3a0   : > { %v1031_v55 = vpop.xlane.xlu1 %1030 }
 0x3a1   : > { %v1073_v36 = vand.u32 127, %v1031_v55 }
 0x3a3   : > { %vm1089_vm4 = vcmp.eq.s32.totalorder %v4688_v18, %v1073_v36 }
 0x3a4   : > { %v1035_v12 = vpop.xlane.xlu1 %1034 }
 0x3a5   : > { %v1075_v13 = vand.u32 127, %v1035_v12 }
 0x3a7   : > { %vm1091_vm7 = vcmp.eq.s32.totalorder %v4688_v18, %v1075_v13 }
 0x3a8   : > { %v1039_v59 = vpop.xlane.xlu1 %1038  ;;  %v4958_v17 = vsel %vm1091_vm7, 3e+38, %v4904_v50  ;;  %vm1085_vm7 = vcmp.eq.s32.totalorder %v4688_v18, %v1069_v7 }
 0x3a9   : > { %v1077_v34 = vand.u32 127, %v1039_v59  ;;  %1130 = vmin.xlane.f32.xlu1 %v4958_v17 }
 0x3ab   : > { %vm1093_vm9 = vcmp.eq.s32.totalorder %v4688_v18, %v1077_v34 }
 0x3ac   : > { %v1043_v0 = vpop.xlane.xlu1 %1042  ;;  %v4968_v43 = vsel %vm1093_vm9, 3e+38, %v4911_v15  ;;  %v1082_v15 = vand.u32 127, %v1049_v46  ;;  %v1071_v46 = vand.u32 127, %v1027_v9 }
 0x3ad   : > { %1128 = vmin.xlane.f32.xlu1 %v4963_v8  ;;  %v1079_v50 = vand.u32 127, %v1043_v0 }
 0x3ae   : > { %vm1098_vm15 = vcmp.eq.s32.totalorder %v4688_v18, %v1082_v15  ;;  %vm1087_vm6 = vcmp.eq.s32.totalorder %v4688_v18, %v1071_v46 }
 0x3af   : > { %vm1095_vm12 = vcmp.eq.s32.totalorder %v4688_v18, %v1079_v50 }
 0x3b0   : > { %v1047_v39 = vpop.xlane.xlu1 %1046  ;;  %v4984_v56 = vsel %vm1095_vm12, 3e+38, %v4918_v40  ;;  %v4998_v40 = vsel %vm1098_vm15, 3e+38, %v4867_v44  ;;  %v5013_v44 = vsel %vm1086_vm5, 3e+38, %v4883_v60 }
 0x3b1   : > { %1134 = vmin.xlane.f32.xlu1 %v4968_v43  ;;  %v1081_v51 = vand.u32 127, %v1047_v39 }
 0x3b3   : > { %vm1097_vm14 = vcmp.eq.s32.totalorder %v4688_v18, %v1081_v51 }
 0x3b4   : > { %v1051_v35 = vpop.xlane.xlu1 %1050  ;;  %v4994_v48 = vsel %vm1097_vm14, 3e+38, %v4925_v61  ;;  %v5008_v61 = vsel %vm1089_vm4, 3e+38, %v4897_v24  ;;  %v5024_v24 = vsel %vm1085_vm7, 3e+38, %v4880_v11  ;;  %v5045_v11 = vpop.f32.mrf.mxu0 }
 0x3b5   : > { %1132 = vmin.xlane.f32.xlu1 %v4974_v4  ;;  %v1083_v57 = vand.u32 127, %v1051_v35 }
 0x3b6   : > { %1136 = vmin.xlane.f32.xlu0 %v4978_v37 }
 0x3b7   : > { %vm1099_vm3 = vcmp.eq.s32.totalorder %v4688_v18, %v1083_v57 }
 0x3b8   : > { %v5004_v62 = vsel %vm1099_vm3, 3e+38, %v4931_v19  ;;  %v5019_v19 = vsel %vm1087_vm6, 3e+38, %v4890_v2 }
 0x3b9   : > { %1138 = vmin.xlane.f32.xlu1 %v4984_v56 }
 0x3ba   : > { %1140 = vmin.xlane.f32.xlu0 %v4988_v49 }
 0x3bd   : > { %1142 = vmin.xlane.f32.xlu1 %v4994_v48 }
 0x3be   : > { %1144 = vmin.xlane.f32.xlu0 %v4998_v40 }
 0x3c1   : > { %1146 = vmin.xlane.f32.xlu1 %v5004_v62 }
 0x3c2   : > { %1126 = vmin.xlane.f32.xlu0 %v5008_v61 }
 0x3c6   : > { %1120 = vmin.xlane.f32.xlu0 %v5013_v44 }
 0x3ca   : > { %1122 = vmin.xlane.f32.xlu0 %v5019_v19 }
 0x3ce   : > { %1118 = vmin.xlane.f32.xlu0 %v5024_v24 }
 0x40a   : > { %v1021_v60 = vpop.xlane.xlu0 %1020 }
 0x40b   : > { %v1068_v52 = vand.u32 127, %v1021_v60 }
 0x40d   : > { %vm1084_vm8 = vcmp.eq.s32.totalorder %v4688_v18, %v1068_v52 }
 0x40e   : > { %v2439_v38 = vpop.permute.xlu0 %2438  ;;  %v5029_v9 = vsel %vm1084_vm8, 3e+38, %v4945_v58 }
 0x40f   : > { %1116 = vmin.xlane.f32.xlu1 %v5029_v9  ;;  %4226 = vmatprep.subr.mxu0 %v2439_v38 }
 0x410   : > { %4227 = vmatpush3.msra.mxu0 %v2439_v38 }
 0x411   : > { %4229 = vmatmul.mubr.msk.f32.vlgmr.msra.gmra.mxu0 %vm6447_vm0, %v4670_v1  ;;  %4252 = vmatprep.subr.mxu0 %v6443_v23  ;;  %v4205_v1 = vpop.f32.mrf.mxu0 }
 0x412   : > { %4231 = vmatprep.mubr.msk.f32.mxu0 %vm6447_vm0, %v4674_v5  ;;  %4253 = vmatpush3.msra.mxu0 %v4650_v41  ;;  %v2634_v5 = vrot.slane %v4661_v47, 1 }
 0x413   : > { %4257 = vmatprep.subr.bf16.mxu0 %v6443_v23 }
 0x415   : > { %4232 = vmatmul.mubr.msk.f32.gmra.mxu0 %vm6447_vm0, %v4678_v3  ;;  %v5073_v3 = vpop.f32.mrf.mxu1 }
 0x416   : > { %4234 = vmatprep.mubr.msk.f32.mxu0 %vm6447_vm0, %v4682_v10 }
 0x417   : > { %v5075_v10 = vpop.f32.mrf.mxu1 }
 0x419   : > { %4235 = vmatmul.mubr.msk.f32.gmra.mxu0 %vm6447_vm0, %v4685_v16  ;;  %v5077_v16 = vpop.f32.mrf.mxu1 }
 0x41a   : > { %4237 = vmatprep.mubr.msk.f32.mxu0 %vm6447_vm0, %v4691_v21 }
 0x41b   : > { %v5079_v21 = vpop.f32.mrf.mxu1 }
 0x41d   : > { %4238 = vmatmul.mubr.msk.f32.gmra.mxu0 %vm6447_vm0, %v4699_v25  ;;  %v5081_v47 = vpop.f32.mrf.mxu1 }
 0x41e   : > { %4240 = vmatprep.mubr.msk.f32.mxu0 %vm6447_vm0, %v4701_v26 }
 0x41f   : > { %v5085_v26 = vpop.f32.mrf.mxu1 }
 0x421   : > { %4241 = vmatmul.mubr.msk.f32.gmra.mxu0 %vm6447_vm0, %v4703_v27 }
 0x422   : > { %4243 = vmatprep.mubr.msk.f32.mxu0 %vm6447_vm0, %v4705_v28  ;;  %v5089_v28 = vpop.f32.mrf.mxu1  ;;  %v1125_v57 = vpop.xlane.xlu1 %1124 }
 0x425   : > { %4244 = vmatmul.mubr.msk.f32.gmra.mxu0 %vm6447_vm0, %v4707_v29 }
 0x426   : > { %4246 = vmatprep.mubr.msk.f32.mxu0 %vm6447_vm0, %v4709_v30 }
 0x429   : > { %4247 = vmatmul.mubr.msk.f32.gmra.mxu0 %vm6447_vm0, %v4711_v31  ;;  %v5095_v31 = vpop.f32.mrf.mxu1 }
 0x42a   : > { %4249 = vmatprep.mubr.msk.f32.mxu0 %vm6447_vm0, %v4713_v32 }
 0x42d   : > { %4250 = vmatmul.mubr.msk.f32.gmra.mxu0 %vm6447_vm0, %v4715_v33  ;;  %v5099_v33 = vpop.f32.mrf.mxu1 }
 0x42e   : > { %4254 = vmatprep.mubr.msk.f32.mxu0 %vm6448_vm1, %v6443_v23 }
 0x42f   : > { %v5105_v55 = vpop.f32.mrf.mxu1 }
 0x431   : > { %4255 = vmatmul.mubr.msk.f32.vlgmr.msra.gmra.mxu0 %vm6447_vm0, %v2634_v5  ;;  %v4194_v53 = vpop.f32.mrf.mxu1 }
 0x432   : > { %4273 = vmatprep.mubr.msk.bf16.mxu0 %vm6448_vm1, %v6443_v23  ;;  %v1131_v46 = vpop.xlane.xlu1 %1130 }
 0x433   : > { %v1940_v34 = vpop.f32.mrf.mxu1 }
 0x435   : > { %v4197_v20 = vpop.f32.mrf.mxu1 }
 0x436   : > { %v1129_v60 = vpop.xlane.xlu1 %1128 }
 0x437   : > { %v1950_v50 = vpop.f32.mrf.mxu1 }
 0x439   : > { %v4200_v51 = vpop.f32.mrf.mxu1 }
 0x43a   : > { %v1135_v38 = vpop.xlane.xlu1 %1134 }
 0x43b   : > { %v1960_v36 = vpop.f32.mrf.mxu1 }
 0x43e   : > { %v1133_v5 = vpop.xlane.xlu1 %1132 }
 0x43f   : > { %v5113_v7 = vpop.xlane.xlu0 %1136 }
 0x443   : > { %v5115_v52 = vpop.xlane.xlu0 %1140 }
 0x447   : > { %v5117_v1 = vpop.xlane.xlu0 %1144 }
 0x4d1   : > { %v5083_v25 = vpop.f32.mrf.mxu0 }
 0x4d3   : > { %v5087_v27 = vpop.f32.mrf.mxu0 }
 0x4d5   : > { %v5091_v29 = vpop.f32.mrf.mxu0 }
 0x4d7   : > { %v5093_v30 = vpop.f32.mrf.mxu0 }
 0x4d9   : > { %v5097_v32 = vpop.f32.mrf.mxu0 }
 0x4db   : > { %v5101_v2 = vpop.f32.mrf.mxu0 }
 0x4dd   : > { %v5103_v58 = vpop.f32.mrf.mxu0 }
 0x4df   : > { %v5107_v12 = vpop.f32.mrf.mxu0 }
 0x4e1   : > { %v5109_v13 = vpop.f32.mrf.mxu0 }
 0x4e3   : > { %v2595_v59 = vpop.f32.mrf.mxu0 }
 0x4e5   : > { %v4245_v0 = vpop.f32.mrf.mxu0 }
 0x4e7   : > { %v2605_v22 = vpop.f32.mrf.mxu0 }
 0x4e9   : > { %v4248_v39 = vpop.f32.mrf.mxu0 }
 0x4eb   : > { %v2615_v45 = vpop.f32.mrf.mxu0 }
 0x4ed   : > { %v4251_v15 = vpop.f32.mrf.mxu0 }
 0x4ee   : > { %2784 = vperm.xlu1 %4350, %v4251_v15   ;;  %v1127_v15 = vpop.xlane.xlu0 %1126 }
 0x4ef   : > { %v2625_v35 = vpop.f32.mrf.mxu0 }
 0x4f0   : > { %2779 = vperm.xlu0 %4349, %v2625_v35  }
 0x4f1   : > { %v5111_v6 = vpop.f32.mrf.mxu0 }
 0x4f2   : > { %2114 = vperm.xlu1 %4350, %v1960_v36  }
 0x4f3   : > { %v4256_v54 = vpop.f32.mrf.mxu0 }
 0x4f4   : > { %2119 = vperm.xlu0 %4349, %v4200_v51   ;;  %v1139_v51 = vpop.xlane.xlu1 %1138 }
 0x4f6   : > { %2774 = vperm.xlu1 %4350, %v4248_v39   ;;  %v1121_v39 = vpop.xlane.xlu0 %1120 }
 0x4f8   : > { %2769 = vperm.xlu0 %4349, %v2615_v45   ;;  %v1143_v35 = vpop.xlane.xlu1 %1142 }
 0x4fa   : > { %2104 = vperm.xlu1 %4350, %v1950_v50   ;;  %v1123_v36 = vpop.xlane.xlu0 %1122 }
 0x4fb   : > { %v1167_v14 = vand.u32 127, %v1123_v36 }
 0x4fc   : > { %2109 = vperm.xlu0 %4349, %v4197_v20   ;;  %v1147_v45 = vpop.xlane.xlu1 %1146 }
 0x4fd   : > { %vm1183_vm11 = vcmp.eq.s32.totalorder %v4688_v18, %v1167_v14 }
 0x4fe   : > { %2764 = vperm.xlu1 %4350, %v4245_v0   ;;  %v1119_v54 = vpop.xlane.xlu0 %1118  ;;  %v1166_v0 = vand.u32 127, %v1121_v39  ;;  %v5132_v39 = vsel %vm1183_vm11, 3e+38, %v5019_v19 }
 0x4ff   : > { %v1165_v20 = vand.u32 127, %v1119_v54 }
 0x500   : > { %2759 = vperm.xlu0 %4349, %v2605_v22   ;;  %v1117_v50 = vpop.xlane.xlu1 %1116  ;;  %v1168_v22 = vand.u32 127, %v1125_v57  ;;  %vm1182_vm12 = vcmp.eq.s32.totalorder %v4688_v18, %v1166_v0  ;;  %v1173_v57 = vand.u32 127, %v1135_v38  ;;  %v1174_v38 = vand.u32 127, %v5113_v7 }
 0x501   : > { %v1164_v23 = vand.u32 127, %v1117_v50  ;;  %vm1181_vm9 = vcmp.eq.s32.totalorder %v4688_v18, %v1165_v20 }
 0x502   : > { %2094 = vperm.xlu1 %4350, %v1940_v34   ;;  %vm1184_vm14 = vcmp.eq.s32.totalorder %v4688_v18, %v1168_v22  ;;  %vm1189_vm4 = vcmp.eq.s32.totalorder %v4688_v18, %v1173_v57  ;;  %vm1190_vm7 = vcmp.eq.s32.totalorder %v4688_v18, %v1174_v38 }
 0x503   : > { %vm1180_vm10 = vcmp.eq.s32.totalorder %v4688_v18, %v1164_v23  ;;  %v1171_v23 = vand.u32 127, %v1131_v46  ;;  %v5146_v19 = vsel %vm1184_vm14, 3e+38, %v4953_v63  ;;  %v1172_v46 = vand.u32 127, %v1133_v5 }
 0x504   : > { %2099 = vperm.xlu0 %4349, %v4194_v53   ;;  %v5122_v53 = vsel %vm1181_vm9, 3e+38, %v5024_v24  ;;  %v5126_v34 = vsel %vm1180_vm10, 3e+38, %v5029_v9  ;;  %v5136_v24 = vsel %vm1182_vm12, 3e+38, %v5013_v44 }
 0x505   : > { %v1170_v9 = vand.u32 127, %v1129_v60  ;;  %vm1187_vm15 = vcmp.eq.s32.totalorder %v4688_v18, %v1171_v23  ;;  %v5161_v63 = vsel %vm1189_vm4, 3e+38, %v4968_v43  ;;  %v1175_v60 = vand.u32 127, %v1139_v51 }
 0x506   : > { %v5151_v44 = vsel %vm1187_vm15, 3e+38, %v4958_v17  ;;  %vm1188_vm5 = vcmp.eq.s32.totalorder %v4688_v18, %v1172_v46  ;;  %v1177_v5 = vand.u32 127, %v1143_v35  ;;  %v5177_v43 = vsel %vm1190_vm7, 3e+38, %v4978_v37 }
 0x507   : > { %vm1186_vm3 = vcmp.eq.s32.totalorder %v4688_v18, %v1170_v9  ;;  %v5166_v17 = vsel %vm1188_vm5, 3e+38, %v4974_v4  ;;  %vm1191_vm6 = vcmp.eq.s32.totalorder %v4688_v18, %v1175_v60  ;;  %v1176_v4 = vand.u32 127, %v5115_v52 }
 0x508   : > { %2749 = vperm.xlu0 %4349, %v2595_v59   ;;  %v1169_v59 = vand.u32 127, %v1127_v15  ;;  %vm1193_vm8 = vcmp.eq.s32.totalorder %v4688_v18, %v1177_v5  ;;  %v1179_v15 = vand.u32 127, %v1147_v45  ;;  %v1178_v37 = vand.u32 127, %v5117_v1 }
 0x509   : > { %v5183_v7 = vsel %vm1193_vm8, 3e+38, %v4994_v48  ;;  %vm1192_vm9 = vcmp.eq.s32.totalorder %v4688_v18, %v1176_v4 }
 0x50a   : > { %vm1185_vm13 = vcmp.eq.s32.totalorder %v4688_v18, %v1169_v59  ;;  %vm1195_vm10 = vcmp.eq.s32.totalorder %v4688_v18, %v1179_v15  ;;  %vm1194_vm11 = vcmp.eq.s32.totalorder %v4688_v18, %v1178_v37 }
 0x50b   : > { %v5142_v14 = vsel %vm1185_vm13, 3e+38, %v5008_v61  ;;  %v5156_v61 = vsel %vm1186_vm3, 3e+38, %v4963_v8  ;;  %v5172_v8 = vsel %vm1191_vm6, 3e+38, %v4984_v56 }
 0x50c   : > { %v5188_v56 = vsel %vm1192_vm9, 3e+38, %v4988_v49  ;;  %v5194_v52 = vsel %vm1195_vm10, 3e+38, %v5004_v62  ;;  %v5199_v48 = vsel %vm1194_vm11, 3e+38, %v4998_v40 }
 0x526   : > { %1214 = vmin.xlane.f32.xlu1 %v5122_v53 }
 0x527   : > { %1212 = vmin.xlane.f32.xlu0 %v5126_v34 }
 0x52a   : > { %1218 = vmin.xlane.f32.xlu1 %v5132_v39 }
 0x52b   : > { %1216 = vmin.xlane.f32.xlu0 %v5136_v24 }
 0x52e   : > { %1222 = vmin.xlane.f32.xlu1 %v5142_v14 }
 0x52f   : > { %1220 = vmin.xlane.f32.xlu0 %v5146_v19 }
 0x532   : > { %1226 = vmin.xlane.f32.xlu1 %v5151_v44 }
 0x536   : > { %1224 = vmin.xlane.f32.xlu1 %v5156_v61 }
 0x53a   : > { %1230 = vmin.xlane.f32.xlu1 %v5161_v63 }
 0x53e   : > { %1228 = vmin.xlane.f32.xlu1 %v5166_v17 }
 0x542   : > { %1234 = vmin.xlane.f32.xlu1 %v5172_v8 }
 0x546   : > { %1232 = vmin.xlane.f32.xlu1 %v5177_v43 }
 0x54a   : > { %1238 = vmin.xlane.f32.xlu1 %v5183_v7 }
 0x54e   : > { %1236 = vmin.xlane.f32.xlu1 %v5188_v56 }
 0x552   : > { %1242 = vmin.xlane.f32.xlu1 %v5194_v52 }
 0x556   : > { %1240 = vmin.xlane.f32.xlu1 %v5199_v48 }
 0x567   : > { %2754 = vperm.xlu1 %4350, %v5109_v13  }
 0x569   : > { %v5205_v1 = vpop.permute.xlu1 %2784 }
 0x56b   : > { %v5203_v49 = vpop.permute.xlu0 %2779 }
 0x56d   : > { %v5209_v35 = vpop.permute.xlu1 %2114 }
 0x56f   : > { %v5207_v51 = vpop.permute.xlu0 %2119 }
 0x571   : > { %v5213_v36 = vpop.permute.xlu1 %2774 }
 0x573   : > { %v5211_v62 = vpop.permute.xlu0 %2769 }
 0x575   : > { %v5217_v40 = vpop.permute.xlu1 %2104 }
 0x577   : > { %v5215_v45 = vpop.permute.xlu0 %2109 }
 0x579   : > { %v5221_v50 = vpop.permute.xlu1 %2764 }
 0x57b   : > { %v5219_v54 = vpop.permute.xlu0 %2759 }
 0x57d   : > { %v5225_v20 = vpop.permute.xlu1 %2094 }
 0x57f   : > { %v5223_v13 = vpop.permute.xlu0 %2099 }
 0x583   : > { %v5227_v0 = vpop.permute.xlu0 %2749 }
 0x5af   : > { %v1215_v59 = vpop.xlane.xlu1 %1214 }
 0x5b0   : > { %v1261_v22 = vand.u32 127, %v1215_v59  ;;  %v1213_v23 = vpop.xlane.xlu0 %1212 }
 0x5b1   : > { %v1260_v9 = vand.u32 127, %v1213_v23 }
 0x5b2   : > { %vm1277_vm12 = vcmp.eq.s32.totalorder %v4688_v18, %v1261_v22 }
 0x5b3   : > { %v1219_v57 = vpop.xlane.xlu1 %1218  ;;  %v5231_v46 = vsel %vm1277_vm12, 3e+38, %v5122_v53  ;;  %vm1276_vm13 = vcmp.eq.s32.totalorder %v4688_v18, %v1260_v9 }
 0x5b4   : > { %v1263_v60 = vand.u32 127, %v1219_v57  ;;  %1310 = vmin.xlane.f32.xlu1 %v5231_v46  ;;  %v1217_v38 = vpop.xlane.xlu0 %1216  ;;  %v5236_v5 = vsel %vm1276_vm13, 3e+38, %v5126_v34 }
 0x5b5   : > { %v1262_v4 = vand.u32 127, %v1217_v38  ;;  %1308 = vmin.xlane.f32.xlu0 %v5236_v5 }
 0x5b6   : > { %vm1279_vm14 = vcmp.eq.s32.totalorder %v4688_v18, %v1263_v60 }
 0x5b7   : > { %v1223_v15 = vpop.xlane.xlu1 %1222  ;;  %v5241_v37 = vsel %vm1279_vm14, 3e+38, %v5132_v39  ;;  %vm1278_vm15 = vcmp.eq.s32.totalorder %v4688_v18, %v1262_v4 }
 0x5b8   : > { %v1265_v53 = vand.u32 127, %v1223_v15  ;;  %1314 = vmin.xlane.f32.xlu1 %v5241_v37  ;;  %v1221_v59 = vpop.xlane.xlu0 %1220  ;;  %v5246_v22 = vsel %vm1278_vm15, 3e+38, %v5136_v24 }
 0x5b9   : > { %v1264_v34 = vand.u32 127, %v1221_v59  ;;  %1312 = vmin.xlane.f32.xlu0 %v5246_v22 }
 0x5ba   : > { %vm1281_vm3 = vcmp.eq.s32.totalorder %v4688_v18, %v1265_v53 }
 0x5bb   : > { %v1227_v23 = vpop.xlane.xlu1 %1226  ;;  %v5251_v9 = vsel %vm1281_vm3, 3e+38, %v5142_v14  ;;  %vm1280_vm4 = vcmp.eq.s32.totalorder %v4688_v18, %v1264_v34 }
 0x5bc   : > { %v1267_v39 = vand.u32 127, %v1227_v23  ;;  %1318 = vmin.xlane.f32.xlu1 %v5251_v9  ;;  %v5256_v57 = vsel %vm1280_vm4, 3e+38, %v5146_v19 }
 0x5bd   : > { %1316 = vmin.xlane.f32.xlu0 %v5256_v57 }
 0x5be   : > { %vm1283_vm5 = vcmp.eq.s32.totalorder %v4688_v18, %v1267_v39 }
 0x5bf   : > { %v1225_v24 = vpop.xlane.xlu1 %1224  ;;  %v5261_v60 = vsel %vm1283_vm5, 3e+38, %v5151_v44 }
 0x5c0   : > { %v1266_v38 = vand.u32 127, %v1225_v24  ;;  %1322 = vmin.xlane.f32.xlu1 %v5261_v60 }
 0x5c2   : > { %vm1282_vm6 = vcmp.eq.s32.totalorder %v4688_v18, %v1266_v38 }
 0x5c3   : > { %v1231_v14 = vpop.xlane.xlu1 %1230  ;;  %v5266_v4 = vsel %vm1282_vm6, 3e+38, %v5156_v61 }
 0x5c4   : > { %v1269_v15 = vand.u32 127, %v1231_v14  ;;  %1320 = vmin.xlane.f32.xlu0 %v5266_v4 }
 0x5c6   : > { %vm1285_vm7 = vcmp.eq.s32.totalorder %v4688_v18, %v1269_v15 }
 0x5c7   : > { %v1229_v19 = vpop.xlane.xlu1 %1228  ;;  %v5271_v53 = vsel %vm1285_vm7, 3e+38, %v5161_v63 }
 0x5c8   : > { %v1268_v44 = vand.u32 127, %v1229_v19  ;;  %1326 = vmin.xlane.f32.xlu1 %v5271_v53 }
 0x5ca   : > { %vm1284_vm8 = vcmp.eq.s32.totalorder %v4688_v18, %v1268_v44 }
 0x5cb   : > { %v1235_v59 = vpop.xlane.xlu1 %1234  ;;  %v5276_v34 = vsel %vm1284_vm8, 3e+38, %v5166_v17 }
 0x5cc   : > { %v1271_v61 = vand.u32 127, %v1235_v59  ;;  %1324 = vmin.xlane.f32.xlu0 %v5276_v34 }
 0x5ce   : > { %vm1287_vm9 = vcmp.eq.s32.totalorder %v4688_v18, %v1271_v61 }
 0x5cf   : > { %v1233_v23 = vpop.xlane.xlu1 %1232  ;;  %v5281_v39 = vsel %vm1287_vm9, 3e+38, %v5172_v8 }
 0x5d0   : > { %v1270_v63 = vand.u32 127, %v1233_v23  ;;  %1330 = vmin.xlane.f32.xlu1 %v5281_v39 }
 0x5d2   : > { %vm1286_vm10 = vcmp.eq.s32.totalorder %v4688_v18, %v1270_v63 }
 0x5d3   : > { %v1239_v24 = vpop.xlane.xlu1 %1238  ;;  %v5286_v38 = vsel %vm1286_vm10, 3e+38, %v5177_v43 }
 0x5d4   : > { %v1273_v17 = vand.u32 127, %v1239_v24  ;;  %1328 = vmin.xlane.f32.xlu0 %v5286_v38 }
 0x5d6   : > { %vm1289_vm11 = vcmp.eq.s32.totalorder %v4688_v18, %v1273_v17 }
 0x5d7   : > { %v1237_v14 = vpop.xlane.xlu1 %1236  ;;  %v5291_v15 = vsel %vm1289_vm11, 3e+38, %v5183_v7 }
 0x5d8   : > { %v1272_v8 = vand.u32 127, %v1237_v14  ;;  %1334 = vmin.xlane.f32.xlu1 %v5291_v15 }
 0x5da   : > { %vm1288_vm12 = vcmp.eq.s32.totalorder %v4688_v18, %v1272_v8 }
 0x5db   : > { %v1243_v19 = vpop.xlane.xlu1 %1242  ;;  %v5296_v44 = vsel %vm1288_vm12, 3e+38, %v5188_v56 }
 0x5dc   : > { %v1275_v43 = vand.u32 127, %v1243_v19  ;;  %1332 = vmin.xlane.f32.xlu0 %v5296_v44 }
 0x5de   : > { %vm1291_vm13 = vcmp.eq.s32.totalorder %v4688_v18, %v1275_v43 }
 0x5df   : > { %v1241_v59 = vpop.xlane.xlu1 %1240  ;;  %v5301_v61 = vsel %vm1291_vm13, 3e+38, %v5194_v52 }
 0x5e0   : > { %v1274_v7 = vand.u32 127, %v1241_v59  ;;  %1338 = vmin.xlane.f32.xlu1 %v5301_v61 }
 0x5e2   : > { %vm1290_vm14 = vcmp.eq.s32.totalorder %v4688_v18, %v1274_v7 }
 0x5e3   : > { %v5306_v23 = vsel %vm1290_vm14, 3e+38, %v5199_v48  ;;  %v5311_v56 = vpop.permute.xlu1 %2754 }
 0x5e4   : > { %1336 = vmin.xlane.f32.xlu0 %v5306_v23 }
 0x5f1   : > { %2084 = vperm.xlu1 %4350, %v5105_v55  }
 0x5fa   : > { %2089 = vperm.xlu0 %4349, %v5099_v33  }
 0x63d   : > { %v1311_v63 = vpop.xlane.xlu1 %1310 }
 0x63e   : > { %v1357_v24 = vand.u32 127, %v1311_v63  ;;  %v1309_v52 = vpop.xlane.xlu0 %1308 }
 0x63f   : > { %v1356_v17 = vand.u32 127, %v1309_v52 }
 0x640   : > { %vm1373_vm15 = vcmp.eq.s32.totalorder %v4688_v18, %v1357_v24 }
 0x641   : > { %v1315_v14 = vpop.xlane.xlu1 %1314  ;;  %v5315_v8 = vsel %vm1373_vm15, 3e+38, %v5231_v46  ;;  %vm1372_vm3 = vcmp.eq.s32.totalorder %v4688_v18, %v1356_v17 }
 0x642   : > { %v1359_v48 = vand.u32 127, %v1315_v14  ;;  %1406 = vmin.xlane.f32.xlu1 %v5315_v8  ;;  %v1313_v55 = vpop.xlane.xlu0 %1312  ;;  %v5320_v33 = vsel %vm1372_vm3, 3e+38, %v5236_v5 }
 0x643   : > { %v1358_v19 = vand.u32 127, %v1313_v55  ;;  %1404 = vmin.xlane.f32.xlu0 %v5320_v33 }
 0x644   : > { %vm1375_vm4 = vcmp.eq.s32.totalorder %v4688_v18, %v1359_v48 }
 0x645   : > { %v1319_v43 = vpop.xlane.xlu1 %1318  ;;  %v5325_v59 = vsel %vm1375_vm4, 3e+38, %v5241_v37  ;;  %vm1374_vm5 = vcmp.eq.s32.totalorder %v4688_v18, %v1358_v19 }
 0x646   : > { %v1361_v46 = vand.u32 127, %v1319_v43  ;;  %1410 = vmin.xlane.f32.xlu1 %v5325_v59  ;;  %v1317_v7 = vpop.xlane.xlu0 %1316  ;;  %v5330_v63 = vsel %vm1374_vm5, 3e+38, %v5246_v22 }
 0x647   : > { %v1360_v5 = vand.u32 127, %v1317_v7  ;;  %1408 = vmin.xlane.f32.xlu0 %v5330_v63 }
 0x648   : > { %vm1377_vm6 = vcmp.eq.s32.totalorder %v4688_v18, %v1361_v46 }
 0x649   : > { %v1323_v24 = vpop.xlane.xlu1 %1322  ;;  %v5335_v52 = vsel %vm1377_vm6, 3e+38, %v5251_v9  ;;  %vm1376_vm7 = vcmp.eq.s32.totalorder %v4688_v18, %v1360_v5 }
 0x64a   : > { %v1363_v37 = vand.u32 127, %v1323_v24  ;;  %1414 = vmin.xlane.f32.xlu1 %v5335_v52  ;;  %v5340_v17 = vsel %vm1376_vm7, 3e+38, %v5256_v57 }
 0x64b   : > { %1412 = vmin.xlane.f32.xlu0 %v5340_v17 }
 0x64c   : > { %vm1379_vm8 = vcmp.eq.s32.totalorder %v4688_v18, %v1363_v37 }
 0x64d   : > { %v1321_v22 = vpop.xlane.xlu0 %1320  ;;  %v5345_v14 = vsel %vm1379_vm8, 3e+38, %v5261_v60 }
 0x64e   : > { %v1362_v48 = vand.u32 127, %v1321_v22  ;;  %1418 = vmin.xlane.f32.xlu1 %v5345_v14 }
 0x650   : > { %vm1378_vm9 = vcmp.eq.s32.totalorder %v4688_v18, %v1362_v48 }
 0x651   : > { %v1327_v9 = vpop.xlane.xlu1 %1326  ;;  %v5350_v55 = vsel %vm1378_vm9, 3e+38, %v5266_v4 }
 0x652   : > { %v1365_v19 = vand.u32 127, %v1327_v9  ;;  %1416 = vmin.xlane.f32.xlu0 %v5350_v55 }
 0x654   : > { %vm1381_vm10 = vcmp.eq.s32.totalorder %v4688_v18, %v1365_v19 }
 0x655   : > { %v1325_v57 = vpop.xlane.xlu0 %1324  ;;  %v5355_v43 = vsel %vm1381_vm10, 3e+38, %v5271_v53 }
 0x656   : > { %v1364_v60 = vand.u32 127, %v1325_v57  ;;  %1422 = vmin.xlane.f32.xlu1 %v5355_v43 }
 0x658   : > { %vm1380_vm11 = vcmp.eq.s32.totalorder %v4688_v18, %v1364_v60 }
 0x659   : > { %v1331_v46 = vpop.xlane.xlu1 %1330  ;;  %v5360_v7 = vsel %vm1380_vm11, 3e+38, %v5276_v34 }
 0x65a   : > { %v1367_v4 = vand.u32 127, %v1331_v46  ;;  %1420 = vmin.xlane.f32.xlu0 %v5360_v7 }
 0x65c   : > { %vm1383_vm12 = vcmp.eq.s32.totalorder %v4688_v18, %v1367_v4 }
 0x65d   : > { %v1329_v5 = vpop.xlane.xlu0 %1328  ;;  %v5365_v24 = vsel %vm1383_vm12, 3e+38, %v5281_v39 }
 0x65e   : > { %v1366_v53 = vand.u32 127, %v1329_v5  ;;  %1426 = vmin.xlane.f32.xlu1 %v5365_v24 }
 0x660   : > { %vm1382_vm13 = vcmp.eq.s32.totalorder %v4688_v18, %v1366_v53 }
 0x661   : > { %v1335_v37 = vpop.xlane.xlu1 %1334  ;;  %v5370_v22 = vsel %vm1382_vm13, 3e+38, %v5286_v38 }
 0x662   : > { %v1369_v34 = vand.u32 127, %v1335_v37  ;;  %1424 = vmin.xlane.f32.xlu0 %v5370_v22 }
 0x664   : > { %vm1385_vm14 = vcmp.eq.s32.totalorder %v4688_v18, %v1369_v34 }
 0x665   : > { %v1333_v48 = vpop.xlane.xlu0 %1332  ;;  %v5375_v9 = vsel %vm1385_vm14, 3e+38, %v5291_v15 }
 0x666   : > { %v1368_v39 = vand.u32 127, %v1333_v48  ;;  %1430 = vmin.xlane.f32.xlu1 %v5375_v9 }
 0x668   : > { %vm1384_vm15 = vcmp.eq.s32.totalorder %v4688_v18, %v1368_v39 }
 0x669   : > { %v1339_v19 = vpop.xlane.xlu1 %1338  ;;  %v5380_v57 = vsel %vm1384_vm15, 3e+38, %v5296_v44 }
 0x66a   : > { %v1371_v38 = vand.u32 127, %v1339_v19  ;;  %1428 = vmin.xlane.f32.xlu0 %v5380_v57 }
 0x66c   : > { %vm1387_vm3 = vcmp.eq.s32.totalorder %v4688_v18, %v1371_v38 }
 0x66d   : > { %v1337_v60 = vpop.xlane.xlu0 %1336  ;;  %v5385_v46 = vsel %vm1387_vm3, 3e+38, %v5301_v61  ;;  %v5395_v44 = vpop.permute.xlu1 %2084 }
 0x66e   : > { %v1370_v15 = vand.u32 127, %v1337_v60  ;;  %1434 = vmin.xlane.f32.xlu1 %v5385_v46 }
 0x670   : > { %vm1386_vm4 = vcmp.eq.s32.totalorder %v4688_v18, %v1370_v15 }
 0x671   : > { %v5390_v4 = vsel %vm1386_vm4, 3e+38, %v5306_v23 }
 0x672   : > { %1432 = vmin.xlane.f32.xlu0 %v5390_v4 }
 0x675   : > { %v5397_v5 = vpop.permute.xlu0 %2089 }
 0x67f   : > { %2744 = vperm.xlu1 %4350, %v5103_v58  }
 0x688   : > { %2739 = vperm.xlu0 %4349, %v5107_v12  }
 0x6cb   : > { %v5399_v61 = vpop.xlane.xlu1 %1406 }
 0x6cc   : > { %v1405_v53 = vpop.xlane.xlu0 %1404 }
 0x6cd   : > { %v1452_v37 = vand.u32 127, %v1405_v53 }
 0x6cf   : > { %v1411_v34 = vpop.xlane.xlu1 %1410  ;;  %vm1468_vm5 = vcmp.eq.s32.totalorder %v4688_v18, %v1452_v37 }
 0x6d0   : > { %v1455_v48 = vand.u32 127, %v1411_v34  ;;  %v1409_v23 = vpop.xlane.xlu0 %1408  ;;  %v5403_v39 = vsel %vm1468_vm5, 3e+38, %v5320_v33 }
 0x6d1   : > { %v1454_v19 = vand.u32 127, %v1409_v23  ;;  %1500 = vmin.xlane.f32.xlu1 %v5403_v39 }
 0x6d2   : > { %vm1471_vm6 = vcmp.eq.s32.totalorder %v4688_v18, %v1455_v48 }
 0x6d3   : > { %v1415_v58 = vpop.xlane.xlu1 %1414  ;;  %v5408_v12 = vsel %vm1471_vm6, 3e+38, %v5325_v59  ;;  %vm1470_vm7 = vcmp.eq.s32.totalorder %v4688_v18, %v1454_v19 }
 0x6d4   : > { %v1457_v38 = vand.u32 127, %v1415_v58  ;;  %1506 = vmin.xlane.f32.xlu0 %v5408_v12  ;;  %v1413_v60 = vpop.xlane.xlu0 %1412  ;;  %v5413_v15 = vsel %vm1470_vm7, 3e+38, %v5330_v63 }
 0x6d5   : > { %v1456_v33 = vand.u32 127, %v1413_v60  ;;  %1504 = vmin.xlane.f32.xlu1 %v5413_v15 }
 0x6d6   : > { %vm1473_vm8 = vcmp.eq.s32.totalorder %v4688_v18, %v1457_v38 }
 0x6d7   : > { %v1419_v53 = vpop.xlane.xlu1 %1418  ;;  %v5418_v37 = vsel %vm1473_vm8, 3e+38, %v5335_v52  ;;  %vm1472_vm9 = vcmp.eq.s32.totalorder %v4688_v18, %v1456_v33 }
 0x6d8   : > { %v1459_v59 = vand.u32 127, %v1419_v53  ;;  %1510 = vmin.xlane.f32.xlu0 %v5418_v37  ;;  %v5423_v34 = vsel %vm1472_vm9, 3e+38, %v5340_v17 }
 0x6d9   : > { %1508 = vmin.xlane.f32.xlu1 %v5423_v34 }
 0x6da   : > { %vm1475_vm10 = vcmp.eq.s32.totalorder %v4688_v18, %v1459_v59 }
 0x6db   : > { %v1417_v63 = vpop.xlane.xlu0 %1416  ;;  %v5428_v48 = vsel %vm1475_vm10, 3e+38, %v5345_v14 }
 0x6dc   : > { %v1458_v23 = vand.u32 127, %v1417_v63  ;;  %1514 = vmin.xlane.f32.xlu0 %v5428_v48 }
 0x6de   : > { %vm1474_vm11 = vcmp.eq.s32.totalorder %v4688_v18, %v1458_v23 }
 0x6df   : > { %v1423_v52 = vpop.xlane.xlu1 %1422  ;;  %v5433_v19 = vsel %vm1474_vm11, 3e+38, %v5350_v55 }
 0x6e0   : > { %v1461_v58 = vand.u32 127, %v1423_v52  ;;  %1512 = vmin.xlane.f32.xlu1 %v5433_v19 }
 0x6e2   : > { %vm1477_vm12 = vcmp.eq.s32.totalorder %v4688_v18, %v1461_v58 }
 0x6e3   : > { %v1421_v17 = vpop.xlane.xlu0 %1420  ;;  %v5438_v38 = vsel %vm1477_vm12, 3e+38, %v5355_v43 }
 0x6e4   : > { %v1460_v14 = vand.u32 127, %v1421_v17  ;;  %1518 = vmin.xlane.f32.xlu0 %v5438_v38 }
 0x6e6   : > { %vm1476_vm13 = vcmp.eq.s32.totalorder %v4688_v18, %v1460_v14 }
 0x6e7   : > { %v1427_v60 = vpop.xlane.xlu1 %1426  ;;  %v5443_v33 = vsel %vm1476_vm13, 3e+38, %v5360_v7 }
 0x6e8   : > { %v1463_v55 = vand.u32 127, %v1427_v60  ;;  %1516 = vmin.xlane.f32.xlu1 %v5443_v33 }
 0x6ea   : > { %vm1479_vm14 = vcmp.eq.s32.totalorder %v4688_v18, %v1463_v55 }
 0x6eb   : > { %v1425_v53 = vpop.xlane.xlu0 %1424  ;;  %v5448_v59 = vsel %vm1479_vm14, 3e+38, %v5365_v24  ;;  %v1453_v24 = vand.u32 127, %v5399_v61 }
 0x6ec   : > { %v1462_v43 = vand.u32 127, %v1425_v53  ;;  %1522 = vmin.xlane.f32.xlu0 %v5448_v59 }
 0x6ed   : > { %vm1469_vm5 = vcmp.eq.s32.totalorder %v4688_v18, %v1453_v24 }
 0x6ee   : > { %vm1478_vm15 = vcmp.eq.s32.totalorder %v4688_v18, %v1462_v43  ;;  %v5471_v61 = vsel %vm1469_vm5, 3e+38, %v5315_v8 }
 0x6ef   : > { %v1431_v63 = vpop.xlane.xlu1 %1430  ;;  %v5453_v23 = vsel %vm1478_vm15, 3e+38, %v5370_v22 }
 0x6f0   : > { %v1465_v7 = vand.u32 127, %v1431_v63  ;;  %1520 = vmin.xlane.f32.xlu1 %v5453_v23 }
 0x6f2   : > { %vm1481_vm3 = vcmp.eq.s32.totalorder %v4688_v18, %v1465_v7 }
 0x6f3   : > { %v1429_v52 = vpop.xlane.xlu0 %1428  ;;  %v5458_v58 = vsel %vm1481_vm3, 3e+38, %v5375_v9 }
 0x6f4   : > { %v1464_v17 = vand.u32 127, %v1429_v52  ;;  %1526 = vmin.xlane.f32.xlu1 %v5458_v58 }
 0x6f6   : > { %vm1480_vm4 = vcmp.eq.s32.totalorder %v4688_v18, %v1464_v17 }
 0x6f7   : > { %v1435_v14 = vpop.xlane.xlu1 %1434  ;;  %v5464_v22 = vsel %vm1480_vm4, 3e+38, %v5380_v57 }
 0x6f8   : > { %v1467_v60 = vand.u32 127, %v1435_v14  ;;  %1524 = vmin.xlane.f32.xlu0 %v5464_v22 }
 0x6fa   : > { %vm1483_vm6 = vcmp.eq.s32.totalorder %v4688_v18, %v1467_v60 }
 0x6fb   : > { %v1433_v9 = vpop.xlane.xlu0 %1432  ;;  %v1499_v55 = vsel %vm1483_vm6, 3e+38, %v5385_v46 }
 0x6fc   : > { %v1466_v53 = vand.u32 127, %v1433_v9  ;;  %1530 = vmin.xlane.f32.xlu1 %v1499_v55  ;;  %1502 = vmin.xlane.f32.xlu0 %v5471_v61 }
 0x6fe   : > { %vm1482_vm7 = vcmp.eq.s32.totalorder %v4688_v18, %v1466_v53 }
 0x6ff   : > { %v5476_v57 = vsel %vm1482_vm7, 3e+38, %v5390_v4 }
 0x700   : > { %1528 = vmin.xlane.f32.xlu0 %v5476_v57 }
 0x70d   : > { %2074 = vperm.xlu1 %4350, %v5095_v31  }
 0x711   : > { %2734 = vperm.xlu1 %4350, %v5097_v32  }
 0x715   : > { %2064 = vperm.xlu1 %4350, %v5085_v26   ;;  %v5493_v26 = vpop.permute.xlu1 %2744 }
 0x716   : > { %2079 = vperm.xlu0 %4349, %v5089_v28  }
 0x719   : > { %2724 = vperm.xlu1 %4350, %v5091_v29   ;;  %v5497_v29 = vpop.permute.xlu0 %2739 }
 0x71a   : > { %2729 = vperm.xlu0 %4349, %v5101_v2  }
 0x71d   : > { %2054 = vperm.xlu1 %4350, %v5079_v21  }
 0x71e   : > { %2069 = vperm.xlu0 %4349, %v5081_v47  }
 0x721   : > { %2709 = vperm.xlu1 %4350, %v5087_v27  }
 0x722   : > { %2719 = vperm.xlu0 %4349, %v5093_v30  }
 0x725   : > { %2044 = vperm.xlu1 %4350, %v5075_v10  }
 0x726   : > { %2059 = vperm.xlu0 %4349, %v5077_v16  }
 0x72a   : > { %2714 = vperm.xlu0 %4349, %v5083_v25  }
 0x72e   : > { %2049 = vperm.xlu0 %4349, %v5073_v3   ;;  %v6460_v3 = vlaneseq }
 0x730   : > { %v2123_v31 = vshrl.u32 %v6460_v3, 7 }
 0x732   : > { %v5516_v8 = vsub.s32 0, %v2123_v31 }
 0x734   : > { %6461 = vst [vmem:[#allocation2_spill] sm:$0xff] %v5516_v8  ;;  %v5522_v4 = vrot.slane %v5111_v6, %v5516_v8  ;;  %v5528_v24 = vrot.slane %v5045_v11, %v5516_v8 }
 0x736   : > { %v2806_v7 = vadd.f32 %v5522_v4, %v5205_v1  ;;  %v2805_v17 = vadd.f32 %v5522_v4, %v5203_v49  ;;  %v2140_v6 = vadd.f32 %v5528_v24, %v5209_v35  ;;  %v2141_v49 = vadd.f32 %v5528_v24, %v5207_v51 }
 0x738   : > { %v2838_v9 = vmul.f32 0.2, %v2806_v7  ;;  %vm2822_vm8 = vcmp.gt.f32.partialorder %v2806_v7, 0.0  ;;  %v2837_v11 = vmul.f32 0.2, %v2805_v17  ;;  %vm2821_vm12 = vcmp.gt.f32.partialorder %v2805_v17, 0.0 }
 0x739   : > { %v2172_v35 = vmul.f32 0.2, %v2140_v6  ;;  %vm2156_vm14 = vcmp.gt.f32.partialorder %v2140_v6, 0.0  ;;  %vm2157_vm5 = vcmp.gt.f32.partialorder %v2141_v49, 0.0 }
 0x73a   : > { %v2854_v8 = vsel %vm2822_vm8, %v2806_v7, %v2838_v9  ;;  %v2804_v7 = vadd.f32 %v5522_v4, %v5213_v36 }
 0x75a   : > { %v5495_v28 = vpop.xlane.xlu1 %1500 }
 0x75d   : > { %v5499_v21 = vpop.xlane.xlu0 %1506 }
 0x75e   : > { %v5501_v47 = vpop.xlane.xlu1 %1504 }
 0x761   : > { %v5503_v27 = vpop.xlane.xlu0 %1510 }
 0x762   : > { %v5505_v30 = vpop.xlane.xlu1 %1508 }
 0x765   : > { %v5509_v16 = vpop.xlane.xlu0 %1514 }
 0x769   : > { %v5507_v10 = vpop.xlane.xlu1 %1512 }
 0x76d   : > { %v5514_v32 = vpop.xlane.xlu0 %1518 }
 0x771   : > { %v5511_v25 = vpop.xlane.xlu1 %1516 }
 0x775   : > { %v5518_v46 = vpop.xlane.xlu0 %1522 }
 0x779   : > { %v1521_v2 = vpop.xlane.xlu1 %1520 }
 0x77a   : > { %v1558_v51 = vand.u32 127, %v1521_v2  ;;  %v2853_v2 = vsel %vm2821_vm12, %v2805_v17, %v2837_v11  ;;  %v1559_v17 = vand.u32 127, %v5518_v46  ;;  %vm2820_vm12 = vcmp.gt.f32.partialorder %v2804_v7, 0.0 }
 0x77d   : > { %v1527_v43 = vpop.xlane.xlu1 %1526 }
 0x77e   : > { %v1561_v3 = vand.u32 127, %v1527_v43  ;;  %v2803_v43 = vadd.f32 %v5522_v4, %v5211_v62 }
 0x780   : > { %vm5556_vm15 = vcmp.eq.s32.totalorder %v4688_v18, %v1561_v3  ;;  %v2138_v3 = vadd.f32 %v5528_v24, %v5217_v40  ;;  %v2835_v1 = vmul.f32 0.2, %v2803_v43  ;;  %vm2819_vm8 = vcmp.gt.f32.partialorder %v2803_v43, 0.0 }
 0x781   : > { %v1525_v63 = vpop.xlane.xlu0 %1524 }
 0x782   : > { %v1560_v52 = vand.u32 127, %v1525_v63 }
 0x784   : > { %vm5537_vm9 = vcmp.eq.s32.totalorder %v4688_v18, %v1560_v52 }
 0x785   : > { %v1531_v14 = vpop.xlane.xlu1 %1530  ;;  %v5532_v60 = vpop.xlane.xlu0 %1502  ;;  %v1592_v52 = vsel %vm5537_vm9, 3e+38, %v5464_v22  ;;  %v2173_v22 = vmul.f32 0.2, %v2141_v49  ;;  %vm5583_vm9 = vcmp.eq.s32.totalorder %v4688_v18, %v1558_v51  ;;  %v1556_v51 = vand.u32 127, %v5511_v25 }
 0x786   : > { %v1563_v53 = vand.u32 127, %v1531_v14  ;;  %vm1608_vm6 = vcmp.ge.f32.partialorder %v1592_v52, 1e+38  ;;  %v1590_v52 = vsel %vm5583_vm9, 3e+38, %v5453_v23  ;;  %v2802_v23 = vadd.f32 %v5522_v4, %v5221_v50 }
 0x787   : > { %v6476_v25 = vmov 0 }
 0x788   : > { %vm1579_vm10 = vcmp.eq.s32.totalorder %v4688_v18, %v1563_v53  ;;  %v2834_v40 = vmul.f32 0.2, %v2802_v23 }
 0x789   : > { %v1595_v31 = vsel %vm1579_vm10, 3e+38, %v1499_v55  ;;  %v1529_v63 = vpop.xlane.xlu0 %1528  ;;  %vm5599_vm10 = vmand %vm1608_vm6, %vm6451_vm2  ;;  %v5641_v50 = vpop.permute.xlu1 %2074  ;;  %v1554_v55 = vand.u32 127, %v5507_v10  ;;  %v2134_v10 = vadd.f32 %v5528_v24, %v5395_v44 }
 0x78a   : > { %vm1611_vm11 = vcmp.ge.f32.partialorder %v1595_v31, 1e+38  ;;  %v1562_v14 = vand.u32 127, %v1529_v63  ;;  %v2836_v31 = vmul.f32 0.2, %v2804_v7 }
 0x78b   : > { %vm5551_vm13 = vmand %vm1611_vm11, %vm6451_vm2  ;;  %v2170_v63 = vmul.f32 0.2, %v2138_v3  ;;  %vm2150_vm0 = vcmp.gt.f32.partialorder %v2134_v10, 0.0 }
 0x78c   : > { %vm1578_vm3 = vcmp.eq.s32.totalorder %v4688_v18, %v1562_v14  ;;  %v5563_v62 = vsel %vm5551_vm13, %v2854_v8, -9e+15  ;;  %v1593_v8 = vsel %vm5556_vm15, 3e+38, %v5458_v58  ;;  %v2139_v14 = vadd.f32 %v5528_v24, %v5215_v45 }
 0x78d   : > { %v1594_v9 = vsel %vm1578_vm3, 3e+38, %v5476_v57  ;;  %2901 = vmax.xlane.f32.xlu0 %v5563_v62  ;;  %v2188_v57 = vsel %vm2156_vm14, %v2140_v6, %v2172_v35  ;;  %v2189_v6 = vsel %vm2157_vm5, %v2141_v49, %v2173_v22  ;;  %vm1609_vm11 = vcmp.ge.f32.partialorder %v1593_v8, 1e+38 }
 0x78e   : > { %vm1610_vm4 = vcmp.ge.f32.partialorder %v1594_v9, 1e+38  ;;  %v2801_v35 = vadd.f32 %v5522_v4, %v5219_v54  ;;  %v2851_v49 = vsel %vm2819_vm8, %v2803_v43, %v2835_v1  ;;  %vm2154_vm14 = vcmp.gt.f32.partialorder %v2138_v3, 0.0  ;;  %vm5631_vm3 = vmand %vm1609_vm11, %vm6451_vm2 }
 0x78f   : > { %vm5576_vm7 = vmand %vm1610_vm4, %vm6451_vm2  ;;  %vm5613_vm15 = vcmp.eq.s32.totalorder %v4688_v18, %v1559_v17  ;;  %v5619_v45 = vsel %vm5551_vm13, %v2189_v6, -9e+15  ;;  %v5623_v54 = vsel %vm5599_vm10, %v2851_v49, -9e+15  ;;  %v6477_v25 = vsel %vm5631_vm3, 4294967295, %v6476_v25 }
 0x790   : > { %v5589_v11 = vsel %vm5576_vm7, %v2853_v2, -9e+15  ;;  %v5593_v58 = vsel %vm5576_vm7, %v2188_v57, -9e+15  ;;  %v2852_v43 = vsel %vm2820_vm12, %v2804_v7, %v2836_v31  ;;  %v2171_v22 = vmul.f32 0.2, %v2139_v14 }
 0x791   : > { %2899 = vmax.xlane.f32.xlu1 %v5589_v11  ;;  %2234 = vmax.xlane.f32.xlu0 %v5593_v58  ;;  %v2136_v9 = vadd.f32 %v5528_v24, %v5225_v20  ;;  %vm5637_vm4 = vcmp.ge.f32.partialorder %v1590_v52, 1e+38  ;;  %v2186_v1 = vsel %vm2154_vm14, %v2138_v3, %v2170_v63  ;;  %v2833_v8 = vmul.f32 0.2, %v2801_v35  ;;  %v5672_v6 = vpop.permute.xlu0 %2079 }
 0x792   : > { %v1591_v57 = vsel %vm5613_vm15, 3e+38, %v5448_v59  ;;  %vm2155_vm5 = vcmp.gt.f32.partialorder %v2139_v14, 0.0  ;;  %vm2817_vm6 = vcmp.gt.f32.partialorder %v2801_v35, 0.0  ;;  %v1557_v7 = vand.u32 127, %v5514_v32  ;;  %vm5668_vm9 = vmand %vm5637_vm4, %vm6451_vm2 }
 0x793   : > { %vm5648_vm8 = vcmp.eq.s32.totalorder %v4688_v18, %v1556_v51  ;;  %v5654_v20 = vsel %vm5631_vm3, %v2852_v43, -9e+15  ;;  %v5658_v3 = vsel %vm5599_vm10, %v2186_v1, -9e+15  ;;  %v2137_v59 = vadd.f32 %v5528_v24, %v5223_v13  ;;  %v5690_v43 = vpop.permute.xlu1 %2734 }
 0x794   : > { %v6482_v32 = vmov 0  ;;  %v2168_v31 = vmul.f32 0.2, %v2136_v9  ;;  %v2187_v63 = vsel %vm2155_vm5, %v2139_v14, %v2171_v22  ;;  %vm5674_vm11 = vcmp.ge.f32.partialorder %v1591_v57, 1e+38 }
 0x795   : > { %2236 = vmax.xlane.f32.xlu1 %v5619_v45  ;;  %2895 = vmax.xlane.f32.xlu0 %v5623_v54  ;;  %v6483_v32 = vsel %vm5668_vm9, 4294967295, %v6482_v32  ;;  %vm2818_vm12 = vcmp.gt.f32.partialorder %v2802_v23, 0.0  ;;  %v2799_v13 = vadd.f32 %v5522_v4, %v5227_v0  ;;  %v1588_v49 = vsel %vm5648_vm8, 3e+38, %v5443_v33  ;;  %vm5710_vm4 = vmand %vm5674_vm11, %vm6451_vm2 }
 0x796   : > { %v2849_v51 = vsel %vm2817_vm6, %v2801_v35, %v2833_v8  ;;  %vm2152_vm14 = vcmp.gt.f32.partialorder %v2136_v9, 0.0  ;;  %vm5686_vm15 = vcmp.eq.s32.totalorder %v4688_v18, %v1557_v7  ;;  %v5694_v22 = vsel %vm5631_vm3, %v2187_v63, -9e+15  ;;  %v2730_v63 = vpop.permute.xlu0 %2729 }
 0x797   : > { %v5698_v0 = vsel %vm5668_vm9, %v2849_v51, -9e+15  ;;  %v2169_v33 = vmul.f32 0.2, %v2137_v59  ;;  %v2800_v35 = vadd.f32 %v5522_v4, %v5311_v56  ;;  %vm5714_vm5 = vcmp.ge.f32.partialorder %v1588_v49, 1e+38  ;;  %v2065_v49 = vpop.permute.xlu1 %2064 }
 0x798   : > { %v2850_v56 = vsel %vm2818_vm12, %v2802_v23, %v2834_v40  ;;  %vm2153_vm6 = vcmp.gt.f32.partialorder %v2137_v59, 0.0  ;;  %v2831_v44 = vmul.f32 0.2, %v2799_v13  ;;  %v1555_v8 = vand.u32 127, %v5509_v16  ;;  %vm5743_vm12 = vmand %vm5714_vm5, %vm6451_vm2 }
 0x799   : > { %2897 = vmax.xlane.f32.xlu1 %v5654_v20  ;;  %2230 = vmax.xlane.f32.xlu0 %v5658_v3  ;;  %v1589_v57 = vsel %vm5686_vm15, 3e+38, %v5438_v38  ;;  %v2184_v7 = vsel %vm2152_vm14, %v2136_v9, %v2168_v31  ;;  %vm5725_vm8 = vcmp.eq.s32.totalorder %v4688_v18, %v1554_v55  ;;  %v5731_v52 = vsel %vm5710_vm4, %v2850_v56, -9e+15 }
 0x79a   : > { %v5735_v23 = vsel %vm5668_vm9, %v2184_v7, -9e+15  ;;  %vm2815_vm11 = vcmp.gt.f32.partialorder %v2799_v13, 0.0  ;;  %v2832_v16 = vmul.f32 0.2, %v2800_v35  ;;  %v2185_v38 = vsel %vm2153_vm6, %v2137_v59, %v2169_v33 }
 0x79b   : > { %v2166_v40 = vmul.f32 0.2, %v2134_v10  ;;  %v6494_v9 = vmov 0  ;;  %v2135_v31 = vadd.f32 %v5528_v24, %v5397_v5  ;;  %vm1605_vm14 = vcmp.ge.f32.partialorder %v1589_v57, 1e+38  ;;  %v2070_v57 = vpop.permute.xlu0 %2069 }
 0x79c   : > { %v6495_v9 = vsel %vm5743_vm12, 4294967295, %v6494_v9  ;;  %vm2816_vm15 = vcmp.gt.f32.partialorder %v2800_v35, 0.0  ;;  %v2797_v51 = vadd.f32 %v5522_v4, %v5497_v29  ;;  %vm5752_vm6 = vcmp.eq.s32.totalorder %v4688_v18, %v1555_v8  ;;  %vm5774_vm5 = vmand %vm1605_vm14, %vm6451_vm2 }
 0x79d   : > { %2232 = vmax.xlane.f32.xlu1 %v5694_v22  ;;  %2891 = vmax.xlane.f32.xlu0 %v5698_v0  ;;  %v1586_v55 = vsel %vm5725_vm8, 3e+38, %v5433_v19  ;;  %v2847_v14 = vsel %vm2815_vm11, %v2799_v13, %v2831_v44  ;;  %v1552_v33 = vand.u32 127, %v5505_v30  ;;  %v5762_v5 = vsel %vm5710_vm4, %v2185_v38, -9e+15 }
 0x79e   : > { %v5766_v1 = vsel %vm5743_vm12, %v2847_v14, -9e+15  ;;  %v2132_v29 = vadd.f32 %v5528_v24, %v5641_v50  ;;  %v2848_v30 = vsel %vm2816_vm15, %v2800_v35, %v2832_v16  ;;  %v2182_v13 = vsel %vm2150_vm0, %v2134_v10, %v2166_v40  ;;  %v2725_v10 = vpop.permute.xlu1 %2724 }
 0x79f   : > { %v2167_v56 = vmul.f32 0.2, %v2135_v31  ;;  %v2798_v44 = vadd.f32 %v5522_v4, %v5493_v26  ;;  %v1587_v50 = vsel %vm5752_vm6, 3e+38, %v5428_v48  ;;  %vm5783_vm8 = vcmp.ge.f32.partialorder %v1586_v55, 1e+38 }
 0x7a0   : > { %v2829_v7 = vmul.f32 0.2, %v2797_v51  ;;  %v1553_v17 = vand.u32 127, %v5503_v27  ;;  %vm2151_vm11 = vcmp.gt.f32.partialorder %v2135_v31, 0.0  ;;  %vm5789_vm0 = vcmp.eq.s32.totalorder %v4688_v18, %v1552_v33  ;;  %vm5810_vm15 = vmand %vm5783_vm8, %vm6451_vm2 }
 0x7a1   : > { %2893 = vmax.xlane.f32.xlu1 %v5731_v52  ;;  %2226 = vmax.xlane.f32.xlu0 %v5735_v23  ;;  %v2133_v26 = vadd.f32 %v5528_v24, %v5672_v6  ;;  %v5797_v48 = vsel %vm5774_vm5, %v2848_v30, -9e+15  ;;  %v5801_v16 = vsel %vm5743_vm12, %v2182_v13, -9e+15  ;;  %v2164_v27 = vmul.f32 0.2, %v2132_v29 }
 0x7a2   : > { %v2795_v40 = vadd.f32 %v5522_v4, %v2730_v63  ;;  %v6504_v6 = vmov 0  ;;  %vm1603_vm6 = vcmp.ge.f32.partialorder %v1587_v50, 1e+38  ;;  %v2830_v38 = vmul.f32 0.2, %v2798_v44 }
 0x7a3   : > { %v6505_v6 = vsel %vm5810_vm15, 4294967295, %v6504_v6  ;;  %v2183_v59 = vsel %vm2151_vm11, %v2135_v31, %v2167_v56  ;;  %vm2814_vm1 = vcmp.gt.f32.partialorder %v2798_v44, 0.0  ;;  %vm2148_vm14 = vcmp.gt.f32.partialorder %v2132_v29, 0.0  ;;  %v2720_v31 = vpop.permute.xlu0 %2719  ;;  %vm5836_vm11 = vmand %vm1603_vm6, %vm6451_vm2 }
 0x7a4   : > { %v1550_v55 = vand.u32 127, %v5501_v47  ;;  %vm5816_vm12 = vcmp.eq.s32.totalorder %v4688_v18, %v1553_v17  ;;  %v1584_v14 = vsel %vm5789_vm0, 3e+38, %v5423_v34  ;;  %vm6508_vm8 = vcmp.gt.f32.partialorder %v2797_v51, 0.0 }
 0x7a5   : > { %2228 = vmax.xlane.f32.xlu1 %v5762_v5  ;;  %2887 = vmax.xlane.f32.xlu0 %v5766_v1  ;;  %v2845_v33 = vsel %vm6508_vm8, %v2797_v51, %v2829_v7  ;;  %v2796_v30 = vadd.f32 %v5522_v4, %v5690_v43  ;;  %v2165_v13 = vmul.f32 0.2, %v2133_v26  ;;  %v5828_v56 = vsel %vm5774_vm5, %v2183_v59, -9e+15  ;;  %v2055_v7 = vpop.permute.xlu1 %2054 }
 0x7a6   : > { %v5832_v47 = vsel %vm5810_vm15, %v2845_v33, -9e+15  ;;  %v2130_v34 = vadd.f32 %v5528_v24, %v2065_v49  ;;  %v2827_v51 = vmul.f32 0.2, %v2795_v40  ;;  %v2180_v43 = vsel %vm2148_vm14, %v2132_v29, %v2164_v27 }
 0x7a7   : > { %vm2149_vm0 = vcmp.gt.f32.partialorder %v2133_v26, 0.0  ;;  %v1551_v8 = vand.u32 127, %v5499_v21  ;;  %v2846_v17 = vsel %vm2814_vm1, %v2798_v44, %v2830_v38  ;;  %vm2811_vm8 = vcmp.gt.f32.partialorder %v2795_v40, 0.0  ;;  %v2060_v33 = vpop.permute.xlu0 %2059 }
 0x7a8   : > { %vm5846_vm6 = vcmp.eq.s32.totalorder %v4688_v18, %v1550_v55  ;;  %v1585_v49 = vsel %vm5816_vm12, 3e+38, %v5418_v37  ;;  %vm5853_vm2 = vcmp.ge.f32.partialorder %v1584_v14, 1e+38  ;;  %v5859_v21 = vsel %vm5836_vm11, %v2846_v17, -9e+15 }
 0x7a9   : > { %2889 = vmax.xlane.f32.xlu1 %v5797_v48  ;;  %2222 = vmax.xlane.f32.xlu0 %v5801_v16  ;;  %v2828_v29 = vmul.f32 0.2, %v2796_v30  ;;  %v5863_v44 = vsel %vm5810_vm15, %v2180_v43, -9e+15  ;;  %v2181_v27 = vsel %vm2149_vm0, %v2133_v26, %v2165_v13  ;;  %v2162_v38 = vmul.f32 0.2, %v2130_v34  ;;  %v2710_v13 = vpop.permute.xlu1 %2709 }
 0x7aa   : > { %v2131_v55 = vadd.f32 %v5528_v24, %v2070_v57  ;;  %v2793_v37 = vadd.f32 %v5522_v4, %v2720_v31  ;;  %v2843_v63 = vsel %vm2811_vm8, %v2795_v40, %v2827_v51  ;;  %v1548_v14 = vand.u32 127, %v5495_v28 }
 0x7ab   : > { %vm2146_vm12 = vcmp.gt.f32.partialorder %v2130_v34, 0.0  ;;  %vm5871_vm14 = vcmp.eq.s32.totalorder %v4688_v18, %v1551_v8  ;;  %v1582_v57 = vsel %vm5846_vm6, 3e+38, %v5413_v15  ;;  %v2794_v26 = vadd.f32 %v5522_v4, %v2725_v10 }
 0x7ac   : > { %vm6517_vm0 = vcmp.lt.s32.totalorder %v4688_v18, 64  ;;  %v6518_v40 = vmov 0  ;;  %vm1601_vm1 = vcmp.ge.f32.partialorder %v1585_v49, 1e+38  ;;  %v2128_v28 = vadd.f32 %v5528_v24, %v2055_v7 }
 0x7ad   : > { %2224 = vmax.xlane.f32.xlu1 %v5828_v56  ;;  %2883 = vmax.xlane.f32.xlu0 %v5832_v47  ;;  %vm5883_vm8 = vmand %vm5853_vm2, %vm6517_vm0  ;;  %v5890_v31 = vsel %vm5836_vm11, %v2181_v27, -9e+15  ;;  %vm6520_vm6 = vcmp.gt.f32.partialorder %v2796_v30, 0.0  ;;  %v2163_v51 = vmul.f32 0.2, %v2131_v55  ;;  %v2178_v17 = vsel %vm2146_vm12, %v2130_v34, %v2162_v38  ;;  %v2715_v38 = vpop.permute.xlu0 %2714 }
 0x7ae   : > { %v6519_v40 = vsel %vm5883_vm8, 4294967295, %v6518_v40  ;;  %v5894_v15 = vsel %vm5883_vm8, %v2843_v63, -9e+15  ;;  %v2844_v10 = vsel %vm6520_vm6, %v2796_v30, %v2828_v29  ;;  %v2825_v8 = vmul.f32 0.2, %v2793_v37  ;;  %vm5908_vm15 = vmand %vm1601_vm1, %vm6517_vm0 }
 0x7af   : > { %v1583_v7 = vsel %vm5871_vm14, 3e+38, %v5408_v12  ;;  %vm5902_vm2 = vcmp.ge.f32.partialorder %v1582_v57, 1e+38  ;;  %vm2147_vm6 = vcmp.gt.f32.partialorder %v2131_v55, 0.0  ;;  %vm2809_vm9 = vcmp.gt.f32.partialorder %v2793_v37, 0.0  ;;  %v2045_v57 = vpop.permute.xlu1 %2044 }
 0x7b0   : > { %vm5913_vm3 = vcmp.eq.s32.totalorder %v4688_v18, %v1548_v14  ;;  %v1549_v34 = vand.u32 127, %v5532_v60  ;;  %v2826_v12 = vmul.f32 0.2, %v2794_v26  ;;  %v5920_v59 = vsel %vm5908_vm15, %v2844_v10, -9e+15 }
 0x7b1   : > { %2885 = vmax.xlane.f32.xlu1 %v5859_v21  ;;  %2218 = vmax.xlane.f32.xlu0 %v5863_v44  ;;  %v2160_v29 = vmul.f32 0.2, %v2128_v28  ;;  %v2791_v27 = vadd.f32 %v5522_v4, %v2710_v13  ;;  %v5925_v63 = vsel %vm5883_vm8, %v2178_v17, -9e+15  ;;  %vm2810_vm1 = vcmp.gt.f32.partialorder %v2794_v26, 0.0  ;;  %vm5942_vm8 = vmand %vm5902_vm2, %vm6517_vm0 }
 0x7b2   : > { %v2129_v14 = vadd.f32 %v5528_v24, %v2060_v33  ;;  %v2179_v60 = vsel %vm2147_vm6, %v2131_v55, %v2163_v51  ;;  %v2841_v43 = vsel %vm2809_vm9, %v2793_v37, %v2825_v8  ;;  %vm2144_vm12 = vcmp.gt.f32.partialorder %v2128_v28, 0.0 }
 0x7b3   : > { %v1580_v13 = vsel %vm5913_vm3, 3e+38, %v5403_v39  ;;  %vm5934_vm14 = vcmp.eq.s32.totalorder %v4688_v18, %v1549_v34  ;;  %v6529_v33 = vmov 0  ;;  %vm5946_vm9 = vcmp.ge.f32.partialorder %v1583_v7, 1e+38 }
 0x7b4   : > { %v6530_v33 = vsel %vm5942_vm8, 4294967295, %v6529_v33  ;;  %v2842_v37 = vsel %vm2810_vm1, %v2794_v26, %v2826_v12  ;;  %v2823_v51 = vmul.f32 0.2, %v2791_v27  ;;  %v5952_v39 = vsel %vm5908_vm15, %v2179_v60, -9e+15  ;;  %v2050_v26 = vpop.permute.xlu0 %2049  ;;  %vm6533_vm1 = vmmov %vm6517_vm0 }
 0x7b5   : > { %2220 = vmax.xlane.f32.xlu1 %v5890_v31  ;;  %2879 = vmax.xlane.f32.xlu0 %v5894_v15  ;;  %v5956_v8 = vsel %vm5942_vm8, %v2841_v43, -9e+15  ;;  %v2176_v17 = vsel %vm2144_vm12, %v2128_v28, %v2160_v29  ;;  %v2126_v35 = vadd.f32 %v5528_v24, %v2045_v57  ;;  %v2161_v30 = vmul.f32 0.2, %v2129_v14  ;;  %vm5966_vm0 = vmand %vm5946_vm9, %vm6533_vm1 }
 0x7b6   : > { %v2792_v34 = vadd.f32 %v5522_v4, %v2715_v38  ;;  %vm2807_vm3 = vcmp.gt.f32.partialorder %v2791_v27, 0.0  ;;  %vm2145_vm2 = vcmp.gt.f32.partialorder %v2129_v14, 0.0  ;;  %vm1596_vm6 = vcmp.ge.f32.partialorder %v1580_v13, 1e+38  ;;  %vm6536_vm9 = vmmov %vm6533_vm1 }
 0x7b7   : > { %v1581_v4 = vsel %vm5934_vm14, 3e+38, %v5471_v61  ;;  %v5975_v28 = vsel %vm5966_vm0, %v2842_v37, -9e+15  ;;  %v5979_v12 = vsel %vm5942_vm8, %v2176_v17, -9e+15  ;;  %v2839_v29 = vsel %vm2807_vm3, %v2791_v27, %v2823_v51  ;;  %vm5986_vm1 = vmand %vm1596_vm6, %vm6536_vm9 }
 0x7b8   : > { %v2158_v38 = vmul.f32 0.2, %v2126_v35  ;;  %v2824_v60 = vmul.f32 0.2, %v2792_v34  ;;  %v2127_v43 = vadd.f32 %v5528_v24, %v2050_v26  ;;  %v2177_v57 = vsel %vm2145_vm2, %v2129_v14, %v2161_v30  ;;  %vm6540_vm6 = vmmov %vm6536_vm9 }
 0x7b9   : > { %2881 = vmax.xlane.f32.xlu1 %v5920_v59  ;;  %2214 = vmax.xlane.f32.xlu0 %v5925_v63  ;;  %vm2142_vm12 = vcmp.gt.f32.partialorder %v2126_v35, 0.0  ;;  %vm2808_vm14 = vcmp.gt.f32.partialorder %v2792_v34, 0.0  ;;  %v6537_v61 = vmov 0  ;;  %v5992_v27 = vsel %vm5986_vm1, %v2839_v29, -9e+15 }
 0x7ba   : > { %v6538_v61 = vsel %vm5986_vm1, 4294967295, %v6537_v61  ;;  %v5996_v24 = vsel %vm5966_vm0, %v2177_v57, -9e+15  ;;  %vm1597_vm3 = vcmp.ge.f32.partialorder %v1581_v4, 1e+38  ;;  %v2174_v14 = vsel %vm2142_vm12, %v2126_v35, %v2158_v38 }
 0x7bb   : > { %6539 = vst [vmem:[#allocation3_spill] sm:$0xff] %v6538_v61  ;;  %v2159_v13 = vmul.f32 0.2, %v2127_v43  ;;  %v2840_v10 = vsel %vm2808_vm14, %v2792_v34, %v2824_v60  ;;  %vm2143_vm2 = vcmp.gt.f32.partialorder %v2127_v43, 0.0  ;;  %vm6002_vm9 = vmand %vm1597_vm3, %vm6540_vm6  ;;  %v6541_v55 = vmov 0 }
 0x7bc   : > { %v6542_v55 = vsel %vm6002_vm9, 4294967295, %v6541_v55  ;;  %v6008_v37 = vsel %vm5986_vm1, %v2174_v14, -9e+15  ;;  %v6012_v51 = vsel %vm6002_vm9, %v2840_v10, -9e+15  ;;  %v6543_v61 = vmov 0.0  }
 0x7bd   : > { %2216 = vmax.xlane.f32.xlu1 %v5952_v39  ;;  %2875 = vmax.xlane.f32.xlu0 %v5956_v8  ;;  %v2175_v17 = vsel %vm2143_vm2, %v2127_v43, %v2159_v13  ;;  %vm6544_vm12 = vmmov 0   ;;  %vm3104_vm2 = vcmask 130048   ;;  %vm6545_vm6 = vcmask 64512  }
 0x7be   : > { %v6018_v18 = vsel %vm6002_vm9, %v2175_v17, -9e+15 }
 0x7c1   : > { %2877 = vmax.xlane.f32.xlu1 %v5975_v28  ;;  %2210 = vmax.xlane.f32.xlu0 %v5979_v12 }
 0x7c5   : > { %2871 = vmax.xlane.f32.xlu0 %v5992_v27  ;;  %2212 = vmax.xlane.f32.xlu1 %v5996_v24 }
 0x7c9   : > { %2206 = vmax.xlane.f32.xlu0 %v6008_v37  ;;  %2873 = vmax.xlane.f32.xlu1 %v6012_v51 }
 0x7cd   : > { %2208 = vmax.xlane.f32.xlu1 %v6018_v18 }
 0x816   : > { %v2902_v35 = vpop.xlane.xlu0 %2901 }
 0x817   : > { %v2918_v30 = vsub.f32 %v5563_v62, %v2902_v35 }
 0x819   : > { %v2949_v34 = vmul.f32 1.442695, %v2918_v30 }
 0x81a   : > { %v2900_v26 = vpop.xlane.xlu1 %2899  ;;  %v2235_v4 = vpop.xlane.xlu0 %2234 }
 0x81b   : > { %4351 = vpow2.f32 %v2949_v34  ;;  %v2917_v29 = vsub.f32 %v5589_v11, %v2900_v26  ;;  %v2252_v38 = vsub.f32 %v5593_v58, %v2235_v4 }
 0x81d   : > { %v2947_v60 = vmul.f32 1.442695, %v2917_v29  ;;  %v2282_v57 = vmul.f32 1.442695, %v2252_v38 }
 0x81e   : > { %v2237_v43 = vpop.xlane.xlu1 %2236  ;;  %v2896_v13 = vpop.xlane.xlu0 %2895 }
 0x81f   : > { %4353 = vpow2.f32 %v2947_v60  ;;  %v2253_v14 = vsub.f32 %v5619_v45, %v2237_v43  ;;  %v2915_v10 = vsub.f32 %v5623_v54, %v2896_v13 }
 0x820   : > { %4355 = vpow2.f32 %v2282_v57 }
 0x821   : > { %v2284_v17 = vmul.f32 1.442695, %v2253_v14  ;;  %v2943_v62 = vmul.f32 1.442695, %v2915_v10 }
 0x822   : > { %v2898_v35 = vpop.xlane.xlu1 %2897  ;;  %v2231_v30 = vpop.xlane.xlu0 %2230 }
 0x823   : > { %4357 = vpow2.f32 %v2284_v17  ;;  %v2916_v34 = vsub.f32 %v5654_v20, %v2898_v35  ;;  %v2250_v11 = vsub.f32 %v5658_v3, %v2231_v30 }
 0x824   : > { %4359 = vpow2.f32 %v2943_v62 }
 0x825   : > { %v2945_v58 = vmul.f32 1.442695, %v2916_v34  ;;  %v2278_v26 = vmul.f32 1.442695, %v2250_v11 }
 0x826   : > { %v2233_v4 = vpop.xlane.xlu1 %2232  ;;  %v2892_v29 = vpop.xlane.xlu0 %2891 }
 0x827   : > { %4361 = vpow2.f32 %v2945_v58  ;;  %v2251_v45 = vsub.f32 %v5694_v22, %v2233_v4  ;;  %v2913_v54 = vsub.f32 %v5698_v0, %v2892_v29 }
 0x828   : > { %v6030_v38 = vpop.eup %4351  ;;  %4363 = vpow2.f32 %v2278_v26 }
 0x829   : > { %v2280_v60 = vmul.f32 1.442695, %v2251_v45  ;;  %2981 = vadd.xlane.f32.xlu1 %v6030_v38  ;;  %v2939_v57 = vmul.f32 1.442695, %v2913_v54 }
 0x82a   : > { %v2894_v20 = vpop.xlane.xlu1 %2893  ;;  %v2227_v43 = vpop.xlane.xlu0 %2226 }
 0x82b   : > { %4365 = vpow2.f32 %v2280_v60  ;;  %v2914_v3 = vsub.f32 %v5731_v52, %v2894_v20  ;;  %v2248_v13 = vsub.f32 %v5735_v23, %v2227_v43 }
 0x82c   : > { %v6035_v14 = vpop.eup %4353  ;;  %4367 = vpow2.f32 %v2939_v57 }
 0x82d   : > { %v2941_v10 = vmul.f32 1.442695, %v2914_v3  ;;  %2979 = vadd.xlane.f32.xlu0 %v6035_v14  ;;  %v2274_v22 = vmul.f32 1.442695, %v2248_v13  ;;  %v6038_v62 = vpop.eup %4355 }
 0x82e   : > { %v2229_v0 = vpop.xlane.xlu1 %2228  ;;  %v2888_v17 = vpop.xlane.xlu0 %2887 }
 0x82f   : > { %4369 = vpow2.f32 %v2941_v10  ;;  %v2249_v35 = vsub.f32 %v5762_v5, %v2229_v0  ;;  %v2911_v30 = vsub.f32 %v5766_v1, %v2888_v17 }
 0x830   : > { %v6042_v34 = vpop.eup %4357  ;;  %4371 = vpow2.f32 %v2274_v22 }
 0x831   : > { %v2276_v52 = vmul.f32 1.442695, %v2249_v35  ;;  %2316 = vadd.xlane.f32.xlu1 %v6042_v34  ;;  %2314 = vadd.xlane.f32.xlu0 %v6038_v62  ;;  %v2935_v23 = vmul.f32 1.442695, %v2911_v30  ;;  %v6046_v26 = vpop.eup %4359 }
 0x832   : > { %v2890_v11 = vpop.xlane.xlu1 %2889  ;;  %v2223_v58 = vpop.xlane.xlu0 %2222 }
 0x833   : > { %4373 = vpow2.f32 %v2276_v52  ;;  %v2912_v4 = vsub.f32 %v5797_v48, %v2890_v11  ;;  %v2246_v5 = vsub.f32 %v5801_v16, %v2223_v58 }
 0x834   : > { %v6050_v29 = vpop.eup %4361  ;;  %4375 = vpow2.f32 %v2935_v23 }
 0x835   : > { %v2937_v1 = vmul.f32 1.442695, %v2912_v4  ;;  %2977 = vadd.xlane.f32.xlu1 %v6050_v29  ;;  %2975 = vadd.xlane.f32.xlu0 %v6046_v26  ;;  %v2270_v45 = vmul.f32 1.442695, %v2246_v5  ;;  %v6054_v57 = vpop.eup %4363 }
 0x836   : > { %v2225_v54 = vpop.xlane.xlu1 %2224  ;;  %v2884_v60 = vpop.xlane.xlu0 %2883 }
 0x837   : > { %4377 = vpow2.f32 %v2937_v1  ;;  %v2247_v20 = vsub.f32 %v5828_v56, %v2225_v54  ;;  %v2909_v48 = vsub.f32 %v5832_v47, %v2884_v60 }
 0x838   : > { %v6058_v43 = vpop.eup %4365  ;;  %4379 = vpow2.f32 %v2270_v45 }
 0x839   : > { %v2272_v16 = vmul.f32 1.442695, %v2247_v20  ;;  %2312 = vadd.xlane.f32.xlu1 %v6058_v43  ;;  %2310 = vadd.xlane.f32.xlu0 %v6054_v57  ;;  %v2931_v3 = vmul.f32 1.442695, %v2909_v48  ;;  %v6062_v22 = vpop.eup %4367 }
 0x83a   : > { %v2886_v13 = vpop.xlane.xlu1 %2885  ;;  %v2219_v10 = vpop.xlane.xlu0 %2218 }
 0x83b   : > { %4381 = vpow2.f32 %v2272_v16  ;;  %v2910_v0 = vsub.f32 %v5859_v21, %v2886_v13  ;;  %v2244_v56 = vsub.f32 %v5863_v44, %v2219_v10 }
 0x83c   : > { %v6066_v17 = vpop.eup %4369  ;;  %4383 = vpow2.f32 %v2931_v3 }
 0x83d   : > { %v2933_v47 = vmul.f32 1.442695, %v2910_v0  ;;  %2973 = vadd.xlane.f32.xlu1 %v6066_v17  ;;  %2971 = vadd.xlane.f32.xlu0 %v6062_v22  ;;  %v2266_v35 = vmul.f32 1.442695, %v2244_v56  ;;  %v6070_v23 = vpop.eup %4371 }
 0x83e   : > { %v2221_v30 = vpop.xlane.xlu1 %2220  ;;  %v2880_v52 = vpop.xlane.xlu0 %2879 }
 0x83f   : > { %4385 = vpow2.f32 %v2933_v47  ;;  %v2245_v11 = vsub.f32 %v5890_v31, %v2221_v30  ;;  %v2907_v21 = vsub.f32 %v5894_v15, %v2880_v52 }
 0x840   : > { %v6074_v58 = vpop.eup %4373  ;;  %4387 = vpow2.f32 %v2266_v35 }
 0x841   : > { %v2268_v44 = vmul.f32 1.442695, %v2245_v11  ;;  %2308 = vadd.xlane.f32.xlu1 %v6074_v58  ;;  %2306 = vadd.xlane.f32.xlu0 %v6070_v23  ;;  %v2927_v4 = vmul.f32 1.442695, %v2907_v21  ;;  %v6078_v45 = vpop.eup %4375 }
 0x842   : > { %v2882_v5 = vpop.xlane.xlu1 %2881  ;;  %v2215_v1 = vpop.xlane.xlu0 %2214 }
 0x843   : > { %4389 = vpow2.f32 %v2268_v44  ;;  %v2908_v54 = vsub.f32 %v5920_v59, %v2882_v5  ;;  %v2242_v31 = vsub.f32 %v5925_v63, %v2215_v1 }
 0x844   : > { %v6082_v60 = vpop.eup %4377  ;;  %4391 = vpow2.f32 %v2927_v4 }
 0x845   : > { %v2929_v15 = vmul.f32 1.442695, %v2908_v54  ;;  %2969 = vadd.xlane.f32.xlu1 %v6082_v60  ;;  %2967 = vadd.xlane.f32.xlu0 %v6078_v45  ;;  %v2262_v20 = vmul.f32 1.442695, %v2242_v31  ;;  %v6086_v3 = vpop.eup %4379 }
 0x846   : > { %v2217_v48 = vpop.xlane.xlu1 %2216  ;;  %v2876_v16 = vpop.xlane.xlu0 %2875 }
 0x847   : > { %4393 = vpow2.f32 %v2929_v15  ;;  %v2243_v13 = vsub.f32 %v5952_v39, %v2217_v48  ;;  %v2905_v59 = vsub.f32 %v5956_v8, %v2876_v16 }
 0x848   : > { %v6090_v10 = vpop.eup %4381  ;;  %4395 = vpow2.f32 %v2262_v20 }
 0x849   : > { %v2264_v63 = vmul.f32 1.442695, %v2243_v13  ;;  %2304 = vadd.xlane.f32.xlu1 %v6090_v10  ;;  %2302 = vadd.xlane.f32.xlu0 %v6086_v3  ;;  %v2923_v0 = vmul.f32 1.442695, %v2905_v59  ;;  %v6094_v35 = vpop.eup %4383 }
 0x84a   : > { %v2878_v56 = vpop.xlane.xlu1 %2877  ;;  %v2211_v47 = vpop.xlane.xlu0 %2210 }
 0x84b   : > { %4397 = vpow2.f32 %v2264_v63  ;;  %v2906_v30 = vsub.f32 %v5975_v28, %v2878_v56  ;;  %v2240_v39 = vsub.f32 %v5979_v12, %v2211_v47 }
 0x84c   : > { %v6098_v52 = vpop.eup %4385  ;;  %4399 = vpow2.f32 %v2923_v0 }
 0x84d   : > { %v2925_v8 = vmul.f32 1.442695, %v2906_v30  ;;  %2965 = vadd.xlane.f32.xlu1 %v6098_v52  ;;  %2963 = vadd.xlane.f32.xlu0 %v6094_v35  ;;  %v2258_v11 = vmul.f32 1.442695, %v2240_v39  ;;  %v6102_v4 = vpop.eup %4387 }
 0x84e   : > { %v2213_v21 = vpop.xlane.xlu1 %2212  ;;  %v2872_v44 = vpop.xlane.xlu0 %2871 }
 0x84f   : > { %4401 = vpow2.f32 %v2925_v8  ;;  %v2241_v5 = vsub.f32 %v5996_v24, %v2213_v21  ;;  %v2903_v28 = vsub.f32 %v5992_v27, %v2872_v44  ;;  %v3070_v44 = vld [vmem:[%s6439_s2] sm:$0xff] }
 0x850   : > { %v6106_v1 = vpop.eup %4389  ;;  %4403 = vpow2.f32 %v2258_v11 }
 0x851   : > { %v2260_v12 = vmul.f32 1.442695, %v2241_v5  ;;  %2300 = vadd.xlane.f32.xlu1 %v6106_v1  ;;  %2298 = vadd.xlane.f32.xlu0 %v6102_v4  ;;  %v2919_v54 = vmul.f32 1.442695, %v2903_v28  ;;  %v6110_v20 = vpop.eup %4391  ;;  %v3071_v5 = vld [vmem:[%s6439_s2 + $0x8] sm:$0xff] }
 0x852   : > { %v2874_v31 = vpop.xlane.xlu1 %2873  ;;  %v2207_v15 = vpop.xlane.xlu0 %2206 }
 0x853   : > { %4405 = vpow2.f32 %v2260_v12  ;;  %v2904_v48 = vsub.f32 %v6012_v51, %v2874_v31  ;;  %v2238_v24 = vsub.f32 %v6008_v37, %v2207_v15 }
 0x854   : > { %v6114_v16 = vpop.eup %4393  ;;  %4407 = vpow2.f32 %v2919_v54 }
 0x855   : > { %v2921_v27 = vmul.f32 1.442695, %v2904_v48  ;;  %2961 = vadd.xlane.f32.xlu1 %v6114_v16  ;;  %2959 = vadd.xlane.f32.xlu0 %v6110_v20  ;;  %v2254_v13 = vmul.f32 1.442695, %v2238_v24  ;;  %v6118_v63 = vpop.eup %4395 }
 0x856   : > { %v2209_v59 = vpop.xlane.xlu1 %2208 }
 0x857   : > { %4409 = vpow2.f32 %v2921_v27  ;;  %v2239_v0 = vsub.f32 %v6018_v18, %v2209_v59 }
 0x858   : > { %v6121_v56 = vpop.eup %4397  ;;  %4411 = vpow2.f32 %v2254_v13 }
 0x859   : > { %v2256_v51 = vmul.f32 1.442695, %v2239_v0  ;;  %2296 = vadd.xlane.f32.xlu1 %v6121_v56  ;;  %2294 = vadd.xlane.f32.xlu0 %v6118_v63  ;;  %v6125_v37 = vpop.eup %4399 }
 0x85b   : > { %4413 = vpow2.f32 %v2256_v51 }
 0x85c   : > { %v6127_v47 = vpop.eup %4401 }
 0x85d   : > { %2957 = vadd.xlane.f32.xlu1 %v6127_v47  ;;  %2955 = vadd.xlane.f32.xlu0 %v6125_v37  ;;  %v6131_v30 = vpop.eup %4403 }
 0x860   : > { %v6133_v18 = vpop.eup %4405 }
 0x861   : > { %2292 = vadd.xlane.f32.xlu1 %v6133_v18  ;;  %2290 = vadd.xlane.f32.xlu0 %v6131_v30  ;;  %v6137_v39 = vpop.eup %4407 }
 0x864   : > { %v6139_v8 = vpop.eup %4409 }
 0x865   : > { %2953 = vadd.xlane.f32.xlu1 %v6139_v8  ;;  %2951 = vadd.xlane.f32.xlu0 %v6137_v39  ;;  %v6143_v11 = vpop.eup %4411 }
 0x868   : > { %v6145_v21 = vpop.eup %4413 }
 0x869   : > { %2288 = vadd.xlane.f32.xlu1 %v6145_v21  ;;  %2286 = vadd.xlane.f32.xlu0 %v6143_v11 }
 0x896   : > { %3072 = vxpose.xlu0.b32.start [1/2] (short) (narrow) %v3070_v44, 8 }
 0x89a   : > { %3073 = vxpose.xlu0.b32.end [2/2] (short) (narrow) %v3071_v5, 8 }
 0x8b2   : > { %v2982_v28 = vpop.xlane.xlu1 %2981 }
 0x8b3   : > { %4415 = vrcp.f32 %v2982_v28 }
 0x8b6   : > { %v2980_v12 = vpop.xlane.xlu0 %2979 }
 0x8b7   : > { %4417 = vrcp.f32 %v2980_v12 }
 0x8ba   : > { %v2317_v54 = vpop.xlane.xlu1 %2316  ;;  %v2315_v31 = vpop.xlane.xlu0 %2314 }
 0x8bb   : > { %4419 = vrcp.f32 %v2317_v54 }
 0x8bc   : > { %4421 = vrcp.f32 %v2315_v31 }
 0x8be   : > { %v2978_v15 = vpop.xlane.xlu1 %2977  ;;  %v2976_v48 = vpop.xlane.xlu0 %2975 }
 0x8bf   : > { %4423 = vrcp.f32 %v2978_v15 }
 0x8c0   : > { %4425 = vrcp.f32 %v2976_v48  ;;  %v4416_v24 = vpop.eup %4415 }
 0x8c1   : > { %v3014_v51 = vmul.f32 %v4416_v24, %v6030_v38 }
 0x8c2   : > { %v2313_v27 = vpop.xlane.xlu1 %2312  ;;  %v2311_v13 = vpop.xlane.xlu0 %2310 }
 0x8c3   : > { %4427 = vrcp.f32 %v2313_v27 }
 0x8c4   : > { %v4418_v59 = vpop.eup %4417  ;;  %4429 = vrcp.f32 %v2311_v13 }
 0x8c5   : > { %v3013_v0 = vmul.f32 %v4418_v59, %v6035_v14 }
 0x8c6   : > { %v2974_v44 = vpop.xlane.xlu1 %2973  ;;  %v2972_v5 = vpop.xlane.xlu0 %2971 }
 0x8c7   : > { %4431 = vrcp.f32 %v2974_v44  ;;  %v3023_v28 = vpack.c.bf16 %v3014_v51, %v3013_v0 }
 0x8c8   : > { %v4420_v12 = vpop.eup %4419  ;;  %4433 = vrcp.f32 %v2972_v5 }
 0x8c9   : > { %v4422_v54 = vpop.eup %4421  ;;  %4258 = vmatpush3.bf16.xpose.msra.mxu0 %v3023_v28  ;;  %v2349_v31 = vmul.f32 %v4420_v12, %v6042_v34 }
 0x8ca   : > { %v2309_v15 = vpop.xlane.xlu1 %2308  ;;  %v2307_v48 = vpop.xlane.xlu0 %2306  ;;  %v2348_v27 = vmul.f32 %v4422_v54, %v6038_v62  ;;  %4259 = vmatprep.subr.bf16.mxu0 %v6543_v61 }
 0x8cb   : > { %4435 = vrcp.f32 %v2309_v15 }
 0x8cc   : > { %v4424_v14 = vpop.eup %4423  ;;  %4437 = vrcp.f32 %v2307_v48  ;;  %v2358_v38 = vpack.c.bf16 %v2349_v31, %v2348_v27 }
 0x8cd   : > { %v4426_v24 = vpop.eup %4425  ;;  %v3012_v13 = vmul.f32 %v4424_v14, %v6050_v29 }
 0x8ce   : > { %4207 = vmatpush3.bf16.xpose.msra.mxu1 %v2358_v38  ;;  %v2970_v59 = vpop.xlane.xlu1 %2969  ;;  %v2968_v0 = vpop.xlane.xlu0 %2967  ;;  %v3011_v51 = vmul.f32 %v4426_v24, %v6046_v26 }
 0x8cf   : > { %4439 = vrcp.f32 %v2970_v59  ;;  %4208 = vmatprep.subr.bf16.mxu1 %v6543_v61 }
 0x8d0   : > { %v4428_v34 = vpop.eup %4427  ;;  %4441 = vrcp.f32 %v2968_v0  ;;  %v3022_v62 = vpack.c.bf16 %v3012_v13, %v3011_v51 }
 0x8d1   : > { %v4430_v44 = vpop.eup %4429  ;;  %v2347_v5 = vmul.f32 %v4428_v34, %v6058_v43 }
 0x8d2   : > { %4260 = vmatpush3.bf16.xpose.msra.mxu0 %v3022_v62  ;;  %v2305_v28 = vpop.xlane.xlu1 %2304  ;;  %v2303_v12 = vpop.xlane.xlu0 %2302  ;;  %v2346_v54 = vmul.f32 %v4430_v44, %v6054_v57 }
 0x8d3   : > { %4443 = vrcp.f32 %v2305_v28  ;;  %4261 = vmatprep.subr.bf16.mxu0 %v6543_v61 }
 0x8d4   : > { %v4432_v29 = vpop.eup %4431  ;;  %4445 = vrcp.f32 %v2303_v12  ;;  %v2357_v26 = vpack.c.bf16 %v2347_v5, %v2346_v54 }
 0x8d5   : > { %v4434_v31 = vpop.eup %4433  ;;  %v3010_v15 = vmul.f32 %v4432_v29, %v6066_v17 }
 0x8d6   : > { %4209 = vmatpush3.bf16.xpose.msra.mxu1 %v2357_v26  ;;  %v2966_v48 = vpop.xlane.xlu1 %2965  ;;  %v2964_v27 = vpop.xlane.xlu0 %2963  ;;  %v3009_v14 = vmul.f32 %v4434_v31, %v6062_v22 }
 0x8d7   : > { %4447 = vrcp.f32 %v2966_v48  ;;  %4210 = vmatprep.subr.bf16.mxu1 %v6543_v61 }
 0x8d8   : > { %v4436_v43 = vpop.eup %4435  ;;  %4449 = vrcp.f32 %v2964_v27  ;;  %v3021_v57 = vpack.c.bf16 %v3010_v15, %v3009_v14 }
 0x8d9   : > { %v4438_v38 = vpop.eup %4437  ;;  %v2345_v24 = vmul.f32 %v4436_v43, %v6074_v58 }
 0x8da   : > { %4262 = vmatpush3.bf16.xpose.msra.mxu0 %v3021_v57  ;;  %v2301_v13 = vpop.xlane.xlu1 %2300  ;;  %v2299_v59 = vpop.xlane.xlu0 %2298  ;;  %v2344_v0 = vmul.f32 %v4438_v38, %v6070_v23 }
 0x8db   : > { %4451 = vrcp.f32 %v2301_v13  ;;  %4263 = vmatprep.subr.bf16.mxu0 %v6543_v61 }
 0x8dc   : > { %v4440_v17 = vpop.eup %4439  ;;  %4453 = vrcp.f32 %v2299_v59  ;;  %v2356_v22 = vpack.c.bf16 %v2345_v24, %v2344_v0 }
 0x8dd   : > { %v4442_v51 = vpop.eup %4441  ;;  %v3008_v34 = vmul.f32 %v4440_v17, %v6082_v60 }
 0x8de   : > { %4211 = vmatpush3.bf16.xpose.msra.mxu1 %v2356_v22  ;;  %v2962_v62 = vpop.xlane.xlu1 %2961  ;;  %v2960_v44 = vpop.xlane.xlu0 %2959  ;;  %v3007_v5 = vmul.f32 %v4442_v51, %v6078_v45 }
 0x8df   : > { %4455 = vrcp.f32 %v2962_v62  ;;  %4212 = vmatprep.subr.bf16.mxu1 %v6543_v61 }
 0x8e0   : > { %v4444_v58 = vpop.eup %4443  ;;  %4457 = vrcp.f32 %v2960_v44  ;;  %v3020_v23 = vpack.c.bf16 %v3008_v34, %v3007_v5 }
 0x8e1   : > { %v4446_v28 = vpop.eup %4445  ;;  %v2343_v12 = vmul.f32 %v4444_v58, %v6090_v10 }
 0x8e2   : > { %4264 = vmatpush3.bf16.xpose.msra.mxu0 %v3020_v23  ;;  %v2297_v54 = vpop.xlane.xlu1 %2296  ;;  %v2295_v29 = vpop.xlane.xlu0 %2294  ;;  %v2342_v26 = vmul.f32 %v4446_v28, %v6086_v3 }
 0x8e3   : > { %4459 = vrcp.f32 %v2297_v54  ;;  %4265 = vmatprep.subr.bf16.mxu0 %v6543_v61 }
 0x8e4   : > { %v4448_v60 = vpop.eup %4447  ;;  %4461 = vrcp.f32 %v2295_v29  ;;  %v2355_v45 = vpack.c.bf16 %v2343_v12, %v2342_v26 }
 0x8e5   : > { %v4450_v31 = vpop.eup %4449  ;;  %v3006_v15 = vmul.f32 %v4448_v60, %v6098_v52 }
 0x8e6   : > { %4213 = vmatpush3.bf16.xpose.msra.mxu1 %v2355_v45  ;;  %v2958_v48 = vpop.xlane.xlu1 %2957  ;;  %v2956_v27 = vpop.xlane.xlu0 %2955  ;;  %v3005_v14 = vmul.f32 %v4450_v31, %v6094_v35 }
 0x8e7   : > { %4463 = vrcp.f32 %v2958_v48  ;;  %4214 = vmatprep.subr.bf16.mxu1 %v6543_v61 }
 0x8e8   : > { %v4452_v10 = vpop.eup %4451  ;;  %4465 = vrcp.f32 %v2956_v27  ;;  %v3019_v3 = vpack.c.bf16 %v3006_v15, %v3005_v14 }
 0x8e9   : > { %v4454_v43 = vpop.eup %4453  ;;  %v2341_v57 = vmul.f32 %v4452_v10, %v6106_v1 }
 0x8ea   : > { %4266 = vmatpush3.bf16.xpose.msra.mxu0 %v3019_v3  ;;  %v2293_v38 = vpop.xlane.xlu1 %2292  ;;  %v2291_v24 = vpop.xlane.xlu0 %2290  ;;  %v2340_v13 = vmul.f32 %v4454_v43, %v6102_v4 }
 0x8eb   : > { %4467 = vrcp.f32 %v2293_v38  ;;  %4267 = vmatprep.subr.bf16.mxu0 %v6543_v61 }
 0x8ec   : > { %v4456_v52 = vpop.eup %4455  ;;  %4469 = vrcp.f32 %v2291_v24  ;;  %v2354_v35 = vpack.c.bf16 %v2341_v57, %v2340_v13 }
 0x8ed   : > { %v4458_v59 = vpop.eup %4457  ;;  %v3004_v0 = vmul.f32 %v4456_v52, %v6114_v16 }
 0x8ee   : > { %4215 = vmatpush3.bf16.xpose.msra.mxu1 %v2354_v35  ;;  %v2954_v17 = vpop.xlane.xlu1 %2953  ;;  %v2952_v22 = vpop.xlane.xlu0 %2951  ;;  %v3003_v51 = vmul.f32 %v4458_v59, %v6110_v20 }
 0x8ef   : > { %4471 = vrcp.f32 %v2954_v17  ;;  %4216 = vmatprep.subr.bf16.mxu1 %v6543_v61 }
 0x8f0   : > { %v4460_v1 = vpop.eup %4459  ;;  %4473 = vrcp.f32 %v2952_v22  ;;  %v3018_v4 = vpack.c.bf16 %v3004_v0, %v3003_v51 }
 0x8f1   : > { %v4462_v34 = vpop.eup %4461  ;;  %v2339_v62 = vmul.f32 %v4460_v1, %v6121_v56 }
 0x8f2   : > { %4268 = vmatpush3.bf16.xpose.msra.mxu0 %v3018_v4  ;;  %v2289_v44 = vpop.xlane.xlu1 %2288  ;;  %v2287_v5 = vpop.xlane.xlu0 %2286  ;;  %v2338_v58 = vmul.f32 %v4462_v34, %v6118_v63 }
 0x8f3   : > { %4475 = vrcp.f32 %v2289_v44  ;;  %4269 = vmatprep.subr.bf16.mxu0 %v6543_v61 }
 0x8f4   : > { %v4464_v16 = vpop.eup %4463  ;;  %4477 = vrcp.f32 %v2287_v5  ;;  %v2353_v20 = vpack.c.bf16 %v2339_v62, %v2338_v58 }
 0x8f5   : > { %v4466_v23 = vpop.eup %4465  ;;  %v3002_v28 = vmul.f32 %v4464_v16, %v6127_v47 }
 0x8f6   : > { %4217 = vmatpush3.bf16.xpose.msra.mxu1 %v2353_v20  ;;  %v3001_v12 = vmul.f32 %v4466_v23, %v6125_v37 }
 0x8f7   : > { %4218 = vmatprep.subr.bf16.mxu1 %v6543_v61 }
 0x8f8   : > { %v4468_v56 = vpop.eup %4467  ;;  %v3017_v54 = vpack.c.bf16 %v3002_v28, %v3001_v12 }
 0x8f9   : > { %v4470_v29 = vpop.eup %4469  ;;  %v2337_v26 = vmul.f32 %v4468_v56, %v6133_v18 }
 0x8fa   : > { %4270 = vmatpush3.bf16.xpose.msra.mxu0 %v3017_v54  ;;  %v2336_v63 = vmul.f32 %v4470_v29, %v6131_v30 }
 0x8fb   : > { %4271 = vmatprep.subr.bf16.mxu0 %v6543_v61 }
 0x8fc   : > { %v4472_v60 = vpop.eup %4471  ;;  %v2352_v45 = vpack.c.bf16 %v2337_v26, %v2336_v63 }
 0x8fd   : > { %v4474_v31 = vpop.eup %4473  ;;  %v3000_v47 = vmul.f32 %v4472_v60, %v6139_v8  ;;  %v3015_v8 = vpack.c.bf16 %v4650_v41, %v4650_v41 }
 0x8fe   : > { %4219 = vmatpush3.bf16.xpose.msra.mxu1 %v2352_v45  ;;  %v2999_v37 = vmul.f32 %v4474_v31, %v6137_v39  ;;  %v2350_v39 = vpack.c.bf16 %v4653_v42, %v4653_v42 }
 0x8ff   : > { %4220 = vmatprep.subr.bf16.mxu1 %v6543_v61 }
 0x900   : > { %v4476_v15 = vpop.eup %4475  ;;  %v3016_v48 = vpack.c.bf16 %v3000_v47, %v2999_v37  ;;  %v4550_v37 = vld [vmem:[%s6441_s4] sm:$0x7] }
 0x901   : > { %v4478_v27 = vpop.eup %4477  ;;  %v2335_v18 = vmul.f32 %v4476_v15, %v6145_v21  ;;  %v3406_v15 = vrot.slane %v4550_v37, 2 }
 0x902   : > { %4272 = vmatpush3.bf16.xpose.msra.mxu0 %v3016_v48  ;;  %v2334_v30 = vmul.f32 %v4478_v27, %v6143_v11  ;;  %v4549_v11 = vld [vmem:[%s6440_s3] sm:$0xff] }
 0x903   : > { %4315 = vmatprep.subr.bf16.mxu0 %v6543_v61  ;;  %3210 = vrot.lane.b32.xlu1 %v4549_v11, %s4564_s12 }
 0x904   : > { %v2351_v14 = vpack.c.bf16 %v2335_v18, %v2334_v30 }
 0x906   : > { %4221 = vmatpush3.bf16.xpose.msra.mxu1 %v2351_v14 }
 0x907   : > { %4277 = vmatprep.subr.mxu1 %v6543_v61 }
 0x909   : > { %4274 = vmatmul.mubr.bf16.vlgmr.msra.gmra.mxu0 %v3015_v8 }
 0x90a   : > { %4331 = vmatprep.mubr.msk.bf16.mxu0 %vm6544_vm12, %v6543_v61 }
 0x90d   : > { %4223 = vmatmul.mubr.bf16.vlgmr.msra.gmra.mxu1 %v2350_v39 }
 0x90e   : > { %4281 = vmatprep.mubr.msk.f32.mxu1 %vm6544_vm12, %v6543_v61 }
 0x912   : > { %v3088_v1 = vpop.trf.xlu0 }
 0x975   : > { %v3211_v34 = vpop.permute.xlu1 %3210 }
 0x9c9   : > { %v3058_v41 = vpop.f32.mrf.mxu0 }
 0x9ca   : > { %v3065_v21 = vmin.f32 %v3058_v41, 0.0  ;;  %vm3064_vm14 = vcmp.gt.f32.partialorder %v3058_v41, 0.0 }
 0x9cb   : > { %v4275_v10 = vpop.f32.mrf.mxu0 }
 0x9cc   : > { %v3066_v3 = vmul.f32 1.442695, %v3065_v21 }
 0x9cd   : > { %v2393_v43 = vpop.f32.mrf.mxu1  ;;  %v3061_v57 = vpop.f32.mrf.mxu0 }
 0x9ce   : > { %4479 = vpow2.f32 %v3066_v3  ;;  %v2400_v38 = vmin.f32 %v2393_v43, 0.0  ;;  %vm2399_vm3 = vcmp.gt.f32.partialorder %v2393_v43, 0.0 }
 0x9cf   : > { %v4224_v24 = vpop.f32.mrf.mxu1  ;;  %v4276_v42 = vpop.f32.mrf.mxu0 }
 0x9d0   : > { %v2401_v13 = vmul.f32 1.442695, %v2400_v38 }
 0x9d1   : > { %v2396_v52 = vpop.f32.mrf.mxu1 }
 0x9d2   : > { %4481 = vpow2.f32 %v2401_v13 }
 0x9d3   : > { %v4225_v35 = vpop.f32.mrf.mxu1 }
 0x9db   : > { %v4480_v59 = vpop.eup %4479 }
 0x9dc   : > { %v3972_v0 = vadd.f32 -1.0, %v4480_v59  ;;  %v6561_v59 = vld [vmem:[#allocation2_spill] sm:$0xff] }
 0x9de   : > { %v3069_v17 = vsel %vm3064_vm14, %v3058_v41, %v3972_v0  ;;  %vm6546_vm14 = vmmov %vm6545_vm6 }
 0x9df   : > { %v4482_v22 = vpop.eup %4481  ;;  %4278 = vmatpush3.msra.mxu1 %v3069_v17 }
 0x9e0   : > { %4279 = vmatprep.subr.mxu1 %v6543_v61  ;;  %v3954_v51 = vadd.f32 -1.0, %v4482_v22 }
 0x9e2   : > { %v2404_v4 = vsel %vm2399_vm3, %v2393_v43, %v3954_v51  ;;  %vm6547_vm3 = vmmov %vm6545_vm6 }
 0x9e3   : > { %4280 = vmatpush3.msra.mxu1 %v2404_v4 }
 0x9e4   : > { %4282 = vmatmul.mubr.msk.f32.vlgmr.msra.gmra.mxu1 %vm3104_vm2, %v3088_v1  ;;  %4284 = vmatprep.subr.mxu1 %v3211_v34  ;;  %vm6548_vm2 = vmmov %vm6547_vm3 }
 0x9e5   : > { %4285 = vmatpush3.msra.mxu1 %v3211_v34  ;;  %vm6549_vm1 = vmmov %vm6548_vm2 }
 0x9e6   : > { %4310 = vmatprep.subr.mxu1 %v6543_v61  ;;  %vm6550_vm9 = vmmov %vm6549_vm1 }
 0x9e7   : > { %vm6551_vm8 = vmmov %vm6549_vm1 }
 0xaa4   : > { %v6216_v62 = vpop.f32.mrf.mxu1 }
 0xaa5   : > { %3178 = vxpose.xlu1.b32.start.end [1/1] (short) %v6216_v62, 128 }
 0xaa6   : > { %v4283_v44 = vpop.f32.mrf.mxu1 }
 0xb21   : > { %v3194_v5 = vpop.trf.xlu1 }
 0xb22   : > { %4286 = vmatprep.mubr.msk.f32.mxu1 %vm6545_vm6, %v3194_v5  ;;  %vm6552_vm6 = vmmov %vm6549_vm1 }
 0xb25   : > { %v3195_v58 = vpop.trf.xlu1 }
 0xb26   : > { %4287 = vmatmul.mubr.msk.f32.vlgmr.msra.gmra.mxu1 %vm6546_vm14, %v3195_v58  ;;  %vm6553_vm14 = vmmov %vm6549_vm1 }
 0xb27   : > { %4311 = vmatpush3.msra.mxu1 %v6216_v62 }
 0xb29   : > { %v3196_v16 = vpop.trf.xlu1 }
 0xb2a   : > { %4289 = vmatprep.mubr.msk.f32.mxu1 %vm6547_vm3, %v3196_v16  ;;  %vm6554_vm3 = vmmov %vm6549_vm1 }
 0xb2d   : > { %v3197_v20 = vpop.trf.xlu1 }
 0xb2e   : > { %4290 = vmatmul.mubr.msk.f32.gmra.mxu1 %vm6548_vm2, %v3197_v20  ;;  %vm6555_vm2 = vmmov %vm6549_vm1 }
 0xb31   : > { %v3198_v23 = vpop.trf.xlu1 }
 0xb32   : > { %4292 = vmatprep.mubr.msk.f32.mxu1 %vm6549_vm1, %v3198_v23 }
 0xb35   : > { %v3199_v28 = vpop.trf.xlu1 }
 0xb36   : > { %4293 = vmatmul.mubr.msk.f32.gmra.mxu1 %vm6550_vm9, %v3199_v28  ;;  %vm6556_vm9 = vmmov %vm6549_vm1 }
 0xb39   : > { %v3200_v12 = vpop.trf.xlu1 }
 0xb3a   : > { %4295 = vmatprep.mubr.msk.f32.mxu1 %vm6551_vm8, %v3200_v12  ;;  %vm6557_vm8 = vmmov %vm6549_vm1 }
 0xb3d   : > { %v3201_v56 = vpop.trf.xlu1 }
 0xb3e   : > { %4296 = vmatmul.mubr.msk.f32.gmra.mxu1 %vm6552_vm6, %v3201_v56  ;;  %vm6558_vm6 = vmmov %vm6549_vm1 }
 0xb41   : > { %v3202_v54 = vpop.trf.xlu1 }
 0xb42   : > { %4298 = vmatprep.mubr.msk.f32.mxu1 %vm6553_vm14, %v3202_v54  ;;  %vm6559_vm14 = vmmov %vm6549_vm1 }
 0xb45   : > { %v3203_v29 = vpop.trf.xlu1 }
 0xb46   : > { %4299 = vmatmul.mubr.msk.f32.gmra.mxu1 %vm6554_vm3, %v3203_v29  ;;  %vm6560_vm3 = vmmov %vm6549_vm1 }
 0xb49   : > { %v3204_v26 = vpop.trf.xlu1 }
 0xb4a   : > { %4301 = vmatprep.mubr.msk.f32.mxu1 %vm6555_vm2, %v3204_v26 }
 0xb4d   : > { %v3205_v63 = vpop.trf.xlu1 }
 0xb4e   : > { %4302 = vmatmul.mubr.msk.f32.gmra.mxu1 %vm6549_vm1, %v3205_v63 }
 0xb51   : > { %v3206_v60 = vpop.trf.xlu1 }
 0xb52   : > { %4304 = vmatprep.mubr.msk.f32.mxu1 %vm6556_vm9, %v3206_v60 }
 0xb55   : > { %v3207_v45 = vpop.trf.xlu1 }
 0xb56   : > { %4305 = vmatmul.mubr.msk.f32.gmra.mxu1 %vm6557_vm8, %v3207_v45 }
 0xb59   : > { %v3208_v31 = vpop.trf.xlu1 }
 0xb5a   : > { %4307 = vmatprep.mubr.msk.f32.mxu1 %vm6558_vm6, %v3208_v31  ;;  %vm6563_vm6 = vnez %v6483_v32 }
 0xb5d   : > { %v3209_v47 = vpop.trf.xlu1 }
 0xb5e   : > { %4308 = vmatmul.mubr.msk.f32.gmra.mxu1 %vm6559_vm14, %v3209_v47 }
 0xb5f   : > { %4312 = vmatprep.mubr.msk.f32.mxu1 %vm6544_vm12, %v6543_v61 }
 0xb62   : > { %4313 = vmatmul.mubr.msk.f32.vlgmr.msra.gmra.mxu1 %vm6560_vm3, %v3406_v15  ;;  %vm6564_vm3 = vnez %v6495_v9 }
 0xbe6   : > { %v4288_v48 = vpop.f32.mrf.mxu1 }
 0xbe8   : > { %v3327_v27 = vpop.f32.mrf.mxu1 }
 0xbee   : > { %v4291_v18 = vpop.f32.mrf.mxu1 }
 0xbf0   : > { %v3337_v30 = vpop.f32.mrf.mxu1 }
 0xbf6   : > { %v4294_v14 = vpop.f32.mrf.mxu1 }
 0xbf8   : > { %v3347_v8 = vpop.f32.mrf.mxu1 }
 0xbfe   : > { %v4297_v39 = vpop.f32.mrf.mxu1 }
 0xc00   : > { %v3357_v11 = vpop.f32.mrf.mxu1 }
 0xc06   : > { %v4300_v41 = vpop.f32.mrf.mxu1 }
 0xc08   : > { %v3367_v21 = vpop.f32.mrf.mxu1 }
 0xc0e   : > { %v4303_v10 = vpop.f32.mrf.mxu1 }
 0xc10   : > { %v3377_v3 = vpop.f32.mrf.mxu1 }
 0xc16   : > { %v4306_v43 = vpop.f32.mrf.mxu1 }
 0xc18   : > { %v3387_v57 = vpop.f32.mrf.mxu1 }
 0xc19   : > { %3541 = vperm.xlu0 %4349, %v3387_v57  }
 0xc1d   : > { %3546 = vperm.xlu0 %4349, %v4306_v43  }
 0xc1e   : > { %v4309_v38 = vpop.f32.mrf.mxu1 }
 0xc1f   : > { %3556 = vperm.xlu1 %4350, %v4309_v38  }
 0xc20   : > { %v3397_v24 = vpop.f32.mrf.mxu1 }
 0xc21   : > { %3531 = vperm.xlu0 %4349, %v3377_v3  }
 0xc22   : > { %v3475_v42 = vpop.f32.mrf.mxu1 }
 0xc23   : > { %v6243_v0 = vrot.slane %v3475_v42, %v6561_v59 }
 0xc24   : > { %v4314_v13 = vpop.f32.mrf.mxu1 }
 0xc25   : > { %3536 = vperm.xlu0 %4349, %v4303_v10  }
 0xc29   : > { %3521 = vperm.xlu0 %4349, %v3367_v21  }
 0xc2d   : > { %3526 = vperm.xlu0 %4349, %v4300_v41  }
 0xc31   : > { %3511 = vperm.xlu0 %4349, %v3357_v11  }
 0xc35   : > { %3551 = vperm.xlu0 %4349, %v3397_v24  }
 0xc39   : > { %3516 = vperm.xlu0 %4349, %v4297_v39  }
 0xc3d   : > { %3501 = vperm.xlu0 %4349, %v3347_v8  }
 0xc41   : > { %3506 = vperm.xlu0 %4349, %v4294_v14  }
 0xc45   : > { %3491 = vperm.xlu0 %4349, %v3337_v30  }
 0xc49   : > { %3496 = vperm.xlu0 %4349, %v4291_v18  }
 0xc4d   : > { %3481 = vperm.xlu0 %4349, %v3327_v27  }
 0xc51   : > { %3486 = vperm.xlu0 %4349, %v4288_v48  }
 0xc94   : > { %v3542_v52 = vpop.permute.xlu0 %3541 }
 0xc95   : > { %v3575_v29 = vadd.f32 %v6243_v0, %v3542_v52 }
 0xc97   : > { %v3607_v60 = vmul.f32 0.2, %v3575_v29  ;;  %vm3591_vm1 = vcmp.gt.f32.partialorder %v3575_v29, 0.0 }
 0xc98   : > { %v3547_v35 = vpop.permute.xlu0 %3546 }
 0xc99   : > { %v3576_v45 = vadd.f32 %v6243_v0, %v3547_v35  ;;  %v3623_v48 = vsel %vm3591_vm1, %v3575_v29, %v3607_v60 }
 0xc9a   : > { %v3557_v17 = vpop.permute.xlu1 %3556  ;;  %v6275_v39 = vsel %vm5599_vm10, %v3623_v48, -9e+15  ;;  %vm6562_vm10 = vnez %v6477_v25 }
 0xc9b   : > { %v3578_v22 = vadd.f32 %v6243_v0, %v3557_v17  ;;  %v3608_v27 = vmul.f32 0.2, %v3576_v45  ;;  %vm3592_vm9 = vcmp.gt.f32.partialorder %v3576_v45, 0.0 }
 0xc9c   : > { %v3532_v51 = vpop.permute.xlu0 %3531 }
 0xc9d   : > { %v3610_v1 = vmul.f32 0.2, %v3578_v22  ;;  %vm3594_vm12 = vcmp.gt.f32.partialorder %v3578_v22, 0.0  ;;  %v3573_v18 = vadd.f32 %v6243_v0, %v3532_v51  ;;  %v3624_v21 = vsel %vm3592_vm9, %v3576_v45, %v3608_v27 }
 0xc9e   : > { %v6288_v43 = vsel %vm6562_vm10, %v3624_v21, -9e+15  ;;  %vm6568_vm9 = vnez %v6542_v55 }
 0xc9f   : > { %v3626_v4 = vsel %vm3594_vm12, %v3578_v22, %v3610_v1  ;;  %v3605_v11 = vmul.f32 0.2, %v3573_v18 }
 0xca0   : > { %v3537_v34 = vpop.permute.xlu0 %3536  ;;  %v6248_v44 = vsel %vm5551_vm13, %v3626_v4, -9e+15 }
 0xca1   : > { %v3574_v5 = vadd.f32 %v6243_v0, %v3537_v34  ;;  %3673 = vmax.xlane.f32.xlu1 %v6248_v44 }
 0xca3   : > { %v3606_v58 = vmul.f32 0.2, %v3574_v5  ;;  %vm3590_vm2 = vcmp.gt.f32.partialorder %v3574_v5, 0.0 }
 0xca4   : > { %v3522_v16 = vpop.permute.xlu0 %3521 }
 0xca5   : > { %v3622_v20 = vsel %vm3590_vm2, %v3574_v5, %v3606_v58  ;;  %v3571_v41 = vadd.f32 %v6243_v0, %v3522_v16  ;;  %vm6565_vm2 = vnez %v6505_v6 }
 0xca6   : > { %v6254_v23 = vsel %vm5710_vm4, %v3622_v20, -9e+15 }
 0xca7   : > { %3665 = vmax.xlane.f32.xlu1 %v6254_v23  ;;  %v3603_v50 = vmul.f32 0.2, %v3571_v41  ;;  %vm3587_vm8 = vcmp.gt.f32.partialorder %v3571_v41, 0.0 }
 0xca8   : > { %v3527_v28 = vpop.permute.xlu0 %3526 }
 0xca9   : > { %v3572_v12 = vadd.f32 %v6243_v0, %v3527_v28  ;;  %v3619_v59 = vsel %vm3587_vm8, %v3571_v41, %v3603_v50 }
 0xcaa   : > { %v6305_v32 = vsel %vm6564_vm3, %v3619_v59, -9e+15 }
 0xcab   : > { %v3604_v53 = vmul.f32 0.2, %v3572_v12  ;;  %vm3588_vm13 = vcmp.gt.f32.partialorder %v3572_v12, 0.0 }
 0xcac   : > { %v3512_v56 = vpop.permute.xlu0 %3511 }
 0xcad   : > { %v3620_v54 = vsel %vm3588_vm13, %v3572_v12, %v3604_v53  ;;  %v3569_v46 = vadd.f32 %v6243_v0, %v3512_v56 }
 0xcae   : > { %v6261_v26 = vsel %vm5774_vm5, %v3620_v54, -9e+15 }
 0xcaf   : > { %3661 = vmax.xlane.f32.xlu1 %v6261_v26  ;;  %v3601_v13 = vmul.f32 0.2, %v3569_v46  ;;  %vm3585_vm14 = vcmp.gt.f32.partialorder %v3569_v46, 0.0 }
 0xcb0   : > { %v3552_v2 = vpop.permute.xlu0 %3551 }
 0xcb1   : > { %v3577_v63 = vadd.f32 %v6243_v0, %v3552_v2  ;;  %v3617_v51 = vsel %vm3585_vm14, %v3569_v46, %v3601_v13 }
 0xcb2   : > { %v6311_v58 = vsel %vm6565_vm2, %v3617_v51, -9e+15 }
 0xcb3   : > { %v3609_v31 = vmul.f32 0.2, %v3577_v63  ;;  %vm3593_vm4 = vcmp.gt.f32.partialorder %v3577_v63, 0.0 }
 0xcb4   : > { %v3517_v47 = vpop.permute.xlu0 %3516 }
 0xcb5   : > { %v3570_v37 = vadd.f32 %v6243_v0, %v3517_v47  ;;  %v3625_v15 = vsel %vm3593_vm4, %v3577_v63, %v3609_v31  ;;  %vm6566_vm4 = vnez %v6519_v40 }
 0xcb6   : > { %v6269_v19 = vsel %vm5576_vm7, %v3625_v15, -9e+15  ;;  %vm3589_vm7 = vcmp.gt.f32.partialorder %v3573_v18, 0.0 }
 0xcb7   : > { %v3602_v30 = vmul.f32 0.2, %v3570_v37  ;;  %3671 = vmax.xlane.f32.xlu0 %v6269_v19  ;;  %vm3586_vm5 = vcmp.gt.f32.partialorder %v3570_v37, 0.0  ;;  %v3621_v38 = vsel %vm3589_vm7, %v3573_v18, %v3605_v11 }
 0xcb8   : > { %v3502_v14 = vpop.permute.xlu0 %3501  ;;  %v6293_v52 = vsel %vm6563_vm6, %v3621_v38, -9e+15 }
 0xcb9   : > { %v3618_v8 = vsel %vm3586_vm5, %v3570_v37, %v3602_v30  ;;  %v3567_v25 = vadd.f32 %v6243_v0, %v3502_v14  ;;  %vm6567_vm5 = vnez %v6530_v33 }
 0xcba   : > { %v6279_v36 = vsel %vm5836_vm11, %v3618_v8, -9e+15 }
 0xcbb   : > { %3667 = vmax.xlane.f32.xlu0 %v6275_v39  ;;  %3657 = vmax.xlane.f32.xlu1 %v6279_v36  ;;  %v3599_v1 = vmul.f32 0.2, %v3567_v25  ;;  %vm3583_vm12 = vcmp.gt.f32.partialorder %v3567_v25, 0.0 }
 0xcbc   : > { %v3507_v10 = vpop.permute.xlu0 %3506 }
 0xcbd   : > { %v3568_v3 = vadd.f32 %v6243_v0, %v3507_v10  ;;  %v3615_v28 = vsel %vm3583_vm12, %v3567_v25, %v3599_v1 }
 0xcbe   : > { %v6323_v6 = vsel %vm6566_vm4, %v3615_v28, -9e+15 }
 0xcbf   : > { %v3600_v57 = vmul.f32 0.2, %v3568_v3  ;;  %3669 = vmax.xlane.f32.xlu0 %v6288_v43  ;;  %vm3584_vm11 = vcmp.gt.f32.partialorder %v3568_v3, 0.0 }
 0xcc0   : > { %v3492_v24 = vpop.permute.xlu0 %3491 }
 0xcc1   : > { %v3616_v42 = vsel %vm3584_vm11, %v3568_v3, %v3600_v57  ;;  %v3565_v49 = vadd.f32 %v6243_v0, %v3492_v24 }
 0xcc2   : > { %v6297_v35 = vsel %vm5908_vm15, %v3616_v42, -9e+15 }
 0xcc3   : > { %3663 = vmax.xlane.f32.xlu0 %v6293_v52  ;;  %3653 = vmax.xlane.f32.xlu1 %v6297_v35  ;;  %v3597_v16 = vmul.f32 0.2, %v3565_v49  ;;  %vm3581_vm13 = vcmp.gt.f32.partialorder %v3565_v49, 0.0 }
 0xcc4   : > { %v3497_v17 = vpop.permute.xlu0 %3496 }
 0xcc5   : > { %v3566_v22 = vadd.f32 %v6243_v0, %v3497_v17  ;;  %v3613_v54 = vsel %vm3581_vm13, %v3565_v49, %v3597_v16 }
 0xcc6   : > { %v6328_v2 = vsel %vm6567_vm5, %v3613_v54, -9e+15 }
 0xcc7   : > { %v3598_v4 = vmul.f32 0.2, %v3566_v22  ;;  %3659 = vmax.xlane.f32.xlu0 %v6305_v32  ;;  %vm3582_vm15 = vcmp.gt.f32.partialorder %v3566_v22, 0.0 }
 0xcc8   : > { %v3482_v34 = vpop.permute.xlu0 %3481 }
 0xcc9   : > { %v3614_v5 = vsel %vm3582_vm15, %v3566_v22, %v3598_v4  ;;  %v3563_v20 = vadd.f32 %v6243_v0, %v3482_v34 }
 0xcca   : > { %v6315_v9 = vsel %vm5966_vm0, %v3614_v5, -9e+15 }
 0xccb   : > { %3655 = vmax.xlane.f32.xlu0 %v6311_v58  ;;  %3649 = vmax.xlane.f32.xlu1 %v6315_v9  ;;  %v3595_v56 = vmul.f32 0.2, %v3563_v20  ;;  %vm3579_vm1 = vcmp.gt.f32.partialorder %v3563_v20, 0.0 }
 0xccc   : > { %v3487_v12 = vpop.permute.xlu0 %3486 }
 0xccd   : > { %v3564_v53 = vadd.f32 %v6243_v0, %v3487_v12  ;;  %v3611_v40 = vsel %vm3579_vm1, %v3563_v20, %v3595_v56  ;;  %v6569_v0 = vld [vmem:[#allocation3_spill] sm:$0xff] }
 0xcce   : > { %vm6570_vm7 = vnez %v6569_v0 }
 0xccf   : > { %v3596_v7 = vmul.f32 0.2, %v3564_v53  ;;  %3651 = vmax.xlane.f32.xlu0 %v6323_v6  ;;  %vm3580_vm0 = vcmp.gt.f32.partialorder %v3564_v53, 0.0  ;;  %v6338_v60 = vsel %vm6570_vm7, %v3611_v40, -9e+15 }
 0xcd1   : > { %v3612_v29 = vsel %vm3580_vm0, %v3564_v53, %v3596_v7 }
 0xcd2   : > { %v6332_v63 = vsel %vm6568_vm9, %v3612_v29, -9e+15 }
 0xcd3   : > { %3647 = vmax.xlane.f32.xlu0 %v6328_v2  ;;  %3645 = vmax.xlane.f32.xlu1 %v6332_v63 }
 0xcd7   : > { %3643 = vmax.xlane.f32.xlu0 %v6338_v60 }
 0xd2a   : > { %v3674_v45 = vpop.xlane.xlu1 %3673 }
 0xd2b   : > { %v3690_v33 = vsub.f32 %v6248_v44, %v3674_v45 }
 0xd2d   : > { %v3721_v31 = vmul.f32 1.442695, %v3690_v33 }
 0xd2f   : > { %4483 = vpow2.f32 %v3721_v31 }
 0xd30   : > { %v3666_v27 = vpop.xlane.xlu1 %3665 }
 0xd31   : > { %v3686_v14 = vsub.f32 %v6254_v23, %v3666_v27 }
 0xd33   : > { %v3713_v21 = vmul.f32 1.442695, %v3686_v14 }
 0xd38   : > { %v3662_v44 = vpop.xlane.xlu1 %3661 }
 0xd39   : > { %v3684_v10 = vsub.f32 %v6261_v26, %v3662_v44 }
 0xd3c   : > { %v6342_v47 = vpop.eup %4483 }
 0xd3d   : > { %3753 = vadd.xlane.f32.xlu1 %v6342_v47 }
 0xd40   : > { %v3672_v55 = vpop.xlane.xlu0 %3671 }
 0xd41   : > { %v3689_v37 = vsub.f32 %v6269_v19, %v3672_v55 }
 0xd43   : > { %v3719_v15 = vmul.f32 1.442695, %v3689_v37 }
 0xd44   : > { %v3668_v48 = vpop.xlane.xlu0 %3667  ;;  %v3658_v19 = vpop.xlane.xlu1 %3657 }
 0xd45   : > { %4485 = vpow2.f32 %v3719_v15  ;;  %v3687_v18 = vsub.f32 %v6275_v39, %v3668_v48  ;;  %v3709_v39 = vmul.f32 1.442695, %v3684_v10  ;;  %v3682_v57 = vsub.f32 %v6279_v36, %v3658_v19 }
 0xd47   : > { %v3715_v30 = vmul.f32 1.442695, %v3687_v18  ;;  %v3705_v26 = vmul.f32 1.442695, %v3682_v57 }
 0xd48   : > { %v3670_v8 = vpop.xlane.xlu0 %3669 }
 0xd49   : > { %4487 = vpow2.f32 %v3715_v30  ;;  %v3688_v11 = vsub.f32 %v6288_v43, %v3670_v8 }
 0xd4b   : > { %v3717_v41 = vmul.f32 1.442695, %v3688_v11 }
 0xd4c   : > { %v3664_v3 = vpop.xlane.xlu0 %3663  ;;  %v3654_v38 = vpop.xlane.xlu1 %3653 }
 0xd4d   : > { %4489 = vpow2.f32 %v3717_v41  ;;  %v3685_v46 = vsub.f32 %v6293_v52, %v3664_v3  ;;  %v3680_v13 = vsub.f32 %v6297_v35, %v3654_v38 }
 0xd4e   : > { %4491 = vpow2.f32 %v3713_v21 }
 0xd4f   : > { %v3711_v50 = vmul.f32 1.442695, %v3685_v46  ;;  %v3701_v22 = vmul.f32 1.442695, %v3680_v13 }
 0xd50   : > { %v3660_v23 = vpop.xlane.xlu0 %3659 }
 0xd51   : > { %4493 = vpow2.f32 %v3711_v50  ;;  %v3683_v24 = vsub.f32 %v6305_v32, %v3660_v23 }
 0xd52   : > { %v6353_v43 = vpop.eup %4485  ;;  %4495 = vpow2.f32 %v3709_v39 }
 0xd53   : > { %v3707_v42 = vmul.f32 1.442695, %v3683_v24  ;;  %3751 = vadd.xlane.f32.xlu0 %v6353_v43 }
 0xd54   : > { %v3656_v52 = vpop.xlane.xlu0 %3655  ;;  %v3650_v59 = vpop.xlane.xlu1 %3649 }
 0xd55   : > { %4497 = vpow2.f32 %v3707_v42  ;;  %v3681_v25 = vsub.f32 %v6311_v58, %v3656_v52  ;;  %v3678_v32 = vsub.f32 %v6315_v9, %v3650_v59 }
 0xd56   : > { %v6358_v36 = vpop.eup %4487  ;;  %4499 = vpow2.f32 %v3705_v26 }
 0xd57   : > { %v3703_v17 = vmul.f32 1.442695, %v3681_v25  ;;  %3747 = vadd.xlane.f32.xlu0 %v6358_v36  ;;  %v3697_v4 = vmul.f32 1.442695, %v3678_v32 }
 0xd58   : > { %v3652_v51 = vpop.xlane.xlu0 %3651 }
 0xd59   : > { %4501 = vpow2.f32 %v3703_v17  ;;  %v3679_v1 = vsub.f32 %v6323_v6, %v3652_v51 }
 0xd5a   : > { %v6363_v49 = vpop.eup %4489  ;;  %4503 = vpow2.f32 %v3701_v22 }
 0xd5b   : > { %v3699_v35 = vmul.f32 1.442695, %v3679_v1  ;;  %3749 = vadd.xlane.f32.xlu1 %v6363_v49  ;;  %v6366_v58 = vpop.eup %4491 }
 0xd5c   : > { %v3648_v34 = vpop.xlane.xlu0 %3647  ;;  %v3646_v5 = vpop.xlane.xlu1 %3645 }
 0xd5d   : > { %4505 = vpow2.f32 %v3699_v35  ;;  %v3677_v16 = vsub.f32 %v6328_v2, %v3648_v34  ;;  %v3676_v9 = vsub.f32 %v6332_v63, %v3646_v5 }
 0xd5e   : > { %v6370_v20 = vpop.eup %4493  ;;  %4507 = vpow2.f32 %v3697_v4 }
 0xd5f   : > { %v3695_v28 = vmul.f32 1.442695, %v3677_v16  ;;  %3745 = vadd.xlane.f32.xlu1 %v6366_v58  ;;  %3743 = vadd.xlane.f32.xlu0 %v6370_v20  ;;  %v3693_v12 = vmul.f32 1.442695, %v3676_v9  ;;  %v6374_v6 = vpop.eup %4495 }
 0xd60   : > { %v3644_v53 = vpop.xlane.xlu0 %3643 }
 0xd61   : > { %4509 = vpow2.f32 %v3695_v28  ;;  %v3675_v56 = vsub.f32 %v6338_v60, %v3644_v53 }
 0xd62   : > { %v6377_v7 = vpop.eup %4497  ;;  %4511 = vpow2.f32 %v3693_v12 }
 0xd63   : > { %v3691_v54 = vmul.f32 1.442695, %v3675_v56  ;;  %3741 = vadd.xlane.f32.xlu1 %v6374_v6  ;;  %3739 = vadd.xlane.f32.xlu0 %v6377_v7  ;;  %v6381_v29 = vpop.eup %4499 }
 0xd65   : > { %4513 = vpow2.f32 %v3691_v54 }
 0xd66   : > { %v6383_v2 = vpop.eup %4501 }
 0xd67   : > { %3737 = vadd.xlane.f32.xlu1 %v6381_v29  ;;  %3735 = vadd.xlane.f32.xlu0 %v6383_v2  ;;  %v6387_v63 = vpop.eup %4503 }
 0xd6a   : > { %v6389_v40 = vpop.eup %4505 }
 0xd6b   : > { %3733 = vadd.xlane.f32.xlu1 %v6387_v63  ;;  %3731 = vadd.xlane.f32.xlu0 %v6389_v40  ;;  %v6393_v0 = vpop.eup %4507 }
 0xd6e   : > { %v6395_v60 = vpop.eup %4509 }
 0xd6f   : > { %3729 = vadd.xlane.f32.xlu1 %v6393_v0  ;;  %3727 = vadd.xlane.f32.xlu0 %v6395_v60  ;;  %v6399_v45 = vpop.eup %4511 }
 0xd72   : > { %v6401_v33 = vpop.eup %4513 }
 0xd73   : > { %3725 = vadd.xlane.f32.xlu1 %v6399_v45  ;;  %3723 = vadd.xlane.f32.xlu0 %v6401_v33 }
 0xdc6   : > { %v3754_v31 = vpop.xlane.xlu1 %3753 }
 0xdc7   : > { %4515 = vrcp.f32 %v3754_v31 }
 0xdd4   : > { %v4516_v48 = vpop.eup %4515 }
 0xdd5   : > { %v3786_v8 = vmul.f32 %v4516_v48, %v6342_v47 }
 0xddc   : > { %v3752_v55 = vpop.xlane.xlu0 %3751 }
 0xddd   : > { %4517 = vrcp.f32 %v3752_v55 }
 0xde0   : > { %v3748_v37 = vpop.xlane.xlu0 %3747 }
 0xde1   : > { %4519 = vrcp.f32 %v3748_v37 }
 0xde4   : > { %v3750_v15 = vpop.xlane.xlu1 %3749 }
 0xde5   : > { %4521 = vrcp.f32 %v3750_v15 }
 0xde8   : > { %v3746_v27 = vpop.xlane.xlu1 %3745  ;;  %v3744_v18 = vpop.xlane.xlu0 %3743 }
 0xde9   : > { %4523 = vrcp.f32 %v3746_v27 }
 0xdea   : > { %v4518_v30 = vpop.eup %4517  ;;  %4525 = vrcp.f32 %v3744_v18 }
 0xdeb   : > { %v3785_v14 = vmul.f32 %v4518_v30, %v6353_v43 }
 0xdec   : > { %v3742_v44 = vpop.xlane.xlu1 %3741  ;;  %v3740_v41 = vpop.xlane.xlu0 %3739 }
 0xded   : > { %v3795_v11 = vpack.c.bf16 %v3786_v8, %v3785_v14  ;;  %4527 = vrcp.f32 %v3742_v44 }
 0xdee   : > { %v4520_v21 = vpop.eup %4519  ;;  %4529 = vrcp.f32 %v3740_v41 }
 0xdef   : > { %4316 = vmatpush3.bf16.xpose.msra.mxu0 %v3795_v11  ;;  %v3783_v3 = vmul.f32 %v4520_v21, %v6358_v36 }
 0xdf0   : > { %4317 = vmatprep.subr.bf16.mxu0 %v6543_v61  ;;  %v3738_v46 = vpop.xlane.xlu1 %3737  ;;  %v3736_v57 = vpop.xlane.xlu0 %3735 }
 0xdf1   : > { %4531 = vrcp.f32 %v3738_v46 }
 0xdf2   : > { %v4522_v10 = vpop.eup %4521  ;;  %4533 = vrcp.f32 %v3736_v57 }
 0xdf3   : > { %v3784_v19 = vmul.f32 %v4522_v10, %v6363_v49 }
 0xdf4   : > { %v3734_v43 = vpop.xlane.xlu1 %3733  ;;  %v3732_v13 = vpop.xlane.xlu0 %3731 }
 0xdf5   : > { %v3794_v50 = vpack.c.bf16 %v3784_v19, %v3783_v3  ;;  %4535 = vrcp.f32 %v3734_v43 }
 0xdf6   : > { %v4524_v39 = vpop.eup %4523  ;;  %4537 = vrcp.f32 %v3732_v13 }
 0xdf7   : > { %v4526_v23 = vpop.eup %4525  ;;  %4318 = vmatpush3.bf16.xpose.msra.mxu0 %v3794_v50  ;;  %v3782_v38 = vmul.f32 %v4524_v39, %v6366_v58 }
 0xdf8   : > { %4319 = vmatprep.subr.bf16.mxu0 %v6543_v61  ;;  %v3781_v47 = vmul.f32 %v4526_v23, %v6370_v20  ;;  %v3730_v36 = vpop.xlane.xlu1 %3729  ;;  %v3728_v32 = vpop.xlane.xlu0 %3727 }
 0xdf9   : > { %4539 = vrcp.f32 %v3730_v36 }
 0xdfa   : > { %v4528_v24 = vpop.eup %4527  ;;  %v3793_v42 = vpack.c.bf16 %v3782_v38, %v3781_v47  ;;  %4541 = vrcp.f32 %v3728_v32 }
 0xdfb   : > { %v4530_v26 = vpop.eup %4529  ;;  %v3780_v25 = vmul.f32 %v4528_v24, %v6374_v6 }
 0xdfc   : > { %v3779_v52 = vmul.f32 %v4530_v26, %v6377_v7  ;;  %v3726_v35 = vpop.xlane.xlu1 %3725  ;;  %v3724_v5 = vpop.xlane.xlu0 %3723 }
 0xdfd   : > { %4543 = vrcp.f32 %v3726_v35 }
 0xdfe   : > { %v4532_v59 = vpop.eup %4531  ;;  %v3792_v17 = vpack.c.bf16 %v3780_v25, %v3779_v52  ;;  %4545 = vrcp.f32 %v3724_v5 }
 0xdff   : > { %4320 = vmatpush3.bf16.xpose.msra.mxu0 %v3793_v42  ;;  %v4534_v22 = vpop.eup %4533  ;;  %v3778_v1 = vmul.f32 %v4532_v59, %v6381_v29 }
 0xe00   : > { %4321 = vmatprep.subr.bf16.mxu0 %v6543_v61  ;;  %v3777_v51 = vmul.f32 %v4534_v22, %v6383_v2 }
 0xe02   : > { %v4536_v49 = vpop.eup %4535  ;;  %v3791_v4 = vpack.c.bf16 %v3778_v1, %v3777_v51 }
 0xe03   : > { %v4538_v34 = vpop.eup %4537  ;;  %v3776_v16 = vmul.f32 %v4536_v49, %v6387_v63  ;;  %v3787_v63 = vpack.c.bf16 %v6216_v62, %v6216_v62 }
 0xe04   : > { %v3775_v58 = vmul.f32 %v4538_v34, %v6389_v40 }
 0xe06   : > { %v4540_v9 = vpop.eup %4539  ;;  %v3790_v20 = vpack.c.bf16 %v3776_v16, %v3775_v58 }
 0xe07   : > { %4322 = vmatpush3.bf16.xpose.msra.mxu0 %v3792_v17  ;;  %v4542_v28 = vpop.eup %4541  ;;  %v3774_v53 = vmul.f32 %v4540_v9, %v6393_v0 }
 0xe08   : > { %4323 = vmatprep.subr.bf16.mxu0 %v6543_v61  ;;  %v3773_v12 = vmul.f32 %v4542_v28, %v6395_v60 }
 0xe0a   : > { %v4544_v6 = vpop.eup %4543  ;;  %v3789_v56 = vpack.c.bf16 %v3774_v53, %v3773_v12 }
 0xe0b   : > { %v4546_v7 = vpop.eup %4545  ;;  %v3772_v29 = vmul.f32 %v4544_v6, %v6399_v45 }
 0xe0c   : > { %v3771_v54 = vmul.f32 %v4546_v7, %v6401_v33 }
 0xe0e   : > { %v3788_v2 = vpack.c.bf16 %v3772_v29, %v3771_v54 }
 0xe0f   : > { %4324 = vmatpush3.bf16.xpose.msra.mxu0 %v3791_v4 }
 0xe10   : > { %4325 = vmatprep.subr.bf16.mxu0 %v6543_v61 }
 0xe17   : > { %4326 = vmatpush3.bf16.xpose.msra.mxu0 %v3790_v20 }
 0xe18   : > { %4327 = vmatprep.subr.bf16.mxu0 %v6543_v61 }
 0xe1f   : > { %4328 = vmatpush3.bf16.xpose.msra.mxu0 %v3789_v56 }
 0xe20   : > { %4329 = vmatprep.subr.bf16.mxu0 %v6543_v61 }
 0xe27   : > { %4330 = vmatpush3.bf16.xpose.msra.mxu0 %v3788_v2 }
 0xe2e   : > { %4332 = vmatmul.mubr.bf16.vlgmr.msra.gmra.mxu0 %v3787_v63 }
 0xeee   : > { %v3830_v40 = vpop.f32.mrf.mxu0 }
 0xeef   : > { %v3837_v60 = vmin.f32 %v3830_v40, 0.0  ;;  %vm3836_vm10 = vcmp.gt.f32.partialorder %v3830_v40, 0.0 }
 0xef0   : > { %v4333_v0 = vpop.f32.mrf.mxu0 }
 0xef1   : > { %v3838_v31 = vmul.f32 1.442695, %v3837_v60 }
 0xef2   : > { %v3833_v55 = vpop.f32.mrf.mxu0 }
 0xef3   : > { %4547 = vpow2.f32 %v3838_v31 }
 0xef4   : > { %v4334_v37 = vpop.f32.mrf.mxu0 }
 0xf00   : > { %v4548_v15 = vpop.eup %4547 }
 0xf01   : > { %v3991_v61 = vadd.f32 -1.0, %v4548_v15 }
 0xf03   : > { %v3841_v45 = vsel %vm3836_vm10, %v3830_v40, %v3991_v61 }
 0xf04   : > { %3842 = vst [vmem:[%s219_s20] sm:$0xff] %v3841_v45 }
 0xf05 PF: > { %s15_s18 = sadd.s32 1, %s4557_s18  }
 0xf06   : > { %p12_p4 = scmp.ge.s32.totalorder %s15_s18, 4  }
 0xf08   :  { %14 = sbr.rel (!%p12_p4) target bundleno = 1 (0x1), region = 70 }

// kernel: gcn_unit_forward.5
= control target key start
LH: loop header
LB: loop body
LE: loop exit
PB: predicated region body
PF: predicated region fallthrough
CT: control target
= control target key end

     0   :  { %vm134_vm0 = vcmask 1043456   ;;  %v291_v2 = vmov 0   ;;  %vm130_vm1 = vcmask 588800   ;;  %s384_s1 = inlined_call_operand.vmem [shape: bf16[72,512], index: 1, kind: input, shape index: {}]   ;;  %s385_s2 = inlined_call_operand.vmem [shape: f32[8,1], index: 2, kind: input, shape index: {}]   ;;  %s386_s0 = inlined_call_operand.vmem [shape: bf16[8,72], index: 0, kind: input, shape index: {}]   ;;  %s387_s3 = inlined_call_operand.vmem [shape: f32[8,512], index: 3, kind: output, shape index: {}]  }
   0x1   :  { %v32_v0 = vld [vmem:[%s384_s1 + $0x80] sm:$0xff]  ;;  %v33_v1 = vld [vmem:[%s384_s1 + $0x88] sm:$0xff]  ;;  %179 = vmatprep.mubr.bf16.mxu0 %v291_v2  ;;  %220 = vmatprep.mubr.bf16.mxu1 %v291_v2 }
   0x2   :  { %v254_v3 = vcombine.high %v32_v0, %v32_v0  ;;  %v256_v4 = vcombine.high %v33_v1, %v33_v1  ;;  %v253_v5 = vcombine.low %v32_v0, %v32_v0  ;;  %v255_v6 = vcombine.low %v33_v1, %v33_v1  ;;  %v267_v7 = vld [vmem:[%s384_s1 + $0x64] ss:$16 sps:$4 sm:$0xff]   ;;  %262 = vset.pattern.permute.xlu0 %v291_v2  ;;  %v269_v8 = vld [vmem:[%s384_s1 + $0x6c] ss:$16 sps:$4 sm:$0xff]   ;;  %v271_v11 = vld [vmem:[%s384_s1 + $0x60] ss:$16 sps:$4 sm:$0xff]  }
   0x3   :  { %v272_v12 = vld [vmem:[%s384_s1 + $0x68] ss:$16 sps:$4 sm:$0xff]   ;;  %v273_v13 = vld [vmem:[%s384_s1 + $0x44] ss:$16 sps:$4 sm:$0xff]   ;;  %v275_v14 = vld [vmem:[%s384_s1 + $0x4c] ss:$16 sps:$4 sm:$0xff]  }
   0x4   :  { %257 = vmatprep.subr.msk.bf16.mxu0 %vm134_vm0, %v254_v3  ;;  %259 = vmatprep.subr.msk.bf16.mxu1 %vm134_vm0, %v256_v4  ;;  %v136_v9 = vsel %vm134_vm0, %v253_v5, 0  ;;  %v142_v10 = vsel %vm134_vm0, %v255_v6, 0  ;;  %v277_v15 = vld [vmem:[%s384_s1 + $0x40] ss:$16 sps:$4 sm:$0xff]   ;;  %v278_v16 = vld [vmem:[%s384_s1 + $0x48] ss:$16 sps:$4 sm:$0xff]  }
   0x5   :  { %154 = vmatpush1.bf16.msra.mxu0 %v136_v9  ;;  %195 = vmatpush1.bf16.msra.mxu1 %v142_v10  ;;  %v279_v17 = vld [vmem:[%s384_s1 + $0x24] ss:$16 sps:$4 sm:$0xff]   ;;  %v281_v18 = vld [vmem:[%s384_s1 + $0x2c] ss:$16 sps:$4 sm:$0xff]   ;;  %v283_v20 = vld [vmem:[%s384_s1 + $0x20] ss:$16 sps:$4 sm:$0xff]  }
   0x6   :  { %155 = vmatprep.subr.bf16.mxu0 %v267_v7  ;;  %196 = vmatprep.subr.bf16.mxu1 %v269_v8  ;;  %v34_v19 = vld [vmem:[%s385_s2] sm:$0xff]  ;;  %v284_v21 = vld [vmem:[%s384_s1 + $0x28] ss:$16 sps:$4 sm:$0xff]   ;;  %v287_v23 = vld [vmem:[%s384_s1 + $0xc] ss:$16 sps:$4 sm:$0xff]  }
   0x7   :  { %v285_v22 = vld [vmem:[%s384_s1 + $0x4] ss:$16 sps:$4 sm:$0xff]   ;;  %37 = vperm.xlu0 %262, %v34_v19   ;;  %v289_v24 = vld [vmem:[%s384_s1] ss:$16 sps:$4 sm:$0xff]   ;;  %v290_v25 = vld [vmem:[%s384_s1 + $0x8] ss:$16 sps:$4 sm:$0xff]  }
   0x8   :  { %v15_v26 = vld [vmem:[%s386_s0] sm:$0xf] }
   0x9   :  { %156 = vmatpush1.bf16.msra.mxu0 %v271_v11  ;;  %197 = vmatpush1.bf16.msra.mxu1 %v272_v12 }
   0xa   :  { %157 = vmatprep.subr.bf16.mxu0 %v273_v13  ;;  %198 = vmatprep.subr.bf16.mxu1 %v275_v14 }
   0xd   :  { %158 = vmatpush1.bf16.msra.mxu0 %v277_v15  ;;  %199 = vmatpush1.bf16.msra.mxu1 %v278_v16 }
   0xe   :  { %159 = vmatprep.subr.bf16.mxu0 %v279_v17  ;;  %200 = vmatprep.subr.bf16.mxu1 %v281_v18 }
  0x11   :  { %160 = vmatpush1.bf16.msra.mxu0 %v283_v20  ;;  %201 = vmatpush1.bf16.msra.mxu1 %v284_v21 }
  0x12   :  { %161 = vmatprep.subr.bf16.mxu0 %v285_v22  ;;  %202 = vmatprep.subr.bf16.mxu1 %v287_v23 }
  0x15   :  { %162 = vmatpush1.bf16.msra.mxu0 %v289_v24  ;;  %203 = vmatpush1.bf16.msra.mxu1 %v290_v25 }
  0x18   :  { %258 = vmatmul.mubr.msk.bf16.vlgmr.msra.gmra.mxu0 %vm130_vm1, %v15_v26  ;;  %260 = vmatmul.mubr.msk.bf16.vlgmr.msra.gmra.mxu1 %vm130_vm1, %v15_v26 }
  0x82   :  { %v38_v27 = vpop.permute.xlu0 %37 }
  0xd8   :  { %v181_v28 = vpop.f32.mrf.mxu0  ;;  %v222_v29 = vpop.f32.mrf.mxu1 }
  0xd9   :  { %v182_v30 = vadd.f32 %v181_v28, %v38_v27  ;;  %v223_v31 = vadd.f32 %v222_v29, %v38_v27 }
  0xda   :  { %v183_v32 = vpop.f32.mrf.mxu0  ;;  %v224_v33 = vpop.f32.mrf.mxu1 }
  0xdb   :  { %229 = vst [vmem:[%s387_s3] sm:$0xff] %v182_v30  ;;  %231 = vst [vmem:[%s387_s3 + $0x10] sm:$0xff] %v223_v31  ;;  %v184_v34 = vadd.f32 %v183_v32, %v38_v27  ;;  %v225_v35 = vadd.f32 %v224_v33, %v38_v27 }
  0xdc   :  { %v185_v36 = vpop.f32.mrf.mxu0  ;;  %v226_v37 = vpop.f32.mrf.mxu1 }
  0xdd   :  { %230 = vst [vmem:[%s387_s3 + $0x8] sm:$0xff] %v184_v34  ;;  %232 = vst [vmem:[%s387_s3 + $0x18] sm:$0xff] %v225_v35 }
  0xde   :  { %v186_v38 = vpop.f32.mrf.mxu0  ;;  %v227_v39 = vpop.f32.mrf.mxu1 }

</bundles_post_ra>
